<compile_context>
chip_gen: v7x
topology: tpu7x:2x2x1
jax: 0.10.0
libtpu: 0.0.40
codegen_flags: <defaults>
</compile_context>

<pallas_src>
import jax
import jax.numpy as jnp
from jax.experimental import pallas as pl
from jax.experimental.pallas import tpu as pltpu

LEAKY_SLOPE = 0.01   # nn.LeakyReLU default negative_slope
CONV_K = 8           # kernel_size=8 for every Conv1d
CONV_PAD = 4         # padding=4 for every Conv1d

# MXU operand dtype for every matmul.  Accumulation stays float32 via
# preferred_element_type; bias/LeakyReLU epilogue stays float32.
MATMUL_DTYPE = jnp.bfloat16

BIAS_SLAB_WIDTH = 256    # widest bias (conv1 layers)
FC_WIDTH = 128           # hidden width of the FC head
FLAT_C = 64              # channels entering the flatten (conv3 output)


def _round_up(n, m):
    return ((n + m - 1) // m) * m


def _leaky_relu(x):
    return jnp.where(x > 0, x, LEAKY_SLOPE * x)


def _matmul(a, w):
    # Cast LHS to the (bf16) weight dtype; accumulate in float32 on the MXU.
    return jnp.dot(a.astype(w.dtype), w, preferred_element_type=jnp.float32)


def _zero_tail(x, t_true):
    """Zero sublane rows >= t_true of a (TB, T, C) activation."""
    if t_true >= x.shape[1]:
        return x
    row = jax.lax.broadcasted_iota(jnp.int32, x.shape, 1)
    return jnp.where(row < t_true, x, 0.0)


# ----------------------------------------------------------------------------
# In-kernel building blocks (operate on traced VMEM values)
# ----------------------------------------------------------------------------
def _conv1d_lrelu(x, t_in, w_ref, bias_ref, bias_row):
    """Conv1d(k=8, s=1, p=4) + bias + LeakyReLU as one im2col MXU matmul.

    x:      (TB, T_buf, C_in) float32, rows >= t_in are zero.
    w_ref:  (K*C_in, C_out) folded weight ref (k-major, ci-minor rows), bf16.
    Returns (y, t_out): y is (TB, T_out_pad, C_out) with T_out_pad a multiple
    of 8; rows >= t_out are zeroed so they double as the next conv's right pad.
    """
    TB, T_buf, C_in = x.shape
    KC, C_out = w_ref.shape
    assert KC == CONV_K * C_in
    t_out = t_in + 2 * CONV_PAD - CONV_K + 1           # == t_in + 1
    t_out_pad = _round_up(t_out, 8)
    back = t_out_pad + CONV_K - 1 - CONV_PAD - T_buf   # extra right zeros
    assert back >= 0

    parts = [jnp.zeros((TB, CONV_PAD, C_in), jnp.float32), x]
    if back > 0:
        parts.append(jnp.zeros((TB, back, C_in), jnp.float32))
    xp = jnp.concatenate(parts, axis=1)                # (TB, t_out_pad+K-1, C_in)

    # im2col: K sublane-shifted windows concatenated along the lane axis.
    cols = jnp.concatenate(
        [xp[:, k:k + t_out_pad, :] for k in range(CONV_K)], axis=-1)
    lhs = cols.reshape(TB * t_out_pad, CONV_K * C_in)  # 8-aligned sublane merge

    y = _matmul(lhs, w_ref[...]).reshape(TB, t_out_pad, C_out)
    b = bias_ref[bias_row:bias_row + 1, 0:C_out].reshape(1, 1, C_out)
    y = _leaky_relu(y + b)
    return _zero_tail(y, t_out), t_out


def _maxpool2(x, t_in):
    """MaxPool1d(kernel=2, stride=2), floor mode (trailing element dropped).

    Static per-pair row slices + one sublane concat (no strided value slices
    or 4-D de-interleave reshapes).  Garbage tail rows of the padded buffer
    pool to garbage and are re-zeroed before the next conv reads them.
    """
    TB, T_buf, C = x.shape
    n = T_buf // 2
    t_out = t_in // 2
    pairs = [jnp.maximum(x[:, 2 * i:2 * i + 1, :], x[:, 2 * i + 1:2 * i + 2, :])
             for i in range(n)]
    y = pairs[0] if n == 1 else jnp.concatenate(pairs, axis=1)
    return _zero_tail(y, t_out), t_out


# ----------------------------------------------------------------------------
# Fused forward kernel
# ----------------------------------------------------------------------------
def fused_forward_kernel(x_ref,
                         c1a_w, c1b_w, c2a_w, c2b_w, c3a_w, c3b_w,
                         f1_w, fc_w, bias, o_ref):
    h = x_ref[...].astype(jnp.float32)                 # (TB, L, 5)
    t = h.shape[1]                                     # true sequence length

    # convolution1
    h, t = _conv1d_lrelu(h, t, c1a_w, bias, 0)
    h, t = _conv1d_lrelu(h, t, c1b_w, bias, 1)
    h, t = _maxpool2(h, t)
    # convolution2
    h, t = _conv1d_lrelu(h, t, c2a_w, bias, 2)
    h, t = _conv1d_lrelu(h, t, c2b_w, bias, 3)
    h, t = _maxpool2(h, t)
    # convolution3
    h, t = _conv1d_lrelu(h, t, c3a_w, bias, 4)
    h, t = _conv1d_lrelu(h, t, c3b_w, bias, 5)
    # h: (TB, T_pad, 64); rows >= t are zero and the matching f1_w rows are 0.

    TB, T_pad, C_f = h.shape
    assert f1_w.shape[0] == T_pad * C_f

    # fc1: contract over (t, c) as T_pad per-timestep matmuls summed in f32 —
    # avoids a sublane->lane flatten relayout entirely.
    acc = jnp.zeros((TB, FC_WIDTH), jnp.float32)
    for ti in range(T_pad):
        acc = acc + _matmul(h[:, ti, :], f1_w[ti * C_f:(ti + 1) * C_f, :])
    h = _leaky_relu(acc + bias[6:7, 0:FC_WIDTH])

    # fc2..fc5 (+ Dropout == identity at inference)
    for i in range(4):
        w = fc_w[i * FC_WIDTH:(i + 1) * FC_WIDTH, :]
        h = _leaky_relu(_matmul(h, w) + bias[7 + i:8 + i, 0:FC_WIDTH])

    # fc6, zero-padded at init to 128 output lanes (lane-dense store).
    w6 = fc_w[4 * FC_WIDTH:5 * FC_WIDTH, :]
    out = _matmul(h, w6) + bias[11:12, 0:FC_WIDTH]
    o_ref[...] = out.reshape(TB, 1, FC_WIDTH)


# ----------------------------------------------------------------------------
# Wrapper
# ----------------------------------------------------------------------------
def atom_count_cnn_forward(x, kernel_args, *, batch_tile=1):
    """x: (B, L, 5) — the PyTorch module's input (before its internal transpose)."""
    B, L, C_in = x.shape
    TB = batch_tile
    assert B % TB == 0, (B, TB)

    def _const_spec(a):
        nd = a.ndim
        return pl.BlockSpec(a.shape, lambda b, _nd=nd: (0,) * _nd)

    in_specs = [pl.BlockSpec((TB, L, C_in), lambda b: (b, 0, 0))]
    in_specs += [_const_spec(a) for a in kernel_args]

    out = pl.pallas_call(
        fused_forward_kernel,
        out_shape=jax.ShapeDtypeStruct((B, 1, FC_WIDTH), jnp.float32),
        grid=(B // TB,),
        in_specs=in_specs,
        out_specs=pl.BlockSpec((TB, 1, FC_WIDTH), lambda b: (b, 0, 0)),
        compiler_params=pltpu.CompilerParams(
            # v7x: batch tiles shard across both TensorCores; no-op on v5e/v6e.
            dimension_semantics=("parallel",),
            # ~2.3 MB bf16 weights (x2 buffered) + tiny activations: well under
            # v7x's 64 MiB physical VMEM.
            vmem_limit_bytes=32 * 1024 * 1024,
        ),
    )(x, *kernel_args)
    return out[:, 0, 0:1]                              # real output is lane 0


# ----------------------------------------------------------------------------
# One-time (init) weight re-layout + packing: torch layout -> kernel layout
# ----------------------------------------------------------------------------
def _conv_out_len(L):
    t = L + 1    # conv1a: L + 2*4 - 8 + 1
    t = t + 1    # conv1b
    t = t // 2   # maxpool1 (floor)
    t = t + 1    # conv2a
    t = t + 1    # conv2b
    t = t // 2   # maxpool2 (floor)
    t = t + 1    # conv3a
    t = t + 1    # conv3b
    return t


def prepare_kernel_params(params, length_of_sequence):
    conv_names = ("c1a", "c1b", "c2a", "c2b", "c3a", "c3b")
    args = []
    # Conv weights: torch (C_out, C_in, K) -> folded (K*C_in, C_out), bf16.
    for name in conv_names:
        w = params[name + "_w"]
        C_out, C_in, K = w.shape
        w_mat = jnp.transpose(w, (2, 1, 0)).reshape(K * C_in, C_out)
        args.append(w_mat.astype(MATMUL_DTYPE))

    fc_ws = list(params["fc_ws"])

    # fc1: torch columns are the NCW flatten (c-major, t-minor).  Permute to
    # (t-major, c-minor) to match the kernel's (TB, T, C) activation and
    # zero-pad the t axis to the kernel's 8-aligned T.
    t_flat = _conv_out_len(length_of_sequence)
    t_flat_pad = _round_up(t_flat, 8)
    w1 = fc_ws[0]                                       # (128, FLAT_C * t_flat)
    w1 = w1.reshape(FC_WIDTH, FLAT_C, t_flat).transpose(0, 2, 1)   # (128, t, c)
    w1 = jnp.pad(w1, ((0, 0), (0, t_flat_pad - t_flat), (0, 0)))
    w1 = w1.reshape(FC_WIDTH, t_flat_pad * FLAT_C).T               # (t*c, 128)
    args.append(w1.astype(MATMUL_DTYPE))

    # fc2..fc5 + fc6 (padded to 128 output lanes) packed into one slab.
    slab = [jnp.transpose(w) for w in fc_ws[1:5]]                  # (128,128) each
    w6 = jnp.pad(jnp.transpose(fc_ws[5]), ((0, 0), (0, FC_WIDTH - 1)))
    slab.append(w6)
    args.append(jnp.concatenate(slab, axis=0).astype(MATMUL_DTYPE))  # (640, 128)

    # All 12 biases packed into one (12, 256) float32 slab (f32 epilogue).
    biases = [params[n + "_b"] for n in conv_names] + list(params["fc_bs"])
    bias_slab = jnp.stack(
        [jnp.pad(b.astype(jnp.float32), (0, BIAS_SLAB_WIDTH - b.shape[0]))
         for b in biases])
    args.append(bias_slab)
    return tuple(args)


# ----------------------------------------------------------------------------
# Pure-JAX (non-Pallas) reference with PyTorch layouts/semantics
# ----------------------------------------------------------------------------
def reference_forward(x, params, matmul_dtype=jnp.float32):
    def conv_lrelu(h, w, b):
        B, T, Cin = h.shape
        Cout, _, K = w.shape
        Tout = T + 2 * CONV_PAD - K + 1
        hp = jnp.pad(h, ((0, 0), (CONV_PAD, CONV_PAD), (0, 0)))
        cols = jnp.concatenate([hp[:, k:k + Tout, :] for k in range(K)], axis=-1)
        wm = jnp.transpose(w, (2, 1, 0)).reshape(K * Cin, Cout)
        y = jnp.dot(cols.reshape(B * Tout, K * Cin).astype(matmul_dtype),
                    wm.astype(matmul_dtype),
                    preferred_element_type=jnp.float32)
        y = y.reshape(B, Tout, Cout) + b.reshape(1, 1, Cout).astype(jnp.float32)
        return jnp.where(y > 0, y, LEAKY_SLOPE * y)

    def pool(h):
        n = h.shape[1] // 2
        return jnp.maximum(h[:, 0:2 * n:2, :], h[:, 1:2 * n:2, :])

    h = x
    h = conv_lrelu(h, params["c1a_w"], params["c1a_b"])
    h = conv_lrelu(h, params["c1b_w"], params["c1b_b"])
    h = pool(h)
    h = conv_lrelu(h, params["c2a_w"], params["c2a_b"])
    h = conv_lrelu(h, params["c2b_w"], params["c2b_b"])
    h = pool(h)
    h = conv_lrelu(h, params["c3a_w"], params["c3a_b"])
    h = conv_lrelu(h, params["c3b_w"], params["c3b_b"])
    # torch: x.view(B, -1) on NCW -> transpose to (B, C, T) before flattening.
    B = h.shape[0]
    h = jnp.transpose(h, (0, 2, 1)).reshape(B, -1)
    for i in range(5):
        w, b = params["fc_ws"][i], params["fc_bs"][i]
        h = jnp.dot(h.astype(matmul_dtype), jnp.transpose(w).astype(matmul_dtype),
                    preferred_element_type=jnp.float32) + b
        h = jnp.where(h > 0, h, LEAKY_SLOPE * h)
    w, b = params["fc_ws"][5], params["fc_bs"][5]
    return jnp.dot(h.astype(matmul_dtype), jnp.transpose(w).astype(matmul_dtype),
                   preferred_element_type=jnp.float32) + b


# ----------------------------------------------------------------------------
# Deterministic synthetic parameters (weights ~ N(0, 0.05), as _create_weights)
# ----------------------------------------------------------------------------
def init_params(key, length_of_sequence, std=0.05):
    conv_defs = [
        ("c1a", (256, 5, 8)), ("c1b", (256, 256, 8)),
        ("c2a", (128, 256, 8)), ("c2b", (128, 128, 8)),
        ("c3a", (64, 128, 8)), ("c3b", (64, 64, 8)),
    ]
    out_dim = FLAT_C * _conv_out_len(length_of_sequence)
    fc_dims = [(out_dim, 128), (128, 128), (128, 128),
               (128, 128), (128, 128), (128, 1)]

    keys = list(jax.random.split(key, 2 * (len(conv_defs) + len(fc_dims))))
    params, ki = {}, 0
    for name, shape in conv_defs:
        params[name + "_w"] = std * jax.random.normal(keys[ki], shape, jnp.float32)
        ki += 1
        params[name + "_b"] = std * jax.random.normal(keys[ki], (shape[0],), jnp.float32)
        ki += 1
    fc_ws, fc_bs = [], []
    for d_in, d_out in fc_dims:
        fc_ws.append(std * jax.random.normal(keys[ki], (d_out, d_in), jnp.float32))
        ki += 1
        fc_bs.append(std * jax.random.normal(keys[ki], (d_out,), jnp.float32))
        ki += 1
    params["fc_ws"], params["fc_bs"] = fc_ws, fc_bs
    return params


if __name__ == "__main__":
    B = 2        # batch_size
    L = 16       # length_peptide_sequence
    C_IN = 5     # peptide_input_dim (Conv1d(5, ...) in the module)

    key = jax.random.PRNGKey(0)
    k_x, k_p = jax.random.split(key)
    x = jax.random.uniform(k_x, (B, L, C_IN), dtype=jnp.float32)

    params = init_params(k_p, L)
    kernel_args = prepare_kernel_params(params, L)   # one-time re-layout/packing

    forward = jax.jit(atom_count_cnn_forward)
    out = jax.block_until_ready(forward(x, kernel_args))

    assert out.shape == (B, 1), out.shape
    assert bool(jnp.all(jnp.isfinite(out)))

    # Correctness: tight check vs. a pure-JAX reference at the kernel's bf16
    # matmul precision, loose check vs. the float32 PyTorch-equivalent path.
    ref_bf16 = reference_forward(x, params, matmul_dtype=MATMUL_DTYPE)
    ref_f32 = reference_forward(x, params, matmul_dtype=jnp.float32)
    assert bool(jnp.allclose(out, ref_bf16, rtol=1e-2, atol=1e-3)), (out, ref_bf16)
    assert bool(jnp.allclose(out, ref_f32, rtol=2e-1, atol=5e-2)), (out, ref_f32)

    print("KERNEL_OK")
</pallas_src>

<mosaic_0001>
module attributes {stable_mosaic.version = 11 : i64} {
  func.func @fused_forward_kernel(%arg0: i32, %arg1: memref<1x16x5xf32, #tpu.memory_space<vmem>>, %arg2: memref<40x256xbf16, #tpu.memory_space<vmem>>, %arg3: memref<2048x256xbf16, #tpu.memory_space<vmem>>, %arg4: memref<2048x128xbf16, #tpu.memory_space<vmem>>, %arg5: memref<1024x128xbf16, #tpu.memory_space<vmem>>, %arg6: memref<1024x64xbf16, #tpu.memory_space<vmem>>, %arg7: memref<512x64xbf16, #tpu.memory_space<vmem>>, %arg8: memref<512x128xbf16, #tpu.memory_space<vmem>>, %arg9: memref<640x128xbf16, #tpu.memory_space<vmem>>, %arg10: memref<12x256xf32, #tpu.memory_space<vmem>>, %arg11: memref<1x1x128xf32, #tpu.memory_space<vmem>>) attributes {dimension_semantics = [#tpu.dimension_semantics<parallel>], iteration_bounds = array<i64: 2>, scalar_prefetch = 0 : i64, scratch_operands = 0 : i64, tpu.core_type = #tpu.core_type<tc>, window_params = [{transform_indices = @transform_0, window_bounds = array<i64: 1, 16, 5>}, {pipeline_mode = #tpu.pipeline_mode<synchronous>, transform_indices = @transform_1, window_bounds = array<i64: 40, 256>}, {pipeline_mode = #tpu.pipeline_mode<synchronous>, transform_indices = @transform_2, window_bounds = array<i64: 2048, 256>}, {pipeline_mode = #tpu.pipeline_mode<synchronous>, transform_indices = @transform_3, window_bounds = array<i64: 2048, 128>}, {pipeline_mode = #tpu.pipeline_mode<synchronous>, transform_indices = @transform_4, window_bounds = array<i64: 1024, 128>}, {pipeline_mode = #tpu.pipeline_mode<synchronous>, transform_indices = @transform_5, window_bounds = array<i64: 1024, 64>}, {pipeline_mode = #tpu.pipeline_mode<synchronous>, transform_indices = @transform_6, window_bounds = array<i64: 512, 64>}, {pipeline_mode = #tpu.pipeline_mode<synchronous>, transform_indices = @transform_7, window_bounds = array<i64: 512, 128>}, {pipeline_mode = #tpu.pipeline_mode<synchronous>, transform_indices = @transform_8, window_bounds = array<i64: 640, 128>}, {pipeline_mode = #tpu.pipeline_mode<synchronous>, transform_indices = @transform_9, window_bounds = array<i64: 12, 256>}, {transform_indices = @transform_10, window_bounds = array<i64: 1, 1, 128>}]} {
    %c0 = arith.constant 0 : index
    %c0_0 = arith.constant 0 : index
    %c0_1 = arith.constant 0 : index
    %0 = vector.load %arg1[%c0, %c0_0, %c0_1] : memref<1x16x5xf32, #tpu.memory_space<vmem>>, vector<1x16x5xf32>
    %cst = arith.constant 0.000000e+00 : f32
    %1 = vector.broadcast %cst : f32 to vector<1x4x5xf32>
    %cst_2 = arith.constant 0.000000e+00 : f32
    %2 = vector.broadcast %cst_2 : f32 to vector<1x11x5xf32>
    %3 = tpu.concatenate %1, %0, %2 in 1 : vector<1x4x5xf32>, vector<1x16x5xf32>, vector<1x11x5xf32> -> vector<1x31x5xf32>
    %4 = vector.extract_strided_slice %3 {offsets = [0, 0, 0], sizes = [1, 24, 5], strides = [1, 1, 1]} : vector<1x31x5xf32> to vector<1x24x5xf32>
    %5 = vector.extract_strided_slice %3 {offsets = [0, 1, 0], sizes = [1, 24, 5], strides = [1, 1, 1]} : vector<1x31x5xf32> to vector<1x24x5xf32>
    %6 = vector.extract_strided_slice %3 {offsets = [0, 2, 0], sizes = [1, 24, 5], strides = [1, 1, 1]} : vector<1x31x5xf32> to vector<1x24x5xf32>
    %7 = vector.extract_strided_slice %3 {offsets = [0, 3, 0], sizes = [1, 24, 5], strides = [1, 1, 1]} : vector<1x31x5xf32> to vector<1x24x5xf32>
    %8 = vector.extract_strided_slice %3 {offsets = [0, 4, 0], sizes = [1, 24, 5], strides = [1, 1, 1]} : vector<1x31x5xf32> to vector<1x24x5xf32>
    %9 = vector.extract_strided_slice %3 {offsets = [0, 5, 0], sizes = [1, 24, 5], strides = [1, 1, 1]} : vector<1x31x5xf32> to vector<1x24x5xf32>
    %10 = vector.extract_strided_slice %3 {offsets = [0, 6, 0], sizes = [1, 24, 5], strides = [1, 1, 1]} : vector<1x31x5xf32> to vector<1x24x5xf32>
    %11 = vector.extract_strided_slice %3 {offsets = [0, 7, 0], sizes = [1, 24, 5], strides = [1, 1, 1]} : vector<1x31x5xf32> to vector<1x24x5xf32>
    %12 = tpu.concatenate %4, %5, %6, %7, %8, %9, %10, %11 in 2 : vector<1x24x5xf32>, vector<1x24x5xf32>, vector<1x24x5xf32>, vector<1x24x5xf32>, vector<1x24x5xf32>, vector<1x24x5xf32>, vector<1x24x5xf32>, vector<1x24x5xf32> -> vector<1x24x40xf32>
    %13 = vector.shape_cast %12 : vector<1x24x40xf32> to vector<24x40xf32>
    %c0_3 = arith.constant 0 : index
    %c0_4 = arith.constant 0 : index
    %14 = vector.load %arg2[%c0_3, %c0_4] : memref<40x256xbf16, #tpu.memory_space<vmem>>, vector<40x256xbf16>
    %15 = arith.truncf %13 : vector<24x40xf32> to vector<24x40xbf16>
    %cst_5 = arith.constant dense<0.000000e+00> : vector<24x256xf32>
    %16 = tpu.matmul %15, %14, %cst_5 {dimension_numbers = #tpu.dot_dimension_numbers<[1], [0], [0], [1], [0, 0, 1, 1], [], []>} : vector<24x40xbf16>, vector<40x256xbf16>, vector<24x256xf32> -> vector<24x256xf32>
    %17 = vector.shape_cast %16 : vector<24x256xf32> to vector<1x24x256xf32>
    %c0_6 = arith.constant 0 : index
    %c0_7 = arith.constant 0 : index
    %18 = vector.load %arg10[%c0_6, %c0_7] : memref<12x256xf32, #tpu.memory_space<vmem>>, vector<1x256xf32>
    %19 = vector.shape_cast %18 : vector<1x256xf32> to vector<1x1x256xf32>
    %20 = vector.broadcast %19 : vector<1x1x256xf32> to vector<1x24x256xf32>
    %21 = arith.addf %17, %20 : vector<1x24x256xf32>
    %cst_8 = arith.constant 0.000000e+00 : f32
    %22 = vector.broadcast %cst_8 : f32 to vector<1x24x256xf32>
    %23 = arith.cmpf ogt, %21, %22 : vector<1x24x256xf32>
    %cst_9 = arith.constant 0.00999999977 : f32
    %24 = vector.broadcast %cst_9 : f32 to vector<1x24x256xf32>
    %25 = arith.mulf %24, %21 : vector<1x24x256xf32>
    %26 = arith.select %23, %21, %25 : vector<1x24x256xi1>, vector<1x24x256xf32>
    %27 = tpu.iota {dimensions = array<i32: 1>} : vector<1x24x256xi32>
    %c17_i32 = arith.constant 17 : i32
    %28 = vector.broadcast %c17_i32 : i32 to vector<1x24x256xi32>
    %29 = arith.cmpi slt, %27, %28 : vector<1x24x256xi32>
    %cst_10 = arith.constant 0.000000e+00 : f32
    %30 = vector.broadcast %cst_10 : f32 to vector<1x24x256xf32>
    %31 = arith.select %29, %26, %30 : vector<1x24x256xi1>, vector<1x24x256xf32>
    %cst_11 = arith.constant 0.000000e+00 : f32
    %32 = vector.broadcast %cst_11 : f32 to vector<1x4x256xf32>
    %cst_12 = arith.constant 0.000000e+00 : f32
    %33 = vector.broadcast %cst_12 : f32 to vector<1x3x256xf32>
    %34 = tpu.concatenate %32, %31, %33 in 1 : vector<1x4x256xf32>, vector<1x24x256xf32>, vector<1x3x256xf32> -> vector<1x31x256xf32>
    %35 = vector.extract_strided_slice %34 {offsets = [0, 0, 0], sizes = [1, 24, 256], strides = [1, 1, 1]} : vector<1x31x256xf32> to vector<1x24x256xf32>
    %36 = vector.extract_strided_slice %34 {offsets = [0, 1, 0], sizes = [1, 24, 256], strides = [1, 1, 1]} : vector<1x31x256xf32> to vector<1x24x256xf32>
    %37 = vector.extract_strided_slice %34 {offsets = [0, 2, 0], sizes = [1, 24, 256], strides = [1, 1, 1]} : vector<1x31x256xf32> to vector<1x24x256xf32>
    %38 = vector.extract_strided_slice %34 {offsets = [0, 3, 0], sizes = [1, 24, 256], strides = [1, 1, 1]} : vector<1x31x256xf32> to vector<1x24x256xf32>
    %39 = vector.extract_strided_slice %34 {offsets = [0, 4, 0], sizes = [1, 24, 256], strides = [1, 1, 1]} : vector<1x31x256xf32> to vector<1x24x256xf32>
    %40 = vector.extract_strided_slice %34 {offsets = [0, 5, 0], sizes = [1, 24, 256], strides = [1, 1, 1]} : vector<1x31x256xf32> to vector<1x24x256xf32>
    %41 = vector.extract_strided_slice %34 {offsets = [0, 6, 0], sizes = [1, 24, 256], strides = [1, 1, 1]} : vector<1x31x256xf32> to vector<1x24x256xf32>
    %42 = vector.extract_strided_slice %34 {offsets = [0, 7, 0], sizes = [1, 24, 256], strides = [1, 1, 1]} : vector<1x31x256xf32> to vector<1x24x256xf32>
    %43 = tpu.concatenate %35, %36, %37, %38, %39, %40, %41, %42 in 2 : vector<1x24x256xf32>, vector<1x24x256xf32>, vector<1x24x256xf32>, vector<1x24x256xf32>, vector<1x24x256xf32>, vector<1x24x256xf32>, vector<1x24x256xf32>, vector<1x24x256xf32> -> vector<1x24x2048xf32>
    %44 = vector.shape_cast %43 : vector<1x24x2048xf32> to vector<24x2048xf32>
    %c0_13 = arith.constant 0 : index
    %c0_14 = arith.constant 0 : index
    %45 = vector.load %arg3[%c0_13, %c0_14] : memref<2048x256xbf16, #tpu.memory_space<vmem>>, vector<2048x256xbf16>
    %46 = arith.truncf %44 : vector<24x2048xf32> to vector<24x2048xbf16>
    %cst_15 = arith.constant dense<0.000000e+00> : vector<24x256xf32>
    %47 = tpu.matmul %46, %45, %cst_15 {dimension_numbers = #tpu.dot_dimension_numbers<[1], [0], [0], [1], [0, 0, 1, 1], [], []>} : vector<24x2048xbf16>, vector<2048x256xbf16>, vector<24x256xf32> -> vector<24x256xf32>
    %48 = vector.shape_cast %47 : vector<24x256xf32> to vector<1x24x256xf32>
    %c1 = arith.constant 1 : index
    %c0_16 = arith.constant 0 : index
    %49 = vector.load %arg10[%c1, %c0_16] : memref<12x256xf32, #tpu.memory_space<vmem>>, vector<1x256xf32>
    %50 = vector.shape_cast %49 : vector<1x256xf32> to vector<1x1x256xf32>
    %51 = vector.broadcast %50 : vector<1x1x256xf32> to vector<1x24x256xf32>
    %52 = arith.addf %48, %51 : vector<1x24x256xf32>
    %cst_17 = arith.constant 0.000000e+00 : f32
    %53 = vector.broadcast %cst_17 : f32 to vector<1x24x256xf32>
    %54 = arith.cmpf ogt, %52, %53 : vector<1x24x256xf32>
    %cst_18 = arith.constant 0.00999999977 : f32
    %55 = vector.broadcast %cst_18 : f32 to vector<1x24x256xf32>
    %56 = arith.mulf %55, %52 : vector<1x24x256xf32>
    %57 = arith.select %54, %52, %56 : vector<1x24x256xi1>, vector<1x24x256xf32>
    %58 = tpu.iota {dimensions = array<i32: 1>} : vector<1x24x256xi32>
    %c18_i32 = arith.constant 18 : i32
    %59 = vector.broadcast %c18_i32 : i32 to vector<1x24x256xi32>
    %60 = arith.cmpi slt, %58, %59 : vector<1x24x256xi32>
    %cst_19 = arith.constant 0.000000e+00 : f32
    %61 = vector.broadcast %cst_19 : f32 to vector<1x24x256xf32>
    %62 = arith.select %60, %57, %61 : vector<1x24x256xi1>, vector<1x24x256xf32>
    %63 = vector.extract_strided_slice %62 {offsets = [0, 0, 0], sizes = [1, 1, 256], strides = [1, 1, 1]} : vector<1x24x256xf32> to vector<1x1x256xf32>
    %64 = vector.extract_strided_slice %62 {offsets = [0, 1, 0], sizes = [1, 1, 256], strides = [1, 1, 1]} : vector<1x24x256xf32> to vector<1x1x256xf32>
    %65 = arith.maximumf %63, %64 : vector<1x1x256xf32>
    %66 = vector.extract_strided_slice %62 {offsets = [0, 2, 0], sizes = [1, 1, 256], strides = [1, 1, 1]} : vector<1x24x256xf32> to vector<1x1x256xf32>
    %67 = vector.extract_strided_slice %62 {offsets = [0, 3, 0], sizes = [1, 1, 256], strides = [1, 1, 1]} : vector<1x24x256xf32> to vector<1x1x256xf32>
    %68 = arith.maximumf %66, %67 : vector<1x1x256xf32>
    %69 = vector.extract_strided_slice %62 {offsets = [0, 4, 0], sizes = [1, 1, 256], strides = [1, 1, 1]} : vector<1x24x256xf32> to vector<1x1x256xf32>
    %70 = vector.extract_strided_slice %62 {offsets = [0, 5, 0], sizes = [1, 1, 256], strides = [1, 1, 1]} : vector<1x24x256xf32> to vector<1x1x256xf32>
    %71 = arith.maximumf %69, %70 : vector<1x1x256xf32>
    %72 = vector.extract_strided_slice %62 {offsets = [0, 6, 0], sizes = [1, 1, 256], strides = [1, 1, 1]} : vector<1x24x256xf32> to vector<1x1x256xf32>
    %73 = vector.extract_strided_slice %62 {offsets = [0, 7, 0], sizes = [1, 1, 256], strides = [1, 1, 1]} : vector<1x24x256xf32> to vector<1x1x256xf32>
    %74 = arith.maximumf %72, %73 : vector<1x1x256xf32>
    %75 = vector.extract_strided_slice %62 {offsets = [0, 8, 0], sizes = [1, 1, 256], strides = [1, 1, 1]} : vector<1x24x256xf32> to vector<1x1x256xf32>
    %76 = vector.extract_strided_slice %62 {offsets = [0, 9, 0], sizes = [1, 1, 256], strides = [1, 1, 1]} : vector<1x24x256xf32> to vector<1x1x256xf32>
    %77 = arith.maximumf %75, %76 : vector<1x1x256xf32>
    %78 = vector.extract_strided_slice %62 {offsets = [0, 10, 0], sizes = [1, 1, 256], strides = [1, 1, 1]} : vector<1x24x256xf32> to vector<1x1x256xf32>
    %79 = vector.extract_strided_slice %62 {offsets = [0, 11, 0], sizes = [1, 1, 256], strides = [1, 1, 1]} : vector<1x24x256xf32> to vector<1x1x256xf32>
    %80 = arith.maximumf %78, %79 : vector<1x1x256xf32>
    %81 = vector.extract_strided_slice %62 {offsets = [0, 12, 0], sizes = [1, 1, 256], strides = [1, 1, 1]} : vector<1x24x256xf32> to vector<1x1x256xf32>
    %82 = vector.extract_strided_slice %62 {offsets = [0, 13, 0], sizes = [1, 1, 256], strides = [1, 1, 1]} : vector<1x24x256xf32> to vector<1x1x256xf32>
    %83 = arith.maximumf %81, %82 : vector<1x1x256xf32>
    %84 = vector.extract_strided_slice %62 {offsets = [0, 14, 0], sizes = [1, 1, 256], strides = [1, 1, 1]} : vector<1x24x256xf32> to vector<1x1x256xf32>
    %85 = vector.extract_strided_slice %62 {offsets = [0, 15, 0], sizes = [1, 1, 256], strides = [1, 1, 1]} : vector<1x24x256xf32> to vector<1x1x256xf32>
    %86 = arith.maximumf %84, %85 : vector<1x1x256xf32>
    %87 = vector.extract_strided_slice %62 {offsets = [0, 16, 0], sizes = [1, 1, 256], strides = [1, 1, 1]} : vector<1x24x256xf32> to vector<1x1x256xf32>
    %88 = vector.extract_strided_slice %62 {offsets = [0, 17, 0], sizes = [1, 1, 256], strides = [1, 1, 1]} : vector<1x24x256xf32> to vector<1x1x256xf32>
    %89 = arith.maximumf %87, %88 : vector<1x1x256xf32>
    %90 = vector.extract_strided_slice %62 {offsets = [0, 18, 0], sizes = [1, 1, 256], strides = [1, 1, 1]} : vector<1x24x256xf32> to vector<1x1x256xf32>
    %91 = vector.extract_strided_slice %62 {offsets = [0, 19, 0], sizes = [1, 1, 256], strides = [1, 1, 1]} : vector<1x24x256xf32> to vector<1x1x256xf32>
    %92 = arith.maximumf %90, %91 : vector<1x1x256xf32>
    %93 = vector.extract_strided_slice %62 {offsets = [0, 20, 0], sizes = [1, 1, 256], strides = [1, 1, 1]} : vector<1x24x256xf32> to vector<1x1x256xf32>
    %94 = vector.extract_strided_slice %62 {offsets = [0, 21, 0], sizes = [1, 1, 256], strides = [1, 1, 1]} : vector<1x24x256xf32> to vector<1x1x256xf32>
    %95 = arith.maximumf %93, %94 : vector<1x1x256xf32>
    %96 = vector.extract_strided_slice %62 {offsets = [0, 22, 0], sizes = [1, 1, 256], strides = [1, 1, 1]} : vector<1x24x256xf32> to vector<1x1x256xf32>
    %97 = vector.extract_strided_slice %62 {offsets = [0, 23, 0], sizes = [1, 1, 256], strides = [1, 1, 1]} : vector<1x24x256xf32> to vector<1x1x256xf32>
    %98 = arith.maximumf %96, %97 : vector<1x1x256xf32>
    %99 = tpu.concatenate %65, %68, %71, %74, %77, %80, %83, %86, %89, %92, %95, %98 in 1 : vector<1x1x256xf32>, vector<1x1x256xf32>, vector<1x1x256xf32>, vector<1x1x256xf32>, vector<1x1x256xf32>, vector<1x1x256xf32>, vector<1x1x256xf32>, vector<1x1x256xf32>, vector<1x1x256xf32>, vector<1x1x256xf32>, vector<1x1x256xf32>, vector<1x1x256xf32> -> vector<1x12x256xf32>
    %100 = tpu.iota {dimensions = array<i32: 1>} : vector<1x12x256xi32>
    %c9_i32 = arith.constant 9 : i32
    %101 = vector.broadcast %c9_i32 : i32 to vector<1x12x256xi32>
    %102 = arith.cmpi slt, %100, %101 : vector<1x12x256xi32>
    %cst_20 = arith.constant 0.000000e+00 : f32
    %103 = vector.broadcast %cst_20 : f32 to vector<1x12x256xf32>
    %104 = arith.select %102, %99, %103 : vector<1x12x256xi1>, vector<1x12x256xf32>
    %cst_21 = arith.constant 0.000000e+00 : f32
    %105 = vector.broadcast %cst_21 : f32 to vector<1x4x256xf32>
    %cst_22 = arith.constant 0.000000e+00 : f32
    %106 = vector.broadcast %cst_22 : f32 to vector<1x7x256xf32>
    %107 = tpu.concatenate %105, %104, %106 in 1 : vector<1x4x256xf32>, vector<1x12x256xf32>, vector<1x7x256xf32> -> vector<1x23x256xf32>
    %108 = vector.extract_strided_slice %107 {offsets = [0, 0, 0], sizes = [1, 16, 256], strides = [1, 1, 1]} : vector<1x23x256xf32> to vector<1x16x256xf32>
    %109 = vector.extract_strided_slice %107 {offsets = [0, 1, 0], sizes = [1, 16, 256], strides = [1, 1, 1]} : vector<1x23x256xf32> to vector<1x16x256xf32>
    %110 = vector.extract_strided_slice %107 {offsets = [0, 2, 0], sizes = [1, 16, 256], strides = [1, 1, 1]} : vector<1x23x256xf32> to vector<1x16x256xf32>
    %111 = vector.extract_strided_slice %107 {offsets = [0, 3, 0], sizes = [1, 16, 256], strides = [1, 1, 1]} : vector<1x23x256xf32> to vector<1x16x256xf32>
    %112 = vector.extract_strided_slice %107 {offsets = [0, 4, 0], sizes = [1, 16, 256], strides = [1, 1, 1]} : vector<1x23x256xf32> to vector<1x16x256xf32>
    %113 = vector.extract_strided_slice %107 {offsets = [0, 5, 0], sizes = [1, 16, 256], strides = [1, 1, 1]} : vector<1x23x256xf32> to vector<1x16x256xf32>
    %114 = vector.extract_strided_slice %107 {offsets = [0, 6, 0], sizes = [1, 16, 256], strides = [1, 1, 1]} : vector<1x23x256xf32> to vector<1x16x256xf32>
    %115 = vector.extract_strided_slice %107 {offsets = [0, 7, 0], sizes = [1, 16, 256], strides = [1, 1, 1]} : vector<1x23x256xf32> to vector<1x16x256xf32>
    %116 = tpu.concatenate %108, %109, %110, %111, %112, %113, %114, %115 in 2 : vector<1x16x256xf32>, vector<1x16x256xf32>, vector<1x16x256xf32>, vector<1x16x256xf32>, vector<1x16x256xf32>, vector<1x16x256xf32>, vector<1x16x256xf32>, vector<1x16x256xf32> -> vector<1x16x2048xf32>
    %117 = vector.shape_cast %116 : vector<1x16x2048xf32> to vector<16x2048xf32>
    %c0_23 = arith.constant 0 : index
    %c0_24 = arith.constant 0 : index
    %118 = vector.load %arg4[%c0_23, %c0_24] : memref<2048x128xbf16, #tpu.memory_space<vmem>>, vector<2048x128xbf16>
    %119 = arith.truncf %117 : vector<16x2048xf32> to vector<16x2048xbf16>
    %cst_25 = arith.constant dense<0.000000e+00> : vector<16x128xf32>
    %120 = tpu.matmul %119, %118, %cst_25 {dimension_numbers = #tpu.dot_dimension_numbers<[1], [0], [0], [1], [0, 0, 1, 1], [], []>} : vector<16x2048xbf16>, vector<2048x128xbf16>, vector<16x128xf32> -> vector<16x128xf32>
    %121 = vector.shape_cast %120 : vector<16x128xf32> to vector<1x16x128xf32>
    %c2 = arith.constant 2 : index
    %c0_26 = arith.constant 0 : index
    %122 = vector.load %arg10[%c2, %c0_26] : memref<12x256xf32, #tpu.memory_space<vmem>>, vector<1x128xf32>
    %123 = vector.shape_cast %122 : vector<1x128xf32> to vector<1x1x128xf32>
    %124 = vector.broadcast %123 : vector<1x1x128xf32> to vector<1x16x128xf32>
    %125 = arith.addf %121, %124 : vector<1x16x128xf32>
    %cst_27 = arith.constant 0.000000e+00 : f32
    %126 = vector.broadcast %cst_27 : f32 to vector<1x16x128xf32>
    %127 = arith.cmpf ogt, %125, %126 : vector<1x16x128xf32>
    %cst_28 = arith.constant 0.00999999977 : f32
    %128 = vector.broadcast %cst_28 : f32 to vector<1x16x128xf32>
    %129 = arith.mulf %128, %125 : vector<1x16x128xf32>
    %130 = arith.select %127, %125, %129 : vector<1x16x128xi1>, vector<1x16x128xf32>
    %131 = tpu.iota {dimensions = array<i32: 1>} : vector<1x16x128xi32>
    %c10_i32 = arith.constant 10 : i32
    %132 = vector.broadcast %c10_i32 : i32 to vector<1x16x128xi32>
    %133 = arith.cmpi slt, %131, %132 : vector<1x16x128xi32>
    %cst_29 = arith.constant 0.000000e+00 : f32
    %134 = vector.broadcast %cst_29 : f32 to vector<1x16x128xf32>
    %135 = arith.select %133, %130, %134 : vector<1x16x128xi1>, vector<1x16x128xf32>
    %cst_30 = arith.constant 0.000000e+00 : f32
    %136 = vector.broadcast %cst_30 : f32 to vector<1x4x128xf32>
    %cst_31 = arith.constant 0.000000e+00 : f32
    %137 = vector.broadcast %cst_31 : f32 to vector<1x3x128xf32>
    %138 = tpu.concatenate %136, %135, %137 in 1 : vector<1x4x128xf32>, vector<1x16x128xf32>, vector<1x3x128xf32> -> vector<1x23x128xf32>
    %139 = vector.extract_strided_slice %138 {offsets = [0, 0, 0], sizes = [1, 16, 128], strides = [1, 1, 1]} : vector<1x23x128xf32> to vector<1x16x128xf32>
    %140 = vector.extract_strided_slice %138 {offsets = [0, 1, 0], sizes = [1, 16, 128], strides = [1, 1, 1]} : vector<1x23x128xf32> to vector<1x16x128xf32>
    %141 = vector.extract_strided_slice %138 {offsets = [0, 2, 0], sizes = [1, 16, 128], strides = [1, 1, 1]} : vector<1x23x128xf32> to vector<1x16x128xf32>
    %142 = vector.extract_strided_slice %138 {offsets = [0, 3, 0], sizes = [1, 16, 128], strides = [1, 1, 1]} : vector<1x23x128xf32> to vector<1x16x128xf32>
    %143 = vector.extract_strided_slice %138 {offsets = [0, 4, 0], sizes = [1, 16, 128], strides = [1, 1, 1]} : vector<1x23x128xf32> to vector<1x16x128xf32>
    %144 = vector.extract_strided_slice %138 {offsets = [0, 5, 0], sizes = [1, 16, 128], strides = [1, 1, 1]} : vector<1x23x128xf32> to vector<1x16x128xf32>
    %145 = vector.extract_strided_slice %138 {offsets = [0, 6, 0], sizes = [1, 16, 128], strides = [1, 1, 1]} : vector<1x23x128xf32> to vector<1x16x128xf32>
    %146 = vector.extract_strided_slice %138 {offsets = [0, 7, 0], sizes = [1, 16, 128], strides = [1, 1, 1]} : vector<1x23x128xf32> to vector<1x16x128xf32>
    %147 = tpu.concatenate %139, %140, %141, %142, %143, %144, %145, %146 in 2 : vector<1x16x128xf32>, vector<1x16x128xf32>, vector<1x16x128xf32>, vector<1x16x128xf32>, vector<1x16x128xf32>, vector<1x16x128xf32>, vector<1x16x128xf32>, vector<1x16x128xf32> -> vector<1x16x1024xf32>
    %148 = vector.shape_cast %147 : vector<1x16x1024xf32> to vector<16x1024xf32>
    %c0_32 = arith.constant 0 : index
    %c0_33 = arith.constant 0 : index
    %149 = vector.load %arg5[%c0_32, %c0_33] : memref<1024x128xbf16, #tpu.memory_space<vmem>>, vector<1024x128xbf16>
    %150 = arith.truncf %148 : vector<16x1024xf32> to vector<16x1024xbf16>
    %cst_34 = arith.constant dense<0.000000e+00> : vector<16x128xf32>
    %151 = tpu.matmul %150, %149, %cst_34 {dimension_numbers = #tpu.dot_dimension_numbers<[1], [0], [0], [1], [0, 0, 1, 1], [], []>} : vector<16x1024xbf16>, vector<1024x128xbf16>, vector<16x128xf32> -> vector<16x128xf32>
    %152 = vector.shape_cast %151 : vector<16x128xf32> to vector<1x16x128xf32>
    %c3 = arith.constant 3 : index
    %c0_35 = arith.constant 0 : index
    %153 = vector.load %arg10[%c3, %c0_35] : memref<12x256xf32, #tpu.memory_space<vmem>>, vector<1x128xf32>
    %154 = vector.shape_cast %153 : vector<1x128xf32> to vector<1x1x128xf32>
    %155 = vector.broadcast %154 : vector<1x1x128xf32> to vector<1x16x128xf32>
    %156 = arith.addf %152, %155 : vector<1x16x128xf32>
    %cst_36 = arith.constant 0.000000e+00 : f32
    %157 = vector.broadcast %cst_36 : f32 to vector<1x16x128xf32>
    %158 = arith.cmpf ogt, %156, %157 : vector<1x16x128xf32>
    %cst_37 = arith.constant 0.00999999977 : f32
    %159 = vector.broadcast %cst_37 : f32 to vector<1x16x128xf32>
    %160 = arith.mulf %159, %156 : vector<1x16x128xf32>
    %161 = arith.select %158, %156, %160 : vector<1x16x128xi1>, vector<1x16x128xf32>
    %162 = tpu.iota {dimensions = array<i32: 1>} : vector<1x16x128xi32>
    %c11_i32 = arith.constant 11 : i32
    %163 = vector.broadcast %c11_i32 : i32 to vector<1x16x128xi32>
    %164 = arith.cmpi slt, %162, %163 : vector<1x16x128xi32>
    %cst_38 = arith.constant 0.000000e+00 : f32
    %165 = vector.broadcast %cst_38 : f32 to vector<1x16x128xf32>
    %166 = arith.select %164, %161, %165 : vector<1x16x128xi1>, vector<1x16x128xf32>
    %167 = vector.extract_strided_slice %166 {offsets = [0, 0, 0], sizes = [1, 1, 128], strides = [1, 1, 1]} : vector<1x16x128xf32> to vector<1x1x128xf32>
    %168 = vector.extract_strided_slice %166 {offsets = [0, 1, 0], sizes = [1, 1, 128], strides = [1, 1, 1]} : vector<1x16x128xf32> to vector<1x1x128xf32>
    %169 = arith.maximumf %167, %168 : vector<1x1x128xf32>
    %170 = vector.extract_strided_slice %166 {offsets = [0, 2, 0], sizes = [1, 1, 128], strides = [1, 1, 1]} : vector<1x16x128xf32> to vector<1x1x128xf32>
    %171 = vector.extract_strided_slice %166 {offsets = [0, 3, 0], sizes = [1, 1, 128], strides = [1, 1, 1]} : vector<1x16x128xf32> to vector<1x1x128xf32>
    %172 = arith.maximumf %170, %171 : vector<1x1x128xf32>
    %173 = vector.extract_strided_slice %166 {offsets = [0, 4, 0], sizes = [1, 1, 128], strides = [1, 1, 1]} : vector<1x16x128xf32> to vector<1x1x128xf32>
    %174 = vector.extract_strided_slice %166 {offsets = [0, 5, 0], sizes = [1, 1, 128], strides = [1, 1, 1]} : vector<1x16x128xf32> to vector<1x1x128xf32>
    %175 = arith.maximumf %173, %174 : vector<1x1x128xf32>
    %176 = vector.extract_strided_slice %166 {offsets = [0, 6, 0], sizes = [1, 1, 128], strides = [1, 1, 1]} : vector<1x16x128xf32> to vector<1x1x128xf32>
    %177 = vector.extract_strided_slice %166 {offsets = [0, 7, 0], sizes = [1, 1, 128], strides = [1, 1, 1]} : vector<1x16x128xf32> to vector<1x1x128xf32>
    %178 = arith.maximumf %176, %177 : vector<1x1x128xf32>
    %179 = vector.extract_strided_slice %166 {offsets = [0, 8, 0], sizes = [1, 1, 128], strides = [1, 1, 1]} : vector<1x16x128xf32> to vector<1x1x128xf32>
    %180 = vector.extract_strided_slice %166 {offsets = [0, 9, 0], sizes = [1, 1, 128], strides = [1, 1, 1]} : vector<1x16x128xf32> to vector<1x1x128xf32>
    %181 = arith.maximumf %179, %180 : vector<1x1x128xf32>
    %182 = vector.extract_strided_slice %166 {offsets = [0, 10, 0], sizes = [1, 1, 128], strides = [1, 1, 1]} : vector<1x16x128xf32> to vector<1x1x128xf32>
    %183 = vector.extract_strided_slice %166 {offsets = [0, 11, 0], sizes = [1, 1, 128], strides = [1, 1, 1]} : vector<1x16x128xf32> to vector<1x1x128xf32>
    %184 = arith.maximumf %182, %183 : vector<1x1x128xf32>
    %185 = vector.extract_strided_slice %166 {offsets = [0, 12, 0], sizes = [1, 1, 128], strides = [1, 1, 1]} : vector<1x16x128xf32> to vector<1x1x128xf32>
    %186 = vector.extract_strided_slice %166 {offsets = [0, 13, 0], sizes = [1, 1, 128], strides = [1, 1, 1]} : vector<1x16x128xf32> to vector<1x1x128xf32>
    %187 = arith.maximumf %185, %186 : vector<1x1x128xf32>
    %188 = vector.extract_strided_slice %166 {offsets = [0, 14, 0], sizes = [1, 1, 128], strides = [1, 1, 1]} : vector<1x16x128xf32> to vector<1x1x128xf32>
    %189 = vector.extract_strided_slice %166 {offsets = [0, 15, 0], sizes = [1, 1, 128], strides = [1, 1, 1]} : vector<1x16x128xf32> to vector<1x1x128xf32>
    %190 = arith.maximumf %188, %189 : vector<1x1x128xf32>
    %191 = tpu.concatenate %169, %172, %175, %178, %181, %184, %187, %190 in 1 : vector<1x1x128xf32>, vector<1x1x128xf32>, vector<1x1x128xf32>, vector<1x1x128xf32>, vector<1x1x128xf32>, vector<1x1x128xf32>, vector<1x1x128xf32>, vector<1x1x128xf32> -> vector<1x8x128xf32>
    %192 = tpu.iota {dimensions = array<i32: 1>} : vector<1x8x128xi32>
    %c5_i32 = arith.constant 5 : i32
    %193 = vector.broadcast %c5_i32 : i32 to vector<1x8x128xi32>
    %194 = arith.cmpi slt, %192, %193 : vector<1x8x128xi32>
    %cst_39 = arith.constant 0.000000e+00 : f32
    %195 = vector.broadcast %cst_39 : f32 to vector<1x8x128xf32>
    %196 = arith.select %194, %191, %195 : vector<1x8x128xi1>, vector<1x8x128xf32>
    %cst_40 = arith.constant 0.000000e+00 : f32
    %197 = vector.broadcast %cst_40 : f32 to vector<1x4x128xf32>
    %cst_41 = arith.constant 0.000000e+00 : f32
    %198 = vector.broadcast %cst_41 : f32 to vector<1x3x128xf32>
    %199 = tpu.concatenate %197, %196, %198 in 1 : vector<1x4x128xf32>, vector<1x8x128xf32>, vector<1x3x128xf32> -> vector<1x15x128xf32>
    %200 = vector.extract_strided_slice %199 {offsets = [0, 0, 0], sizes = [1, 8, 128], strides = [1, 1, 1]} : vector<1x15x128xf32> to vector<1x8x128xf32>
    %201 = vector.extract_strided_slice %199 {offsets = [0, 1, 0], sizes = [1, 8, 128], strides = [1, 1, 1]} : vector<1x15x128xf32> to vector<1x8x128xf32>
    %202 = vector.extract_strided_slice %199 {offsets = [0, 2, 0], sizes = [1, 8, 128], strides = [1, 1, 1]} : vector<1x15x128xf32> to vector<1x8x128xf32>
    %203 = vector.extract_strided_slice %199 {offsets = [0, 3, 0], sizes = [1, 8, 128], strides = [1, 1, 1]} : vector<1x15x128xf32> to vector<1x8x128xf32>
    %204 = vector.extract_strided_slice %199 {offsets = [0, 4, 0], sizes = [1, 8, 128], strides = [1, 1, 1]} : vector<1x15x128xf32> to vector<1x8x128xf32>
    %205 = vector.extract_strided_slice %199 {offsets = [0, 5, 0], sizes = [1, 8, 128], strides = [1, 1, 1]} : vector<1x15x128xf32> to vector<1x8x128xf32>
    %206 = vector.extract_strided_slice %199 {offsets = [0, 6, 0], sizes = [1, 8, 128], strides = [1, 1, 1]} : vector<1x15x128xf32> to vector<1x8x128xf32>
    %207 = vector.extract_strided_slice %199 {offsets = [0, 7, 0], sizes = [1, 8, 128], strides = [1, 1, 1]} : vector<1x15x128xf32> to vector<1x8x128xf32>
    %208 = tpu.concatenate %200, %201, %202, %203, %204, %205, %206, %207 in 2 : vector<1x8x128xf32>, vector<1x8x128xf32>, vector<1x8x128xf32>, vector<1x8x128xf32>, vector<1x8x128xf32>, vector<1x8x128xf32>, vector<1x8x128xf32>, vector<1x8x128xf32> -> vector<1x8x1024xf32>
    %209 = vector.shape_cast %208 : vector<1x8x1024xf32> to vector<8x1024xf32>
    %c0_42 = arith.constant 0 : index
    %c0_43 = arith.constant 0 : index
    %210 = vector.load %arg6[%c0_42, %c0_43] : memref<1024x64xbf16, #tpu.memory_space<vmem>>, vector<1024x64xbf16>
    %211 = arith.truncf %209 : vector<8x1024xf32> to vector<8x1024xbf16>
    %cst_44 = arith.constant dense<0.000000e+00> : vector<8x64xf32>
    %212 = tpu.matmul %211, %210, %cst_44 {dimension_numbers = #tpu.dot_dimension_numbers<[1], [0], [0], [1], [0, 0, 1, 1], [], []>} : vector<8x1024xbf16>, vector<1024x64xbf16>, vector<8x64xf32> -> vector<8x64xf32>
    %213 = vector.shape_cast %212 : vector<8x64xf32> to vector<1x8x64xf32>
    %c4 = arith.constant 4 : index
    %c0_45 = arith.constant 0 : index
    %214 = vector.load %arg10[%c4, %c0_45] : memref<12x256xf32, #tpu.memory_space<vmem>>, vector<1x64xf32>
    %215 = vector.shape_cast %214 : vector<1x64xf32> to vector<1x1x64xf32>
    %216 = vector.broadcast %215 : vector<1x1x64xf32> to vector<1x8x64xf32>
    %217 = arith.addf %213, %216 : vector<1x8x64xf32>
    %cst_46 = arith.constant 0.000000e+00 : f32
    %218 = vector.broadcast %cst_46 : f32 to vector<1x8x64xf32>
    %219 = arith.cmpf ogt, %217, %218 : vector<1x8x64xf32>
    %cst_47 = arith.constant 0.00999999977 : f32
    %220 = vector.broadcast %cst_47 : f32 to vector<1x8x64xf32>
    %221 = arith.mulf %220, %217 : vector<1x8x64xf32>
    %222 = arith.select %219, %217, %221 : vector<1x8x64xi1>, vector<1x8x64xf32>
    %223 = tpu.iota {dimensions = array<i32: 1>} : vector<1x8x64xi32>
    %c6_i32 = arith.constant 6 : i32
    %224 = vector.broadcast %c6_i32 : i32 to vector<1x8x64xi32>
    %225 = arith.cmpi slt, %223, %224 : vector<1x8x64xi32>
    %cst_48 = arith.constant 0.000000e+00 : f32
    %226 = vector.broadcast %cst_48 : f32 to vector<1x8x64xf32>
    %227 = arith.select %225, %222, %226 : vector<1x8x64xi1>, vector<1x8x64xf32>
    %cst_49 = arith.constant 0.000000e+00 : f32
    %228 = vector.broadcast %cst_49 : f32 to vector<1x4x64xf32>
    %cst_50 = arith.constant 0.000000e+00 : f32
    %229 = vector.broadcast %cst_50 : f32 to vector<1x3x64xf32>
    %230 = tpu.concatenate %228, %227, %229 in 1 : vector<1x4x64xf32>, vector<1x8x64xf32>, vector<1x3x64xf32> -> vector<1x15x64xf32>
    %231 = vector.extract_strided_slice %230 {offsets = [0, 0, 0], sizes = [1, 8, 64], strides = [1, 1, 1]} : vector<1x15x64xf32> to vector<1x8x64xf32>
    %232 = vector.extract_strided_slice %230 {offsets = [0, 1, 0], sizes = [1, 8, 64], strides = [1, 1, 1]} : vector<1x15x64xf32> to vector<1x8x64xf32>
    %233 = vector.extract_strided_slice %230 {offsets = [0, 2, 0], sizes = [1, 8, 64], strides = [1, 1, 1]} : vector<1x15x64xf32> to vector<1x8x64xf32>
    %234 = vector.extract_strided_slice %230 {offsets = [0, 3, 0], sizes = [1, 8, 64], strides = [1, 1, 1]} : vector<1x15x64xf32> to vector<1x8x64xf32>
    %235 = vector.extract_strided_slice %230 {offsets = [0, 4, 0], sizes = [1, 8, 64], strides = [1, 1, 1]} : vector<1x15x64xf32> to vector<1x8x64xf32>
    %236 = vector.extract_strided_slice %230 {offsets = [0, 5, 0], sizes = [1, 8, 64], strides = [1, 1, 1]} : vector<1x15x64xf32> to vector<1x8x64xf32>
    %237 = vector.extract_strided_slice %230 {offsets = [0, 6, 0], sizes = [1, 8, 64], strides = [1, 1, 1]} : vector<1x15x64xf32> to vector<1x8x64xf32>
    %238 = vector.extract_strided_slice %230 {offsets = [0, 7, 0], sizes = [1, 8, 64], strides = [1, 1, 1]} : vector<1x15x64xf32> to vector<1x8x64xf32>
    %239 = tpu.concatenate %231, %232, %233, %234, %235, %236, %237, %238 in 2 : vector<1x8x64xf32>, vector<1x8x64xf32>, vector<1x8x64xf32>, vector<1x8x64xf32>, vector<1x8x64xf32>, vector<1x8x64xf32>, vector<1x8x64xf32>, vector<1x8x64xf32> -> vector<1x8x512xf32>
    %240 = vector.shape_cast %239 : vector<1x8x512xf32> to vector<8x512xf32>
    %c0_51 = arith.constant 0 : index
    %c0_52 = arith.constant 0 : index
    %241 = vector.load %arg7[%c0_51, %c0_52] : memref<512x64xbf16, #tpu.memory_space<vmem>>, vector<512x64xbf16>
    %242 = arith.truncf %240 : vector<8x512xf32> to vector<8x512xbf16>
    %cst_53 = arith.constant dense<0.000000e+00> : vector<8x64xf32>
    %243 = tpu.matmul %242, %241, %cst_53 {dimension_numbers = #tpu.dot_dimension_numbers<[1], [0], [0], [1], [0, 0, 1, 1], [], []>} : vector<8x512xbf16>, vector<512x64xbf16>, vector<8x64xf32> -> vector<8x64xf32>
    %244 = vector.shape_cast %243 : vector<8x64xf32> to vector<1x8x64xf32>
    %c5 = arith.constant 5 : index
    %c0_54 = arith.constant 0 : index
    %245 = vector.load %arg10[%c5, %c0_54] : memref<12x256xf32, #tpu.memory_space<vmem>>, vector<1x64xf32>
    %246 = vector.shape_cast %245 : vector<1x64xf32> to vector<1x1x64xf32>
    %247 = vector.broadcast %246 : vector<1x1x64xf32> to vector<1x8x64xf32>
    %248 = arith.addf %244, %247 : vector<1x8x64xf32>
    %cst_55 = arith.constant 0.000000e+00 : f32
    %249 = vector.broadcast %cst_55 : f32 to vector<1x8x64xf32>
    %250 = arith.cmpf ogt, %248, %249 : vector<1x8x64xf32>
    %cst_56 = arith.constant 0.00999999977 : f32
    %251 = vector.broadcast %cst_56 : f32 to vector<1x8x64xf32>
    %252 = arith.mulf %251, %248 : vector<1x8x64xf32>
    %253 = arith.select %250, %248, %252 : vector<1x8x64xi1>, vector<1x8x64xf32>
    %254 = tpu.iota {dimensions = array<i32: 1>} : vector<1x8x64xi32>
    %c7_i32 = arith.constant 7 : i32
    %255 = vector.broadcast %c7_i32 : i32 to vector<1x8x64xi32>
    %256 = arith.cmpi slt, %254, %255 : vector<1x8x64xi32>
    %cst_57 = arith.constant 0.000000e+00 : f32
    %257 = vector.broadcast %cst_57 : f32 to vector<1x8x64xf32>
    %258 = arith.select %256, %253, %257 : vector<1x8x64xi1>, vector<1x8x64xf32>
    %cst_58 = arith.constant 0.000000e+00 : f32
    %259 = vector.broadcast %cst_58 : f32 to vector<1x128xf32>
    %260 = vector.extract_strided_slice %258 {offsets = [0, 0, 0], sizes = [1, 1, 64], strides = [1, 1, 1]} : vector<1x8x64xf32> to vector<1x1x64xf32>
    %261 = vector.shape_cast %260 : vector<1x1x64xf32> to vector<1x64xf32>
    %c0_59 = arith.constant 0 : index
    %c0_60 = arith.constant 0 : index
    %262 = vector.load %arg8[%c0_59, %c0_60] : memref<512x128xbf16, #tpu.memory_space<vmem>>, vector<64x128xbf16>
    %263 = arith.truncf %261 : vector<1x64xf32> to vector<1x64xbf16>
    %cst_61 = arith.constant dense<0.000000e+00> : vector<1x128xf32>
    %264 = tpu.matmul %263, %262, %cst_61 {dimension_numbers = #tpu.dot_dimension_numbers<[1], [0], [0], [1], [0, 0, 1, 1], [], []>} : vector<1x64xbf16>, vector<64x128xbf16>, vector<1x128xf32> -> vector<1x128xf32>
    %265 = arith.addf %259, %264 : vector<1x128xf32>
    %266 = vector.extract_strided_slice %258 {offsets = [0, 1, 0], sizes = [1, 1, 64], strides = [1, 1, 1]} : vector<1x8x64xf32> to vector<1x1x64xf32>
    %267 = vector.shape_cast %266 : vector<1x1x64xf32> to vector<1x64xf32>
    %c64 = arith.constant 64 : index
    %c0_62 = arith.constant 0 : index
    %268 = vector.load %arg8[%c64, %c0_62] : memref<512x128xbf16, #tpu.memory_space<vmem>>, vector<64x128xbf16>
    %269 = arith.truncf %267 : vector<1x64xf32> to vector<1x64xbf16>
    %cst_63 = arith.constant dense<0.000000e+00> : vector<1x128xf32>
    %270 = tpu.matmul %269, %268, %cst_63 {dimension_numbers = #tpu.dot_dimension_numbers<[1], [0], [0], [1], [0, 0, 1, 1], [], []>} : vector<1x64xbf16>, vector<64x128xbf16>, vector<1x128xf32> -> vector<1x128xf32>
    %271 = arith.addf %265, %270 : vector<1x128xf32>
    %272 = vector.extract_strided_slice %258 {offsets = [0, 2, 0], sizes = [1, 1, 64], strides = [1, 1, 1]} : vector<1x8x64xf32> to vector<1x1x64xf32>
    %273 = vector.shape_cast %272 : vector<1x1x64xf32> to vector<1x64xf32>
    %c128 = arith.constant 128 : index
    %c0_64 = arith.constant 0 : index
    %274 = vector.load %arg8[%c128, %c0_64] : memref<512x128xbf16, #tpu.memory_space<vmem>>, vector<64x128xbf16>
    %275 = arith.truncf %273 : vector<1x64xf32> to vector<1x64xbf16>
    %cst_65 = arith.constant dense<0.000000e+00> : vector<1x128xf32>
    %276 = tpu.matmul %275, %274, %cst_65 {dimension_numbers = #tpu.dot_dimension_numbers<[1], [0], [0], [1], [0, 0, 1, 1], [], []>} : vector<1x64xbf16>, vector<64x128xbf16>, vector<1x128xf32> -> vector<1x128xf32>
    %277 = arith.addf %271, %276 : vector<1x128xf32>
    %278 = vector.extract_strided_slice %258 {offsets = [0, 3, 0], sizes = [1, 1, 64], strides = [1, 1, 1]} : vector<1x8x64xf32> to vector<1x1x64xf32>
    %279 = vector.shape_cast %278 : vector<1x1x64xf32> to vector<1x64xf32>
    %c192 = arith.constant 192 : index
    %c0_66 = arith.constant 0 : index
    %280 = vector.load %arg8[%c192, %c0_66] : memref<512x128xbf16, #tpu.memory_space<vmem>>, vector<64x128xbf16>
    %281 = arith.truncf %279 : vector<1x64xf32> to vector<1x64xbf16>
    %cst_67 = arith.constant dense<0.000000e+00> : vector<1x128xf32>
    %282 = tpu.matmul %281, %280, %cst_67 {dimension_numbers = #tpu.dot_dimension_numbers<[1], [0], [0], [1], [0, 0, 1, 1], [], []>} : vector<1x64xbf16>, vector<64x128xbf16>, vector<1x128xf32> -> vector<1x128xf32>
    %283 = arith.addf %277, %282 : vector<1x128xf32>
    %284 = vector.extract_strided_slice %258 {offsets = [0, 4, 0], sizes = [1, 1, 64], strides = [1, 1, 1]} : vector<1x8x64xf32> to vector<1x1x64xf32>
    %285 = vector.shape_cast %284 : vector<1x1x64xf32> to vector<1x64xf32>
    %c256 = arith.constant 256 : index
    %c0_68 = arith.constant 0 : index
    %286 = vector.load %arg8[%c256, %c0_68] : memref<512x128xbf16, #tpu.memory_space<vmem>>, vector<64x128xbf16>
    %287 = arith.truncf %285 : vector<1x64xf32> to vector<1x64xbf16>
    %cst_69 = arith.constant dense<0.000000e+00> : vector<1x128xf32>
    %288 = tpu.matmul %287, %286, %cst_69 {dimension_numbers = #tpu.dot_dimension_numbers<[1], [0], [0], [1], [0, 0, 1, 1], [], []>} : vector<1x64xbf16>, vector<64x128xbf16>, vector<1x128xf32> -> vector<1x128xf32>
    %289 = arith.addf %283, %288 : vector<1x128xf32>
    %290 = vector.extract_strided_slice %258 {offsets = [0, 5, 0], sizes = [1, 1, 64], strides = [1, 1, 1]} : vector<1x8x64xf32> to vector<1x1x64xf32>
    %291 = vector.shape_cast %290 : vector<1x1x64xf32> to vector<1x64xf32>
    %c320 = arith.constant 320 : index
    %c0_70 = arith.constant 0 : index
    %292 = vector.load %arg8[%c320, %c0_70] : memref<512x128xbf16, #tpu.memory_space<vmem>>, vector<64x128xbf16>
    %293 = arith.truncf %291 : vector<1x64xf32> to vector<1x64xbf16>
    %cst_71 = arith.constant dense<0.000000e+00> : vector<1x128xf32>
    %294 = tpu.matmul %293, %292, %cst_71 {dimension_numbers = #tpu.dot_dimension_numbers<[1], [0], [0], [1], [0, 0, 1, 1], [], []>} : vector<1x64xbf16>, vector<64x128xbf16>, vector<1x128xf32> -> vector<1x128xf32>
    %295 = arith.addf %289, %294 : vector<1x128xf32>
    %296 = vector.extract_strided_slice %258 {offsets = [0, 6, 0], sizes = [1, 1, 64], strides = [1, 1, 1]} : vector<1x8x64xf32> to vector<1x1x64xf32>
    %297 = vector.shape_cast %296 : vector<1x1x64xf32> to vector<1x64xf32>
    %c384 = arith.constant 384 : index
    %c0_72 = arith.constant 0 : index
    %298 = vector.load %arg8[%c384, %c0_72] : memref<512x128xbf16, #tpu.memory_space<vmem>>, vector<64x128xbf16>
    %299 = arith.truncf %297 : vector<1x64xf32> to vector<1x64xbf16>
    %cst_73 = arith.constant dense<0.000000e+00> : vector<1x128xf32>
    %300 = tpu.matmul %299, %298, %cst_73 {dimension_numbers = #tpu.dot_dimension_numbers<[1], [0], [0], [1], [0, 0, 1, 1], [], []>} : vector<1x64xbf16>, vector<64x128xbf16>, vector<1x128xf32> -> vector<1x128xf32>
    %301 = arith.addf %295, %300 : vector<1x128xf32>
    %302 = vector.extract_strided_slice %258 {offsets = [0, 7, 0], sizes = [1, 1, 64], strides = [1, 1, 1]} : vector<1x8x64xf32> to vector<1x1x64xf32>
    %303 = vector.shape_cast %302 : vector<1x1x64xf32> to vector<1x64xf32>
    %c448 = arith.constant 448 : index
    %c0_74 = arith.constant 0 : index
    %304 = vector.load %arg8[%c448, %c0_74] : memref<512x128xbf16, #tpu.memory_space<vmem>>, vector<64x128xbf16>
    %305 = arith.truncf %303 : vector<1x64xf32> to vector<1x64xbf16>
    %cst_75 = arith.constant dense<0.000000e+00> : vector<1x128xf32>
    %306 = tpu.matmul %305, %304, %cst_75 {dimension_numbers = #tpu.dot_dimension_numbers<[1], [0], [0], [1], [0, 0, 1, 1], [], []>} : vector<1x64xbf16>, vector<64x128xbf16>, vector<1x128xf32> -> vector<1x128xf32>
    %307 = arith.addf %301, %306 : vector<1x128xf32>
    %c6 = arith.constant 6 : index
    %c0_76 = arith.constant 0 : index
    %308 = vector.load %arg10[%c6, %c0_76] : memref<12x256xf32, #tpu.memory_space<vmem>>, vector<1x128xf32>
    %309 = arith.addf %307, %308 : vector<1x128xf32>
    %cst_77 = arith.constant 0.000000e+00 : f32
    %310 = vector.broadcast %cst_77 : f32 to vector<1x128xf32>
    %311 = arith.cmpf ogt, %309, %310 : vector<1x128xf32>
    %cst_78 = arith.constant 0.00999999977 : f32
    %312 = vector.broadcast %cst_78 : f32 to vector<1x128xf32>
    %313 = arith.mulf %312, %309 : vector<1x128xf32>
    %314 = arith.select %311, %309, %313 : vector<1x128xi1>, vector<1x128xf32>
    %c0_79 = arith.constant 0 : index
    %c0_80 = arith.constant 0 : index
    %315 = vector.load %arg9[%c0_79, %c0_80] : memref<640x128xbf16, #tpu.memory_space<vmem>>, vector<128x128xbf16>
    %316 = arith.truncf %314 : vector<1x128xf32> to vector<1x128xbf16>
    %cst_81 = arith.constant dense<0.000000e+00> : vector<1x128xf32>
    %317 = tpu.matmul %316, %315, %cst_81 {dimension_numbers = #tpu.dot_dimension_numbers<[1], [0], [0], [1], [0, 0, 1, 1], [], []>} : vector<1x128xbf16>, vector<128x128xbf16>, vector<1x128xf32> -> vector<1x128xf32>
    %c7 = arith.constant 7 : index
    %c0_82 = arith.constant 0 : index
    %318 = vector.load %arg10[%c7, %c0_82] : memref<12x256xf32, #tpu.memory_space<vmem>>, vector<1x128xf32>
    %319 = arith.addf %317, %318 : vector<1x128xf32>
    %cst_83 = arith.constant 0.000000e+00 : f32
    %320 = vector.broadcast %cst_83 : f32 to vector<1x128xf32>
    %321 = arith.cmpf ogt, %319, %320 : vector<1x128xf32>
    %cst_84 = arith.constant 0.00999999977 : f32
    %322 = vector.broadcast %cst_84 : f32 to vector<1x128xf32>
    %323 = arith.mulf %322, %319 : vector<1x128xf32>
    %324 = arith.select %321, %319, %323 : vector<1x128xi1>, vector<1x128xf32>
    %c128_85 = arith.constant 128 : index
    %c0_86 = arith.constant 0 : index
    %325 = vector.load %arg9[%c128_85, %c0_86] : memref<640x128xbf16, #tpu.memory_space<vmem>>, vector<128x128xbf16>
    %326 = arith.truncf %324 : vector<1x128xf32> to vector<1x128xbf16>
    %cst_87 = arith.constant dense<0.000000e+00> : vector<1x128xf32>
    %327 = tpu.matmul %326, %325, %cst_87 {dimension_numbers = #tpu.dot_dimension_numbers<[1], [0], [0], [1], [0, 0, 1, 1], [], []>} : vector<1x128xbf16>, vector<128x128xbf16>, vector<1x128xf32> -> vector<1x128xf32>
    %c8 = arith.constant 8 : index
    %c0_88 = arith.constant 0 : index
    %328 = vector.load %arg10[%c8, %c0_88] : memref<12x256xf32, #tpu.memory_space<vmem>>, vector<1x128xf32>
    %329 = arith.addf %327, %328 : vector<1x128xf32>
    %cst_89 = arith.constant 0.000000e+00 : f32
    %330 = vector.broadcast %cst_89 : f32 to vector<1x128xf32>
    %331 = arith.cmpf ogt, %329, %330 : vector<1x128xf32>
    %cst_90 = arith.constant 0.00999999977 : f32
    %332 = vector.broadcast %cst_90 : f32 to vector<1x128xf32>
    %333 = arith.mulf %332, %329 : vector<1x128xf32>
    %334 = arith.select %331, %329, %333 : vector<1x128xi1>, vector<1x128xf32>
    %c256_91 = arith.constant 256 : index
    %c0_92 = arith.constant 0 : index
    %335 = vector.load %arg9[%c256_91, %c0_92] : memref<640x128xbf16, #tpu.memory_space<vmem>>, vector<128x128xbf16>
    %336 = arith.truncf %334 : vector<1x128xf32> to vector<1x128xbf16>
    %cst_93 = arith.constant dense<0.000000e+00> : vector<1x128xf32>
    %337 = tpu.matmul %336, %335, %cst_93 {dimension_numbers = #tpu.dot_dimension_numbers<[1], [0], [0], [1], [0, 0, 1, 1], [], []>} : vector<1x128xbf16>, vector<128x128xbf16>, vector<1x128xf32> -> vector<1x128xf32>
    %c9 = arith.constant 9 : index
    %c0_94 = arith.constant 0 : index
    %338 = vector.load %arg10[%c9, %c0_94] : memref<12x256xf32, #tpu.memory_space<vmem>>, vector<1x128xf32>
    %339 = arith.addf %337, %338 : vector<1x128xf32>
    %cst_95 = arith.constant 0.000000e+00 : f32
    %340 = vector.broadcast %cst_95 : f32 to vector<1x128xf32>
    %341 = arith.cmpf ogt, %339, %340 : vector<1x128xf32>
    %cst_96 = arith.constant 0.00999999977 : f32
    %342 = vector.broadcast %cst_96 : f32 to vector<1x128xf32>
    %343 = arith.mulf %342, %339 : vector<1x128xf32>
    %344 = arith.select %341, %339, %343 : vector<1x128xi1>, vector<1x128xf32>
    %c384_97 = arith.constant 384 : index
    %c0_98 = arith.constant 0 : index
    %345 = vector.load %arg9[%c384_97, %c0_98] : memref<640x128xbf16, #tpu.memory_space<vmem>>, vector<128x128xbf16>
    %346 = arith.truncf %344 : vector<1x128xf32> to vector<1x128xbf16>
    %cst_99 = arith.constant dense<0.000000e+00> : vector<1x128xf32>
    %347 = tpu.matmul %346, %345, %cst_99 {dimension_numbers = #tpu.dot_dimension_numbers<[1], [0], [0], [1], [0, 0, 1, 1], [], []>} : vector<1x128xbf16>, vector<128x128xbf16>, vector<1x128xf32> -> vector<1x128xf32>
    %c10 = arith.constant 10 : index
    %c0_100 = arith.constant 0 : index
    %348 = vector.load %arg10[%c10, %c0_100] : memref<12x256xf32, #tpu.memory_space<vmem>>, vector<1x128xf32>
    %349 = arith.addf %347, %348 : vector<1x128xf32>
    %cst_101 = arith.constant 0.000000e+00 : f32
    %350 = vector.broadcast %cst_101 : f32 to vector<1x128xf32>
    %351 = arith.cmpf ogt, %349, %350 : vector<1x128xf32>
    %cst_102 = arith.constant 0.00999999977 : f32
    %352 = vector.broadcast %cst_102 : f32 to vector<1x128xf32>
    %353 = arith.mulf %352, %349 : vector<1x128xf32>
    %354 = arith.select %351, %349, %353 : vector<1x128xi1>, vector<1x128xf32>
    %c512 = arith.constant 512 : index
    %c0_103 = arith.constant 0 : index
    %355 = vector.load %arg9[%c512, %c0_103] : memref<640x128xbf16, #tpu.memory_space<vmem>>, vector<128x128xbf16>
    %356 = arith.truncf %354 : vector<1x128xf32> to vector<1x128xbf16>
    %cst_104 = arith.constant dense<0.000000e+00> : vector<1x128xf32>
    %357 = tpu.matmul %356, %355, %cst_104 {dimension_numbers = #tpu.dot_dimension_numbers<[1], [0], [0], [1], [0, 0, 1, 1], [], []>} : vector<1x128xbf16>, vector<128x128xbf16>, vector<1x128xf32> -> vector<1x128xf32>
    %c11 = arith.constant 11 : index
    %c0_105 = arith.constant 0 : index
    %358 = vector.load %arg10[%c11, %c0_105] : memref<12x256xf32, #tpu.memory_space<vmem>>, vector<1x128xf32>
    %359 = arith.addf %357, %358 : vector<1x128xf32>
    %360 = vector.shape_cast %359 : vector<1x128xf32> to vector<1x1x128xf32>
    %c0_106 = arith.constant 0 : index
    %c0_107 = arith.constant 0 : index
    %c0_108 = arith.constant 0 : index
    %361 = vector.load %arg11[%c0_106, %c0_107, %c0_108] : memref<1x1x128xf32, #tpu.memory_space<vmem>>, vector<1x1x128xf32>
    tpu.vector_store %arg11[%c0_106, %c0_107, %c0_108], %360 {strides = array<i32>} : memref<1x1x128xf32, #tpu.memory_space<vmem>>, vector<1x1x128xf32>,
    return
  }
  func.func @transform_0(%arg0: i32) -> (i32, i32, i32) {
    %c0_i32 = arith.constant 0 : i32
    %c0_i32_0 = arith.constant 0 : i32
    %c0_i32_1 = arith.constant 0 : i32
    return %arg0, %c0_i32, %c0_i32_0 : i32, i32, i32
  }
  func.func @transform_1(%arg0: i32) -> (i32, i32) {
    %c0_i32 = arith.constant 0 : i32
    %c0_i32_0 = arith.constant 0 : i32
    %c0_i32_1 = arith.constant 0 : i32
    return %c0_i32, %c0_i32_0 : i32, i32
  }
  func.func @transform_2(%arg0: i32) -> (i32, i32) {
    %c0_i32 = arith.constant 0 : i32
    %c0_i32_0 = arith.constant 0 : i32
    %c0_i32_1 = arith.constant 0 : i32
    return %c0_i32, %c0_i32_0 : i32, i32
  }
  func.func @transform_3(%arg0: i32) -> (i32, i32) {
    %c0_i32 = arith.constant 0 : i32
    %c0_i32_0 = arith.constant 0 : i32
    %c0_i32_1 = arith.constant 0 : i32
    return %c0_i32, %c0_i32_0 : i32, i32
  }
  func.func @transform_4(%arg0: i32) -> (i32, i32) {
    %c0_i32 = arith.constant 0 : i32
    %c0_i32_0 = arith.constant 0 : i32
    %c0_i32_1 = arith.constant 0 : i32
    return %c0_i32, %c0_i32_0 : i32, i32
  }
  func.func @transform_5(%arg0: i32) -> (i32, i32) {
    %c0_i32 = arith.constant 0 : i32
    %c0_i32_0 = arith.constant 0 : i32
    %c0_i32_1 = arith.constant 0 : i32
    return %c0_i32, %c0_i32_0 : i32, i32
  }
  func.func @transform_6(%arg0: i32) -> (i32, i32) {
    %c0_i32 = arith.constant 0 : i32
    %c0_i32_0 = arith.constant 0 : i32
    %c0_i32_1 = arith.constant 0 : i32
    return %c0_i32, %c0_i32_0 : i32, i32
  }
  func.func @transform_7(%arg0: i32) -> (i32, i32) {
    %c0_i32 = arith.constant 0 : i32
    %c0_i32_0 = arith.constant 0 : i32
    %c0_i32_1 = arith.constant 0 : i32
    return %c0_i32, %c0_i32_0 : i32, i32
  }
  func.func @transform_8(%arg0: i32) -> (i32, i32) {
    %c0_i32 = arith.constant 0 : i32
    %c0_i32_0 = arith.constant 0 : i32
    %c0_i32_1 = arith.constant 0 : i32
    return %c0_i32, %c0_i32_0 : i32, i32
  }
  func.func @transform_9(%arg0: i32) -> (i32, i32) {
    %c0_i32 = arith.constant 0 : i32
    %c0_i32_0 = arith.constant 0 : i32
    %c0_i32_1 = arith.constant 0 : i32
    return %c0_i32, %c0_i32_0 : i32, i32
  }
  func.func @transform_10(%arg0: i32) -> (i32, i32, i32) {
    %c0_i32 = arith.constant 0 : i32
    %c0_i32_0 = arith.constant 0 : i32
    %c0_i32_1 = arith.constant 0 : i32
    return %arg0, %c0_i32, %c0_i32_0 : i32, i32, i32
  }
}

</mosaic_0001>

<bundles_post_ra>
// kernel: atom_count_cnn_forward.1
= control target key start
LH: loop header
LB: loop body
LE: loop exit
PB: predicated region body
PF: predicated region fallthrough
CT: control target
= control target key end

     0   :  { %15 = vsyncpa [#allocation3], 0  ;;  %s11955_s0 = inlined_call_operand.vmem [shape: f32[2,16,5], index: 0, kind: input, shape index: {}]   ;;  %s11956_s1 = inlined_call_operand.vmem [shape: bf16[40,256], index: 1, kind: input, shape index: {}]   ;;  %s11957_s2 = inlined_call_operand.hbm [shape: bf16[2048,256], index: 2, kind: input, shape index: {}]   ;;  %s11958_s3 = inlined_call_operand.vmem [shape: bf16[2048,128], index: 3, kind: input, shape index: {}]   ;;  %s11959_s4 = inlined_call_operand.hbm [shape: bf16[1024,128], index: 4, kind: input, shape index: {}]   ;;  %s11960_s5 = inlined_call_operand.vmem [shape: bf16[1024,64], index: 5, kind: input, shape index: {}]   ;;  %s11961_s6 = inlined_call_operand.vmem [shape: bf16[512,64], index: 6, kind: input, shape index: {}]   ;;  %s11962_s7 = inlined_call_operand.hbm [shape: bf16[512,128], index: 7, kind: input, shape index: {}]   ;;  %s11963_s8 = inlined_call_operand.hbm [shape: bf16[640,128], index: 8, kind: input, shape index: {}]   ;;  %s11964_s9 = inlined_call_operand.vmem [shape: f32[12,256], index: 9, kind: input, shape index: {}]   ;;  %s11965_s10 = inlined_call_operand.vmem [shape: f32[2,1,128], index: 10, kind: output, shape index: {}]  }
   0x1   :  { %16 = vsyncpa [#allocation5], 0 }
   0x2   :  { %17 = vsyncpa [#allocation8], 0  ;;  %s10107_s13 = smov 0  }
   0x3 LB: > { %s10032_s14 = smov [#allocation4]   ;;  %s10113_s16 = sadd.s32 4294967295, %s10030_s13   ;;  %s10030_s13 = sphi %s10107_s13, %s23_s13  }
   0x4   : > { %s300_s15 = sshll.u32 %s10032_s14, 4  ;;  %p7658_p0 = scmp.ge.s32.totalorder %s10030_s13, 1  ;;  %s10118_s15 = int_to_ptr.vmem [resolvable:$true] %s300_s15 }
   0x5   : > { %p269_p1 = scmp.lt.s32.totalorder %s10030_s13, 3  ;;  %p11970_p2 = scmp.eq.s32.totalorder %s10113_s16, 0 }
   0x6   : > { %s10033_s18 = smov [#allocation2]   ;;  %s10034_s21 = smov [#allocation6]  }
   0x7   : > { %p10120_p3 = pnand %p7658_p0, %p269_p1  ;;  %s284_s19 = sshll.u32 %s10033_s18, 4  ;;  %s10126_s19 = int_to_ptr.vmem [resolvable:$true] %s284_s19 }
   0x8   : > { %s10134_s22 = sshll.u32 %s10034_s21, 4  ;;  %s9900_s25 = scalar_lea.hbm %s11959_s4, 8192  ;;  %s320_s22 = int_to_ptr.vmem [resolvable:$true] %s10134_s22 }
   0x9   : > { %s11979_s17 = scalar_select %p10120_p3, 1, 0 }
   0xa   : > { %p9054_p4 = pneg %p10120_p3  ;;  %p9901_p6 = scmp.ne.s32.totalorder %s11959_s4, %s9900_s25 }
   0xb   : > { %p9907_p10 = scmp.lt.u32.totalorder %s9900_s25, %s11959_s4 }
   0xc   : > { %p10130_p5 = pnand %p11970_p2, %p9054_p4 }
   0xe   : > { %p10144_p7 = pneg %p10130_p5 }
  0x10   : > { %p9903_p8 = pnand %p10144_p7, %p9901_p6 }
  0x12   : > { %p9904_p9 = pneg %p9903_p8 }
  0x14   : > { %p9909_p11 = pnand %p9907_p10, %p9904_p9 }
  0x16   : > { %9912 = shalt.err (!%p9909_p11)
}
  0x17   : > { %s9913_s11 = scalar_lea.vmem %s10118_s15, 8192  ;;  %p9921_p1 = scmp.lt.s32.totalorder %s10118_s15, %s10118_s15 }
  0x18   : > { %p9914_p12 = scmp.ne.s32.totalorder %s10118_s15, %s9913_s11  ;;  %p9922_p4 = scmp.lt.s32.totalorder %s9913_s11, %s9913_s11 }
  0x1a   : > { %p9916_p13 = pnand %p9914_p12, %p10144_p7  ;;  %p9923_p6 = por %p9922_p4, %p9921_p1 }
  0x1c   : > { %p9917_p0 = pneg %p9916_p13 }
  0x1e   : > { %p9924_p8 = pnand %p9923_p6, %p9917_p0 }
  0x20   : > { %9927 = shalt.err (!%p9924_p8)
}
  0x21   : > { %s11966_s12 = smov 64   ;;  %s11968_s14 = smov 4  }
  0x22   : > { %9060 = dma.hbm_to_vmem [thread:$0]  (!%p10130_p5), %s11959_s4, 8192, %s10118_s15, [#allocation5], %s11966_s12, %s11966_s12, %s11968_s14  }
  0x23   : > { %s9928_s25 = scalar_lea.hbm %s11957_s2, 32768 }
  0x24   : > { %p9929_p9 = scmp.ne.s32.totalorder %s11957_s2, %s9928_s25  ;;  %p9935_p12 = scmp.lt.u32.totalorder %s9928_s25, %s11957_s2 }
  0x26   : > { %p9931_p10 = pnand %p9929_p9, %p10144_p7 }
  0x28   : > { %p9932_p11 = pneg %p9931_p10 }
  0x2a   : > { %p9937_p13 = pnand %p9935_p12, %p9932_p11 }
  0x2c   : > { %9940 = shalt.err (!%p9937_p13)
}
  0x2d   : > { %s9941_s15 = scalar_lea.vmem %s10126_s19, 32768  ;;  %p9949_p6 = scmp.lt.s32.totalorder %s10126_s19, %s10126_s19 }
  0x2e   : > { %p9942_p0 = scmp.ne.s32.totalorder %s10126_s19, %s9941_s15  ;;  %p9950_p8 = scmp.lt.s32.totalorder %s9941_s15, %s9941_s15 }
  0x30   : > { %p9944_p1 = pnand %p9942_p0, %p10144_p7  ;;  %p9951_p9 = por %p9950_p8, %p9949_p6 }
  0x32   : > { %p9945_p4 = pneg %p9944_p1 }
  0x34   : > { %p9952_p10 = pnand %p9951_p9, %p9945_p4 }
  0x36   : > { %9955 = shalt.err (!%p9952_p10)
}
  0x37   : > { %s10037_s11 = smov 128   ;;  %s10038_s18 = smov 8  }
  0x38   : > { %9057 = dma.hbm_to_vmem [thread:$0]  (!%p10130_p5), %s11957_s2, 32768, %s10126_s19, [#allocation3], %s10037_s11, %s10037_s11, %s10038_s18  }
  0x39   : > { %s10039_s24 = smov [#allocation7]   ;;  %s9956_s29 = scalar_lea.hbm %s11962_s7, 4096 }
  0x3a   : > { %s332_s25 = sshll.u32 %s10039_s24, 4  ;;  %p9957_p11 = scmp.ne.s32.totalorder %s11962_s7, %s9956_s29  ;;  %s333_s25 = int_to_ptr.vmem [resolvable:$true] %s332_s25 }
  0x3b   : > { %p9963_p0 = scmp.lt.u32.totalorder %s9956_s29, %s11962_s7 }
  0x3c   : > { %p9959_p12 = pnand %p9957_p11, %p10144_p7 }
  0x3e   : > { %p9960_p13 = pneg %p9959_p12 }
  0x40   : > { %p9965_p1 = pnand %p9963_p0, %p9960_p13 }
  0x42   : > { %9968 = shalt.err (!%p9965_p1)
}
  0x43   : > { %s9969_s19 = scalar_lea.vmem %s320_s22, 4096  ;;  %p9977_p9 = scmp.lt.s32.totalorder %s320_s22, %s320_s22 }
  0x44   : > { %p9970_p4 = scmp.ne.s32.totalorder %s320_s22, %s9969_s19  ;;  %p9978_p10 = scmp.lt.s32.totalorder %s9969_s19, %s9969_s19 }
  0x46   : > { %p9972_p6 = pnand %p9970_p4, %p10144_p7  ;;  %p9979_p2 = por %p9978_p10, %p9977_p9 }
  0x48   : > { %p9973_p8 = pneg %p9972_p6 }
  0x4a   : > { %p9980_p3 = pnand %p9979_p2, %p9973_p8 }
  0x4c   : > { %9983 = shalt.err (!%p9980_p3)
}
  0x4d   : > { %s11982_s11 = smov 4   ;;  %s11983_s18 = smov 64  }
  0x4e   : > { %9063 = dma.hbm_to_vmem [thread:$0]  (!%p10130_p5), %s11962_s7, 4096, %s320_s22, [#allocation5], %s11983_s18, %s11983_s18, %s11982_s11  }
  0x4f   : > { %s9984_s24 = scalar_lea.hbm %s11963_s8, 5120 }
  0x50   : > { %p9985_p2 = scmp.ne.s32.totalorder %s11963_s8, %s9984_s24  ;;  %p9991_p12 = scmp.lt.u32.totalorder %s9984_s24, %s11963_s8 }
  0x52   : > { %p9987_p3 = pnand %p9985_p2, %p10144_p7 }
  0x54   : > { %p9988_p11 = pneg %p9987_p3 }
  0x56   : > { %p9993_p13 = pnand %p9991_p12, %p9988_p11 }
  0x58   : > { %9996 = shalt.err (!%p9993_p13)
}
  0x59   : > { %s9997_s15 = scalar_lea.vmem %s333_s25, 5120  ;;  %p10005_p6 = scmp.lt.s32.totalorder %s333_s25, %s333_s25 }
  0x5a   : > { %p9998_p0 = scmp.ne.s32.totalorder %s333_s25, %s9997_s15  ;;  %p10006_p8 = scmp.lt.s32.totalorder %s9997_s15, %s9997_s15 }
  0x5c   : > { %p10000_p1 = pnand %p9998_p0, %p10144_p7  ;;  %p10007_p9 = por %p10006_p8, %p10005_p6 }
  0x5e   : > { %p10001_p4 = pneg %p10000_p1 }
  0x60   : > { %p10008_p10 = pnand %p10007_p9, %p10001_p4 }
  0x62   : > { %10011 = shalt.err (!%p10008_p10)
}
  0x63   : > { %9066 = dma.hbm_to_vmem [thread:$0]  (!%p10130_p5), %s11963_s8, 5120, %s333_s25, [#allocation8], %s11983_s18, %s11983_s18, %s11982_s11  }
  0x64   : > { %p11984_p2 = scmp.ne.s32.totalorder %s11979_s17, 0 }
  0x66   : > { %359 = sbr.rel (%p11984_p2) target bundleno = 4040 (0xfc8), region = 60 }
  0x6d   : > { %p11985_p7 = scmp.eq.s32.totalorder %s10113_s16, 0 }
  0x6f   : > { %10017 = dma.done.wait (%p11985_p7), [#allocation3], 32768   ;;  %p11986_p3 = pmov %p11985_p7 }
  0x71   : > { %10019 = vsyncadd (%p11986_p3), [#allocation3], 4294934528  ;;  %p11987_p11 = pmov %p11986_p3 }
  0x72   : > { %p11988_p12 = pmov %p11986_p3 }
  0x73   : > { %10021 = dma.done.wait (%p11987_p11), [#allocation5], 12288  }
  0x74   : > { %10023 = vsyncadd (%p11988_p12), [#allocation5], 4294955008  ;;  %p11989_p13 = pmov %p11986_p3 }
  0x75   : > { %p11990_p5 = pmov %p11986_p3 }
  0x76   : > { %10025 = dma.done.wait (%p11989_p13), [#allocation8], 5120  }
  0x77   : > { %10027 = vsyncadd (%p11990_p5), [#allocation8], 4294962176  ;;  %p407_p0 = scmp.lt.s32.totalorder %s10113_s16, 1  ;;  %vm420_vm0 = vcmask 1043456   ;;  %vm432_vm1 = vcmask 1046528   ;;  %vm466_vm2 = vcmask 1044480  }
  0x78   : > { %vm449_vm3 = vcmask 1045504   ;;  %v9148_v4 = vld [vmem:[%s11956_s1 + $0x4] ss:$8 sps:$4 sm:$0xff]   ;;  %vm499_vm4 = vcmask 1042432   ;;  %vm516_vm5 = vcmask 1041408   ;;  %vm533_vm6 = vcmask 1040384  }
  0x79   : > { %s12014_s16 = smov (!%p407_p0, %s10113_s16), 1  ;;  %v9150_v5 = vld [vmem:[%s11956_s1] ss:$8 sps:$4 sm:$0xff]   ;;  %623 = vmatprep.subr.bf16.mxu0 %v9148_v4  ;;  %v9151_v9 = vld [vmem:[%s11956_s1 + $0x14] ss:$8 sps:$4 sm:$0xff]   ;;  %s10040_s27 = smov 5  }
  0x7a   : > { %s8332_s17 = sshll.u32 %s12014_s16, 4  ;;  %624 = vmatpush1.bf16.msra.mxu0 %v9150_v5  ;;  %v9153_v14 = vld [vmem:[%s11956_s1 + $0x10] ss:$8 sps:$4 sm:$0xff]   ;;  %s10041_s29 = smov 15   ;;  %v582_v43 = vld [vmem:[%s11956_s1 + $0x20] sm:$0xff]  ;;  %v11972_v53 = vmov 0.0  }
  0x7b   : > { %s411_s25 = scalar_lea.vmem %s11955_s0, %s8332_s17  ;;  %625 = vmatprep.subr.bf16.mxu0 %v9151_v9  ;;  %s10042_s22 = smov 10   ;;  %v10324_v54 = vrot.slane %v11972_v53, 1  ;;  %v7676_v55 = vcombine.high %v582_v43, %v582_v43  ;;  %v7675_v56 = vcombine.low %v582_v43, %v582_v43  ;;  %v10046_v58 = vmov 0   ;;  %v9158_v4 = vld [vmem:[#allocation2] ss:$8 sps:$4 sm:$0xff]  }
  0x7c   : > { %v416_v0 = vld [vmem:[%s411_s25] sm:$0xff]  ;;  %v417_v1 = vld [vmem:[%s411_s25 + $0x8] sm:$0xff]  ;;  %s10043_s19 = smov 20   ;;  %s10045_s17 = smov 25   ;;  %655 = vmatprep.mubr.bf16.mxu0 %v10046_v58  ;;  %v10330_v59 = vrot.slane %v11972_v53, 2  ;;  %v10339_v62 = vrot.slane %v11972_v53, 3 }
  0x7d   : > { %v421_v2 = vrot.slane %v416_v0, 4  ;;  %v422_v3 = vrot.slane %v417_v1, 4  ;;  %s10047_s20 = smov 30   ;;  %v618_v60 = vsel %vm420_vm0, %v7675_v56, 0  ;;  %s10048_s28 = smov 35   ;;  %v10346_v0 = vrot.slane %v11972_v53, 4 }
  0x7e   : > { %626 = vmatpush1.bf16.msra.mxu0 %v9153_v14  ;;  %v9159_v5 = vld [vmem:[#allocation2 + $0x14] ss:$8 sps:$4 sm:$0xff]   ;;  %v9162_v14 = vld [vmem:[#allocation2 + $0x24] ss:$8 sps:$4 sm:$0xff]   ;;  %vm550_vm7 = vcmask 39936   ;;  %vm554_vm8 = vcmask 80896   ;;  %s414_s24 = scalar_lea.vmem %s11965_s10, %s12014_s16 }
  0x7f   : > { %v10263_v6 = vsel %vm420_vm0, %v421_v2, %v422_v3  ;;  %v10266_v7 = vsel %vm420_vm0, 0.0, %v421_v2  ;;  %v10269_v8 = vsel %vm420_vm0, %v422_v3, 0.0  ;;  %7677 = vmatprep.subr.msk.bf16.mxu0 %vm420_vm0, %v7676_v55  ;;  %v10353_v2 = vrot.slane %v11972_v53, 5  ;;  %v9156_v3 = vld [vmem:[#allocation2 + $0x4] ss:$8 sps:$4 sm:$0xff]   ;;  %s10050_s26 = smov 64  }
  0x80   : > { %v433_v10 = vrot.slane %v10266_v7, 1  ;;  %v434_v11 = vrot.slane %v10263_v6, 1  ;;  %v436_v12 = vrot.slane %v10269_v8, 1  ;;  %v467_v13 = vrot.slane %v10266_v7, 3  ;;  %2463 = vmatprep.subr.bf16.mxu1 %v9156_v3 }
  0x81   : > { %v468_v15 = vrot.slane %v10263_v6, 3  ;;  %v470_v16 = vrot.slane %v10269_v8, 3  ;;  %v450_v17 = vrot.slane %v10266_v7, 2  ;;  %v451_v18 = vrot.slane %v10263_v6, 2  ;;  %2464 = vmatpush1.bf16.msra.mxu1 %v9158_v4 }
  0x82   : > { %v435_v19 = vsel %vm432_vm1, %v433_v10, %v434_v11  ;;  %v437_v20 = vsel %vm432_vm1, %v434_v11, %v436_v12  ;;  %v453_v21 = vrot.slane %v10269_v8, 2  ;;  %v483_v22 = vrot.slane %v10266_v7, 4  ;;  %628 = vmatpush1.bf16.msra.mxu0 %v618_v60  ;;  %2465 = vmatprep.subr.bf16.mxu1 %v9159_v5 }
  0x83   : > { %v9103_v23 = vpack.i.bf16 %v437_v20, %v435_v19  ;;  %v469_v24 = vsel %vm466_vm2, %v467_v13, %v468_v15  ;;  %v471_v25 = vsel %vm466_vm2, %v468_v15, %v470_v16  ;;  %v452_v26 = vsel %vm449_vm3, %v450_v17, %v451_v18  ;;  %v9161_v13 = vld [vmem:[#allocation2 + $0x10] ss:$8 sps:$4 sm:$0xff]   ;;  %v9164_v17 = vld [vmem:[#allocation2 + $0x20] ss:$8 sps:$4 sm:$0xff]   ;;  %v9168_v20 = vld [vmem:[#allocation2 + $0x44] ss:$8 sps:$4 sm:$0xff]  }
  0x84   : > { %v9113_v27 = vpack.i.bf16 %v471_v25, %v469_v24  ;;  %v454_v28 = vsel %vm449_vm3, %v451_v18, %v453_v21  ;;  %v484_v29 = vrot.slane %v10263_v6, 4  ;;  %v486_v30 = vrot.slane %v10269_v8, 4  ;;  %v9165_v18 = vld [vmem:[#allocation2 + $0x34] ss:$8 sps:$4 sm:$0xff]   ;;  %v9167_v19 = vld [vmem:[#allocation2 + $0x30] ss:$8 sps:$4 sm:$0xff]  }
  0x85   : > { %9104 = vrot.lane.b32.xlu0 %v9103_v23, %s10040_s27  ;;  %v9108_v31 = vpack.i.bf16 %v454_v28, %v452_v26  ;;  %v500_v32 = vrot.slane %v10266_v7, 5  ;;  %v501_v33 = vrot.slane %v10263_v6, 5  ;;  %v503_v34 = vrot.slane %v10269_v8, 5  ;;  %2466 = vmatpush1.bf16.msra.mxu1 %v9161_v13  ;;  %v9173_v23 = vld [vmem:[#allocation2 + $0x50] ss:$8 sps:$4 sm:$0xff]  }
  0x86   : > { %9114 = vrot.lane.b32.xlu1 %v9113_v27, %s10041_s29  ;;  %v485_v35 = vsel %vm420_vm0, %v483_v22, %v484_v29  ;;  %v487_v36 = vsel %vm420_vm0, %v484_v29, %v486_v30  ;;  %v517_v37 = vrot.slane %v10266_v7, 6  ;;  %v518_v38 = vrot.slane %v10263_v6, 6  ;;  %2467 = vmatprep.subr.bf16.mxu1 %v9162_v14  ;;  %v9171_v22 = vld [vmem:[#allocation2 + $0x54] ss:$8 sps:$4 sm:$0xff]   ;;  %v9174_v24 = vld [vmem:[#allocation2 + $0x64] ss:$8 sps:$4 sm:$0xff]  }
  0x87   : > { %v9118_v39 = vpack.i.bf16 %v487_v36, %v485_v35  ;;  %v502_v40 = vsel %vm499_vm4, %v500_v32, %v501_v33  ;;  %v504_v41 = vsel %vm499_vm4, %v501_v33, %v503_v34  ;;  %v520_v42 = vrot.slane %v10269_v8, 6  ;;  %v9176_v25 = vld [vmem:[#allocation2 + $0x60] ss:$8 sps:$4 sm:$0xff]   ;;  %v9177_v26 = vld [vmem:[#allocation2 + $0x74] ss:$8 sps:$4 sm:$0xff]  }
  0x88   : > { %v519_v44 = vsel %vm516_vm5, %v517_v37, %v518_v38  ;;  %v534_v45 = vrot.slane %v10266_v7, 7  ;;  %v535_v46 = vrot.slane %v10263_v6, 7  ;;  %v9123_v47 = vpack.i.bf16 %v504_v41, %v502_v40  ;;  %v9179_v27 = vld [vmem:[#allocation2 + $0x70] ss:$8 sps:$4 sm:$0xff]   ;;  %v9180_v28 = vld [vmem:[#allocation2 + $0x84] ss:$8 sps:$4 sm:$0xff]  }
  0x89   : > { %9109 = vrot.lane.b32.xlu0 %v9108_v31, %s10042_s22  ;;  %v521_v48 = vsel %vm516_vm5, %v518_v38, %v520_v42  ;;  %v537_v49 = vrot.slane %v10269_v8, 7  ;;  %v439_v61 = vsel %vm432_vm1, %v436_v12, %v10324_v54  ;;  %v456_v63 = vsel %vm449_vm3, %v453_v21, %v10330_v59  ;;  %2468 = vmatpush1.bf16.msra.mxu1 %v9164_v17  ;;  %v9170_v21 = vld [vmem:[#allocation2 + $0x40] ss:$8 sps:$4 sm:$0xff]   ;;  %v9185_v31 = vld [vmem:[#allocation2 + $0x90] ss:$8 sps:$4 sm:$0xff]  }
  0x8a   : > { %9119 = vrot.lane.b32.xlu1 %v9118_v39, %s10043_s19  ;;  %v9128_v50 = vpack.i.bf16 %v521_v48, %v519_v44  ;;  %v536_v51 = vsel %vm533_vm6, %v534_v45, %v535_v46  ;;  %v473_v1 = vsel %vm466_vm2, %v470_v16, %v10339_v62  ;;  %v489_v9 = vsel %vm420_vm0, %v486_v30, %v10346_v0  ;;  %v9182_v29 = vld [vmem:[#allocation2 + $0x80] ss:$8 sps:$4 sm:$0xff]   ;;  %v9183_v30 = vld [vmem:[#allocation2 + $0x94] ss:$8 sps:$4 sm:$0xff]   ;;  %v9186_v32 = vld [vmem:[#allocation2 + $0xa4] ss:$8 sps:$4 sm:$0xff]  }
  0x8b   : > { %v538_v52 = vsel %vm533_vm6, %v535_v46, %v537_v49  ;;  %v10360_v10 = vrot.slane %v11972_v53, 6  ;;  %v506_v11 = vsel %vm499_vm4, %v503_v34, %v10353_v2  ;;  %v10365_v12 = vrot.slane %v11972_v53, 7  ;;  %2469 = vmatprep.subr.bf16.mxu1 %v9165_v18  ;;  %v9188_v33 = vld [vmem:[#allocation2 + $0xa0] ss:$8 sps:$4 sm:$0xff]   ;;  %v9189_v34 = vld [vmem:[#allocation2 + $0xb4] ss:$8 sps:$4 sm:$0xff]  }
  0x8c   : > { %v9133_v57 = vpack.i.bf16 %v538_v52, %v536_v51  ;;  %v9191_v35 = vld [vmem:[#allocation2 + $0xb0] ss:$8 sps:$4 sm:$0xff]   ;;  %v9192_v36 = vld [vmem:[#allocation2 + $0xc4] ss:$8 sps:$4 sm:$0xff]   ;;  %v9194_v37 = vld [vmem:[#allocation2 + $0xc0] ss:$8 sps:$4 sm:$0xff]  }
  0x8d   : > { %9124 = vrot.lane.b32.xlu0 %v9123_v47, %s10045_s17  ;;  %11991 = vst [vmem:[#allocation12_spill] sm:$0xff] %v10365_v12  ;;  %v523_v15 = vsel %vm516_vm5, %v520_v42, %v10360_v10  ;;  %v540_v16 = vsel %vm533_vm6, %v537_v49, %v10365_v12  ;;  %2470 = vmatpush1.bf16.msra.mxu1 %v9167_v19  ;;  %vm558_vm9 = vcmask 121856   ;;  %vm562_vm10 = vcmask 162816   ;;  %v9222_v53 = vld [vmem:[#allocation2 + $0x160] ss:$8 sps:$4 sm:$0xff]  }
  0x8e   : > { %9129 = vrot.lane.b32.xlu1 %v9128_v50, %s10047_s20  ;;  %2471 = vmatprep.subr.bf16.mxu1 %v9168_v20  ;;  %vm566_vm11 = vcmask 203776   ;;  %vm570_vm12 = vcmask 244736   ;;  %vm574_vm13 = vcmask 285696   ;;  %vm610_vm14 = vcmask 326656   ;;  %v9228_v12 = vld [vmem:[#allocation2 + $0x180] ss:$8 sps:$4 sm:$0xff]  }
  0x91   : > { %9134 = vrot.lane.b32.xlu0 %v9133_v57, %s10048_s28  ;;  %2472 = vmatpush1.bf16.msra.mxu1 %v9170_v21 }
  0x92   : > { %444 = vrot.lane.b32.xlu1 %v439_v61, %s10040_s27  ;;  %2473 = vmatprep.subr.bf16.mxu1 %v9171_v22 }
  0x95   : > { %461 = vrot.lane.b32.xlu0 %v456_v63, %s10042_s22  ;;  %2474 = vmatpush1.bf16.msra.mxu1 %v9173_v23 }
  0x96   : > { %478 = vrot.lane.b32.xlu1 %v473_v1, %s10041_s29  ;;  %2475 = vmatprep.subr.bf16.mxu1 %v9174_v24 }
  0x99   : > { %494 = vrot.lane.b32.xlu0 %v489_v9, %s10043_s19  ;;  %2476 = vmatpush1.bf16.msra.mxu1 %v9176_v25 }
  0x9a   : > { %511 = vrot.lane.b32.xlu1 %v506_v11, %s10045_s17  ;;  %2477 = vmatprep.subr.bf16.mxu1 %v9177_v26 }
  0x9d   : > { %528 = vrot.lane.b32.xlu0 %v523_v15, %s10047_s20  ;;  %2478 = vmatpush1.bf16.msra.mxu1 %v9179_v27 }
  0x9e   : > { %545 = vrot.lane.b32.xlu1 %v540_v16, %s10048_s28  ;;  %2479 = vmatprep.subr.bf16.mxu1 %v9180_v28 }
  0xa1   : > { %2480 = vmatpush1.bf16.msra.mxu1 %v9182_v29 }
  0xa2   : > { %2481 = vmatprep.subr.bf16.mxu1 %v9183_v30 }
  0xa5   : > { %2482 = vmatpush1.bf16.msra.mxu1 %v9185_v31 }
  0xa6   : > { %2483 = vmatprep.subr.bf16.mxu1 %v9186_v32 }
  0xa9   : > { %2484 = vmatpush1.bf16.msra.mxu1 %v9188_v33 }
  0xaa   : > { %2485 = vmatprep.subr.bf16.mxu1 %v9189_v34  ;;  %v9195_v34 = vld [vmem:[#allocation2 + $0xd4] ss:$8 sps:$4 sm:$0xff]  }
  0xad   : > { %2486 = vmatpush1.bf16.msra.mxu1 %v9191_v35  ;;  %v9197_v35 = vld [vmem:[#allocation2 + $0xd0] ss:$8 sps:$4 sm:$0xff]  }
  0xae   : > { %2487 = vmatprep.subr.bf16.mxu1 %v9192_v36  ;;  %v9200_v36 = vld [vmem:[#allocation2 + $0xe0] ss:$8 sps:$4 sm:$0xff]  }
  0xb1   : > { %2488 = vmatpush1.bf16.msra.mxu1 %v9194_v37  ;;  %v9201_v37 = vld [vmem:[#allocation2 + $0xf4] ss:$8 sps:$4 sm:$0xff]  }
  0xb2   : > { %2489 = vmatprep.subr.bf16.mxu1 %v9195_v34 }
  0xb5   : > { %2490 = vmatpush1.bf16.msra.mxu1 %v9197_v35 }
  0xf7   : > { %v9105_v38 = vpop.permute.xlu0 %9104 }
  0xf8   : > { %v9115_v39 = vpop.permute.xlu1 %9114  ;;  %v9107_v40 = vunpack.i.h.bf16 %v9105_v38  ;;  %v9106_v41 = vunpack.i.l.bf16 %v9105_v38  ;;  %v9203_v38 = vld [vmem:[#allocation2 + $0xf0] ss:$8 sps:$4 sm:$0xff]  }
  0xf9   : > { %v9117_v43 = vunpack.i.h.bf16 %v9115_v39  ;;  %v9116_v44 = vunpack.i.l.bf16 %v9115_v39  ;;  %v9206_v39 = vld [vmem:[#allocation2 + $0x104] ss:$8 sps:$4 sm:$0xff]  }
  0xfa   : > { %v551_v50 = vsel %vm550_vm7, %v10266_v7, %v9106_v41  ;;  %v552_v51 = vsel %vm550_vm7, %v10263_v6, %v9107_v40  ;;  %v676_v40 = vlaneseq }
  0xfb   : > { %v9110_v42 = vpop.permute.xlu0 %9109 }
  0xfc   : > { %v9112_v45 = vunpack.i.h.bf16 %v9110_v42  ;;  %v9111_v46 = vunpack.i.l.bf16 %v9110_v42  ;;  %v9120_v47 = vpop.permute.xlu1 %9119  ;;  %v10402_v41 = vshrl.u32 %v676_v40, 7 }
  0xfd   : > { %v9122_v48 = vunpack.i.h.bf16 %v9120_v47  ;;  %v9121_v49 = vunpack.i.l.bf16 %v9120_v47 }
  0xfe   : > { %v555_v52 = vsel %vm554_vm8, %v551_v50, %v9111_v46  ;;  %v556_v55 = vsel %vm554_vm8, %v552_v51, %v9112_v45  ;;  %v11975_v42 = vsub.s32 0, %v10402_v41 }
  0xff   : > { %v9125_v56 = vpop.permute.xlu0 %9124  ;;  %v559_v57 = vsel %vm558_vm9, %v555_v52, %v9116_v44  ;;  %v560_v60 = vsel %vm558_vm9, %v556_v55, %v9117_v43  ;;  %v674_v43 = vld [vmem:[%s11964_s9] ss:$8 sm:$0x3]  ;;  %v11974_v44 = vsub.s32 1, %v10402_v41 }
 0x100   : > { %v9127_v61 = vunpack.i.h.bf16 %v9125_v56  ;;  %v9126_v63 = vunpack.i.l.bf16 %v9125_v56  ;;  %v9130_v1 = vpop.permute.xlu1 %9129  ;;  %v563_v3 = vsel %vm562_vm10, %v559_v57, %v9121_v49  ;;  %v564_v7 = vsel %vm562_vm10, %v560_v60, %v9122_v48 }
 0x101   : > { %v9132_v4 = vunpack.i.h.bf16 %v9130_v1  ;;  %v9131_v5 = vunpack.i.l.bf16 %v9130_v1  ;;  %v679_v45 = vrot.slane %v674_v43, %v11975_v42  ;;  %v683_v46 = vrot.slane %v674_v43, %v11974_v44 }
 0x102   : > { %v567_v6 = vsel %vm566_vm11, %v563_v3, %v9126_v63  ;;  %v568_v9 = vsel %vm566_vm11, %v564_v7, %v9127_v61  ;;  %v10414_v61 = vadd.s32 16, %v10402_v41 }
 0x103   : > { %v9135_v11 = vpop.permute.xlu0 %9134  ;;  %v571_v17 = vsel %vm570_vm12, %v567_v6, %v9131_v5  ;;  %v572_v18 = vsel %vm570_vm12, %v568_v9, %v9132_v4 }
 0x104   : > { %v9137_v13 = vunpack.i.h.bf16 %v9135_v11  ;;  %v9136_v14 = vunpack.i.l.bf16 %v9135_v11  ;;  %v445_v15 = vpop.permute.xlu1 %444 }
 0x105   : > { %v553_v16 = vsel %vm550_vm7, %v10269_v8, %v445_v15 }
 0x106   : > { %v575_v19 = vsel %vm574_vm13, %v571_v17, %v9136_v14  ;;  %v576_v20 = vsel %vm574_vm13, %v572_v18, %v9137_v13  ;;  %v11992_v14 = vmov 0 }
 0x107   : > { %v462_v21 = vpop.permute.xlu0 %461  ;;  %v583_v22 = vpack.c.bf16 %v576_v20, %v575_v19  ;;  %v9204_v20 = vld [vmem:[#allocation2 + $0x100] ss:$8 sps:$4 sm:$0xff]  }
 0x108   : > { %v557_v23 = vsel %vm554_vm8, %v553_v16, %v462_v21  ;;  %v479_v24 = vpop.permute.xlu1 %478 }
 0x109   : > { %v561_v25 = vsel %vm558_vm9, %v557_v23, %v479_v24  ;;  %7678 = vmatmul.mubr.msk.bf16.vlgmr.msra.gmra.mrb[0].mxu0 %vm610_vm14, %v583_v22 }
 0x10a   : > { %665 = vmatprep.mubr.bf16.mxu0 %v10046_v58  ;;  %v9198_v58 = vld [vmem:[#allocation2 + $0xe4] ss:$8 sps:$4 sm:$0xff]  }
 0x10b   : > { %v495_v8 = vpop.permute.xlu0 %494  ;;  %2491 = vmatprep.subr.bf16.mxu1 %v9198_v58 }
 0x10c   : > { %v565_v26 = vsel %vm562_vm10, %v561_v25, %v495_v8  ;;  %v512_v27 = vpop.permute.xlu1 %511  ;;  %2492 = vmatpush1.bf16.msra.mxu1 %v9200_v36  ;;  %vm716_vm10 = vcmp.lt.s32.totalorder %v10414_v61, 17 }
 0x10d   : > { %v569_v28 = vsel %vm566_vm11, %v565_v26, %v512_v27  ;;  %2493 = vmatprep.subr.bf16.mxu1 %v9201_v37  ;;  %vm10423_vm11 = vmneg %vm420_vm0  ;;  %v9209_v27 = vld [vmem:[#allocation2 + $0x114] ss:$8 sps:$4 sm:$0xff]  }
 0x10e   : > { %v11993_v14 = vsel %vm10423_vm11, 4294967295, %v11992_v14 }
 0x10f   : > { %v529_v29 = vpop.permute.xlu0 %528  ;;  %11994 = vst [vmem:[#allocation13_spill] sm:$0xff] %v11993_v14 }
 0x110   : > { %v573_v30 = vsel %vm570_vm12, %v569_v28, %v529_v29  ;;  %v546_v31 = vpop.permute.xlu1 %545  ;;  %2494 = vmatpush1.bf16.msra.mxu1 %v9203_v38  ;;  %vm10049_vm12 = vmmov 1  }
 0x111   : > { %v577_v32 = vsel %vm574_vm13, %v573_v30, %v546_v31  ;;  %2514 = vmatprep.subr.bf16.mxu1 %v9206_v39  ;;  %vm10444_vm13 = vmpackc.low %vm10049_vm12, %vm10423_vm11  ;;  %vm2910_vm12 = vcmp.lt.s32.totalorder %v10414_v61, 18 }
 0x112   : > { %v584_v33 = vpack.c.bf16 %v577_v32, %v577_v32 }
 0x114   : > { %7679 = vmatmul.mubr.msk.bf16.gmra.mrb[4].mxu0 %vm610_vm14, %v584_v33 }
 0x1dc   : > { %v657_v47 = vpop.f32.mrb[0].mxu0 }
 0x1dd   : > { %v686_v48 = vadd.f32 %v679_v45, %v657_v47  ;;  %v659_v49 = vpop.f32.mrb[1].mxu0 }
 0x1de   : > { %v687_v50 = vadd.f32 %v683_v46, %v659_v49  ;;  %v661_v51 = vpop.f32.mrb[2].mxu0  ;;  %v9207_v49 = vld [vmem:[#allocation2 + $0x110] ss:$8 sps:$4 sm:$0xff]  }
 0x1df   : > { %vm692_vm15 = vcmp.gt.f32.partialorder %v686_v48, 0.0  ;;  %v698_v52 = vmul.f32 0.01, %v686_v48  ;;  %v688_v55 = vadd.f32 %v679_v45, %v661_v51  ;;  %v663_v56 = vpop.f32.mrb[3].mxu0 }
 0x1e0   : > { %vm693_vm7 = vcmp.gt.f32.partialorder %v687_v50, 0.0  ;;  %v699_v57 = vmul.f32 0.01, %v687_v50  ;;  %v689_v60 = vadd.f32 %v683_v46, %v663_v56 }
 0x1e1   : > { %v704_v63 = vsel %vm692_vm15, %v686_v48, %v698_v52  ;;  %vm694_vm8 = vcmp.gt.f32.partialorder %v688_v55, 0.0  ;;  %v700_v1 = vmul.f32 0.01, %v688_v55 }
 0x1e2   : > { %v729_v3 = vrot.slane %v704_v63, 4  ;;  %v705_v7 = vsel %vm693_vm7, %v687_v50, %v699_v57  ;;  %vm695_vm9 = vcmp.gt.f32.partialorder %v689_v60, 0.0  ;;  %v701_v4 = vmul.f32 0.01, %v689_v60  ;;  %v9212_v50 = vld [vmem:[#allocation2 + $0x124] ss:$8 sps:$4 sm:$0xff]  }
 0x1e3   : > { %v730_v5 = vrot.slane %v705_v7, 4  ;;  %v706_v6 = vsel %vm694_vm8, %v688_v55, %v700_v1  ;;  %v9210_v63 = vld [vmem:[#allocation2 + $0x120] ss:$8 sps:$4 sm:$0xff]  }
 0x1e4   : > { %v10417_v9 = vsel %vm420_vm0, 0.0, %v729_v3  ;;  %v731_v11 = vrot.slane %v706_v6, 4  ;;  %v10419_v13 = vsel %vm695_vm9, %v689_v60, %v701_v4  ;;  %v9215_v4 = vld [vmem:[#allocation2 + $0x134] ss:$8 sps:$4 sm:$0xff]  }
 0x1e5   : > { %v10428_v15 = vsel %vm420_vm0, 0.0, %v730_v5  ;;  %v733_v16 = vrot.slane %v10419_v13, 4  ;;  %v755_v17 = vrot.slane %v10417_v9, 1  ;;  %v775_v18 = vrot.slane %v10417_v9, 2 }
 0x1e6   : > { %v10434_v19 = vsel %vm420_vm0, %v729_v3, %v731_v11  ;;  %v758_v21 = vrot.slane %v10428_v15, 1  ;;  %v778_v22 = vrot.slane %v10428_v15, 2  ;;  %v798_v23 = vrot.slane %v10428_v15, 3 }
 0x1e7   : > { %v10440_v24 = vsel %vm420_vm0, %v730_v5, %v733_v16  ;;  %v667_v25 = vpop.f32.mrb[4].mxu0  ;;  %v7942_v26 = vpack.c.bf16 %v10434_v19, %v729_v3  ;;  %v756_v28 = vrot.slane %v10434_v19, 1  ;;  %v776_v29 = vrot.slane %v10434_v19, 2 }
 0x1e8   : > { %v690_v30 = vadd.f32 %v679_v45, %v667_v25  ;;  %v669_v31 = vpop.f32.mrb[5].mxu0  ;;  %v7938_v32 = vpack.c.bf16 %v10440_v24, %v730_v5  ;;  %v759_v33 = vrot.slane %v10440_v24, 1  ;;  %v779_v34 = vrot.slane %v10440_v24, 2 }
 0x1e9   : > { %v691_v35 = vadd.f32 %v683_v46, %v669_v31  ;;  %v671_v58 = vpop.f32.mrb[6].mxu0  ;;  %v10455_v36 = vsel %vm432_vm1, %v755_v17, %v756_v28  ;;  %v10460_v37 = vsel %vm449_vm3, %v775_v18, %v776_v29  ;;  %v799_v38 = vrot.slane %v10440_v24, 3 }
 0x1ea   : > { %vm696_vm14 = vcmp.gt.f32.partialorder %v690_v30, 0.0  ;;  %v702_v39 = vmul.f32 0.01, %v690_v30  ;;  %7939 = vmatprep.mubr.msk.bf16.mxu1 %vm10444_vm13, %v7938_v32  ;;  %v760_v40 = vsel %vm432_vm1, %v758_v21, %v759_v33  ;;  %v672_v43 = vpop.f32.mrb[7].mxu0  ;;  %v10469_v45 = vsel %vm449_vm3, %v778_v22, %v779_v34 }
 0x1eb   : > { %vm697_vm15 = vcmp.gt.f32.partialorder %v691_v35, 0.0  ;;  %v703_v46 = vmul.f32 0.01, %v691_v35  ;;  %7943 = vmatmul.mubr.msk.bf16.vlgmr.msra.gmra.mrb[0].mxu1 %vm10444_vm13, %v7942_v26  ;;  %v10476_v47 = vsel %vm466_vm2, %v798_v23, %v799_v38  ;;  %v795_v55 = vrot.slane %v10417_v9, 3 }
 0x1ec   : > { %v708_v48 = vsel %vm696_vm14, %v690_v30, %v702_v39  ;;  %2515 = vmatpush1.bf16.msra.mxu1 %v9204_v20  ;;  %v796_v56 = vrot.slane %v10434_v19, 3  ;;  %v818_v1 = vrot.slane %v10428_v15, 4  ;;  %v819_v3 = vrot.slane %v10440_v24, 4 }
 0x1ed   : > { %v721_v51 = vsel %vm716_vm10, %v708_v48, 0.0  ;;  %v709_v52 = vsel %vm697_vm15, %v691_v35, %v703_v46  ;;  %2516 = vmatprep.subr.bf16.mxu1 %v9209_v27  ;;  %v815_v18 = vrot.slane %v10417_v9, 4  ;;  %v9213_v35 = vld [vmem:[#allocation2 + $0x130] ss:$8 sps:$4 sm:$0xff]   ;;  %v9218_v48 = vld [vmem:[#allocation2 + $0x144] ss:$8 sps:$4 sm:$0xff]  }
 0x1ee   : > { %v735_v57 = vrot.slane %v721_v51, 4  ;;  %v722_v60 = vsel %vm716_vm10, %v709_v52, 0.0  ;;  %v10487_v5 = vsel %vm466_vm2, %v795_v55, %v796_v56  ;;  %v10496_v17 = vsel %vm420_vm0, %v818_v1, %v819_v3 }
 0x1ef   : > { %v737_v7 = vrot.slane %v722_v60, 4  ;;  %v816_v51 = vrot.slane %v10434_v19, 4  ;;  %v879_v14 = vrot.slane %v10440_v24, 7 }
 0x1f0   : > { %v10490_v6 = vsel %vm420_vm0, %v731_v11, %v735_v57  ;;  %v10493_v13 = vsel %vm420_vm0, %v735_v57, 0.0  ;;  %2517 = vmatpush1.bf16.msra.mxu1 %v9207_v49 }
 0x1f1   : > { %v10500_v20 = vsel %vm420_vm0, %v733_v16, %v737_v7  ;;  %v10503_v21 = vsel %vm420_vm0, %v737_v7, 0.0  ;;  %2518 = vmatprep.subr.bf16.mxu1 %v9212_v50  ;;  %v1167_v11 = vpack.c.bf16 %v10490_v6, %v10490_v6  ;;  %v761_v22 = vrot.slane %v10490_v6, 1 }
 0x1f2   : > { %v1168_v23 = vpack.c.bf16 %v10500_v20, %v10500_v20  ;;  %v763_v25 = vrot.slane %v10500_v20, 1  ;;  %v767_v26 = vrot.slane %v10503_v21, 1  ;;  %v765_v27 = vrot.slane %v10493_v13, 1 }
 0x1f3   : > { %v10514_v16 = vsel %vm432_vm1, %v756_v28, %v761_v22  ;;  %v783_v30 = vrot.slane %v10500_v20, 2  ;;  %v781_v31 = vrot.slane %v10490_v6, 2  ;;  %v787_v32 = vrot.slane %v10503_v21, 2 }
 0x1f4   : > { %2519 = vmatpush1.bf16.msra.mxu1 %v9210_v63  ;;  %2505 = vmatprep.mubr.bf16.mxu1 %v1168_v23  ;;  %v764_v58 = vsel %vm432_vm1, %v759_v33, %v763_v25  ;;  %v10523_v43 = vsel %vm432_vm1, %v763_v25, %v767_v26  ;;  %v785_v28 = vrot.slane %v10493_v13, 2  ;;  %v10527_v49 = vsel %vm432_vm1, %v761_v22, %v765_v27  ;;  %v9216_v33 = vld [vmem:[#allocation2 + $0x140] ss:$8 sps:$4 sm:$0xff]  }
 0x1f5   : > { %2506 = vmatmul.mubr.bf16.gmra.mrb[4].mxu1 %v1167_v11  ;;  %2520 = vmatprep.subr.bf16.mxu1 %v9215_v4  ;;  %v1154_v46 = vpack.c.bf16 %v764_v58, %v760_v40  ;;  %v803_v50 = vrot.slane %v10500_v20, 3  ;;  %v10534_v52 = vsel %vm449_vm3, %v779_v34, %v783_v30  ;;  %v10539_v55 = vsel %vm449_vm3, %v776_v29, %v781_v31  ;;  %v9221_v34 = vld [vmem:[#allocation2 + $0x154] ss:$8 sps:$4 sm:$0xff]   ;;  %v9230_v11 = vld [vmem:[#allocation2 + $0x184] ss:$8 sps:$4 sm:$0xff]  }
 0x1f6   : > { %v10542_v40 = vsel %vm449_vm3, %v783_v30, %v787_v32  ;;  %v10549_v63 = vsel %vm449_vm3, %v781_v31, %v785_v28  ;;  %v801_v1 = vrot.slane %v10490_v6, 3  ;;  %v807_v7 = vrot.slane %v10503_v21, 3 }
 0x1f7   : > { %2546 = vmatprep.mubr.bf16.mxu1 %v1154_v46  ;;  %v10554_v29 = vsel %vm466_vm2, %v799_v38, %v803_v50  ;;  %v839_v4 = vrot.slane %v10440_v24, 5  ;;  %v805_v22 = vrot.slane %v10493_v13, 3  ;;  %v823_v23 = vrot.slane %v10500_v20, 4 }
 0x1f8   : > { %2521 = vmatpush1.bf16.msra.mxu1 %v9213_v35  ;;  %v10564_v25 = vsel %vm420_vm0, %v815_v18, %v816_v51  ;;  %v10567_v38 = vsel %vm466_vm2, %v796_v56, %v801_v1  ;;  %v10570_v26 = vsel %vm466_vm2, %v803_v50, %v807_v7  ;;  %v821_v27 = vrot.slane %v10490_v6, 4  ;;  %v9219_v56 = vld [vmem:[#allocation2 + $0x150] ss:$8 sps:$4 sm:$0xff]   ;;  %v9227_v50 = vld [vmem:[#allocation2 + $0x174] ss:$8 sps:$4 sm:$0xff]  }
 0x1f9   : > { %2522 = vmatprep.subr.bf16.mxu1 %v9218_v48  ;;  %v827_v30 = vrot.slane %v10503_v21, 4  ;;  %v10577_v32 = vsel %vm466_vm2, %v801_v1, %v805_v22  ;;  %v10580_v35 = vsel %vm420_vm0, %v819_v3, %v823_v23  ;;  %v838_v18 = vrot.slane %v10428_v15, 5  ;;  %v9224_v48 = vld [vmem:[#allocation2 + $0x164] ss:$8 sps:$4 sm:$0xff]  }
 0x1fa   : > { %v10586_v28 = vsel %vm420_vm0, %v816_v51, %v821_v27  ;;  %v825_v3 = vrot.slane %v10493_v13, 4  ;;  %v835_v7 = vrot.slane %v10417_v9, 5  ;;  %v836_v51 = vrot.slane %v10434_v19, 5 }
 0x1fb   : > { %v10589_v46 = vsel %vm420_vm0, %v823_v23, %v827_v30  ;;  %v10595_v1 = vsel %vm499_vm4, %v838_v18, %v839_v4  ;;  %v841_v22 = vrot.slane %v10490_v6, 5  ;;  %v845_v30 = vrot.slane %v10493_v13, 5 }
 0x1fc   : > { %2523 = vmatpush1.bf16.msra.mxu1 %v9216_v33  ;;  %v843_v33 = vrot.slane %v10500_v20, 5  ;;  %v10602_v23 = vsel %vm420_vm0, %v821_v27, %v825_v3  ;;  %v10610_v44 = vsel %vm499_vm4, %v835_v7, %v836_v51  ;;  %v858_v7 = vrot.slane %v10428_v15, 6 }
 0x1fd   : > { %2524 = vmatprep.subr.bf16.mxu1 %v9221_v34  ;;  %v847_v34 = vrot.slane %v10503_v21, 5  ;;  %v10613_v42 = vsel %vm499_vm4, %v836_v51, %v841_v22  ;;  %v859_v58 = vrot.slane %v10440_v24, 6  ;;  %v863_v51 = vrot.slane %v10500_v20, 6 }
 0x1fe   : > { %v10607_v18 = vsel %vm499_vm4, %v839_v4, %v843_v33  ;;  %v10623_v4 = vsel %vm499_vm4, %v841_v22, %v845_v30  ;;  %v856_v31 = vrot.slane %v10434_v19, 6  ;;  %v861_v27 = vrot.slane %v10490_v6, 6 }
 0x1ff   : > { %v867_v3 = vrot.slane %v10503_v21, 6  ;;  %v10636_v22 = vsel %vm516_vm5, %v859_v58, %v863_v51  ;;  %v865_v30 = vrot.slane %v10493_v13, 6  ;;  %v883_v60 = vrot.slane %v10500_v20, 7 }
 0x200   : > { %2525 = vmatpush1.bf16.msra.mxu1 %v9219_v56  ;;  %v10620_v56 = vsel %vm499_vm4, %v843_v33, %v847_v34  ;;  %v9225_v33 = vld [vmem:[#allocation2 + $0x170] ss:$8 sps:$4 sm:$0xff]   ;;  %v10633_v34 = vsel %vm516_vm5, %v858_v7, %v859_v58  ;;  %v10645_v39 = vsel %vm516_vm5, %v856_v31, %v861_v27 }
 0x201   : > { %2526 = vmatprep.subr.bf16.mxu1 %v9224_v48  ;;  %v855_v48 = vrot.slane %v10417_v9, 6  ;;  %v10653_v7 = vsel %vm516_vm5, %v861_v27, %v865_v30  ;;  %v887_v27 = vrot.slane %v10503_v21, 7  ;;  %v9233_v30 = vld [vmem:[#allocation2 + $0x194] ss:$8 sps:$4 sm:$0xff]   ;;  %v9243_v21 = vld [vmem:[#allocation2 + $0x1d0] ss:$8 sps:$4 sm:$0xff]  }
 0x203   : > { %v10642_v57 = vsel %vm516_vm5, %v855_v48, %v856_v31  ;;  %v875_v48 = vrot.slane %v10417_v9, 7  ;;  %v876_v31 = vrot.slane %v10434_v19, 7  ;;  %v885_v9 = vrot.slane %v10493_v13, 7  ;;  %v9234_v13 = vld [vmem:[#allocation2 + $0x1a0] ss:$8 sps:$4 sm:$0xff]  }
 0x204   : > { %2527 = vmatpush1.bf16.msra.mxu1 %v9222_v53  ;;  %v10648_v53 = vsel %vm516_vm5, %v863_v51, %v867_v3  ;;  %v1163_v58 = vpack.c.bf16 %v10645_v39, %v10642_v57  ;;  %v881_v51 = vrot.slane %v10490_v6, 7  ;;  %v10678_v6 = vsel %vm533_vm6, %v883_v60, %v887_v27  ;;  %v9245_v27 = vld [vmem:[#allocation2 + $0x1d4] ss:$8 sps:$4 sm:$0xff]   ;;  %v9501_v39 = vld [vmem:[#allocation2 + $0x730] ss:$8 sps:$4 sm:$0xff]  }
 0x205   : > { %2528 = vmatprep.subr.bf16.mxu1 %v9227_v50  ;;  %v878_v50 = vrot.slane %v10428_v15, 7  ;;  %v10666_v15 = vsel %vm533_vm6, %v879_v14, %v883_v60  ;;  %v10669_v24 = vsel %vm533_vm6, %v875_v48, %v876_v31  ;;  %v9237_v48 = vld [vmem:[#allocation2 + $0x1b0] ss:$8 sps:$4 sm:$0xff]   ;;  %v9240_v60 = vld [vmem:[#allocation2 + $0x1c0] ss:$8 sps:$4 sm:$0xff]  }
 0x206   : > { %v10675_v20 = vsel %vm533_vm6, %v876_v31, %v881_v51  ;;  %v9242_v31 = vld [vmem:[#allocation2 + $0x1c4] ss:$8 sps:$4 sm:$0xff]  }
 0x207   : > { %v10661_v3 = vsel %vm533_vm6, %v878_v50, %v879_v14  ;;  %v10683_v14 = vsel %vm533_vm6, %v881_v51, %v885_v9  ;;  %v9239_v50 = vld [vmem:[#allocation2 + $0x1b4] ss:$8 sps:$4 sm:$0xff]   ;;  %v9248_v51 = vld [vmem:[#allocation2 + $0x1e4] ss:$8 sps:$4 sm:$0xff]   ;;  %v9249_v9 = vld [vmem:[#allocation2 + $0x1f0] ss:$8 sps:$4 sm:$0xff]  }
 0x208   : > { %2529 = vmatpush1.bf16.msra.mxu1 %v9225_v33  ;;  %v1166_v19 = vpack.c.bf16 %v10666_v15, %v10661_v3  ;;  %v9236_v33 = vld [vmem:[#allocation2 + $0x1a4] ss:$8 sps:$4 sm:$0xff]  }
 0x209   : > { %2530 = vmatprep.subr.bf16.mxu1 %v9230_v11  ;;  %v9231_v11 = vld [vmem:[#allocation2 + $0x190] ss:$8 sps:$4 sm:$0xff]   ;;  %v9506_v57 = vld [vmem:[#allocation2 + $0x744] ss:$8 sps:$4 sm:$0xff]  }
 0x20a   : > { %v9518_v3 = vld [vmem:[#allocation2 + $0x784] ss:$8 sps:$4 sm:$0xff]  }
 0x20c   : > { %2531 = vmatpush1.bf16.msra.mxu1 %v9228_v12  ;;  %v9246_v12 = vld [vmem:[#allocation2 + $0x1e0] ss:$8 sps:$4 sm:$0xff]  }
 0x20d   : > { %2532 = vmatprep.subr.bf16.mxu1 %v9233_v30  ;;  %v9251_v30 = vld [vmem:[#allocation2 + $0x1f4] ss:$8 sps:$4 sm:$0xff]  }
 0x210   : > { %2533 = vmatpush1.bf16.msra.mxu1 %v9231_v11  ;;  %v9254_v11 = vld [vmem:[#allocation2 + $0x204] ss:$8 sps:$4 sm:$0xff]  }
 0x211   : > { %2534 = vmatprep.subr.bf16.mxu1 %v9236_v33  ;;  %v9252_v33 = vld [vmem:[#allocation2 + $0x200] ss:$8 sps:$4 sm:$0xff]  }
 0x214   : > { %2535 = vmatpush1.bf16.msra.mxu1 %v9234_v13  ;;  %v9257_v13 = vld [vmem:[#allocation2 + $0x214] ss:$8 sps:$4 sm:$0xff]  }
 0x215   : > { %2536 = vmatprep.subr.bf16.mxu1 %v9239_v50  ;;  %v1170_v50 = vpack.c.bf16 %v10523_v43, %v10523_v43  ;;  %v11998_v43 = vpack.c.bf16 %v10534_v52, %v10469_v45  ;;  %v9278_v45 = vld [vmem:[#allocation2 + $0x284] ss:$8 sps:$4 sm:$0xff]   ;;  %v9276_v52 = vld [vmem:[#allocation2 + $0x280] ss:$8 sps:$4 sm:$0xff]  }
 0x218   : > { %2537 = vmatpush1.bf16.msra.mxu1 %v9237_v48  ;;  %v11997_v48 = vpack.c.bf16 %v10514_v16, %v10455_v36  ;;  %v9261_v36 = vld [vmem:[#allocation2 + $0x230] ss:$8 sps:$4 sm:$0xff]   ;;  %v9266_v16 = vld [vmem:[#allocation2 + $0x244] ss:$8 sps:$4 sm:$0xff]  }
 0x219   : > { %2538 = vmatprep.subr.bf16.mxu1 %v9242_v31  ;;  %v9260_v31 = vld [vmem:[#allocation2 + $0x224] ss:$8 sps:$4 sm:$0xff]  }
 0x21c   : > { %2539 = vmatpush1.bf16.msra.mxu1 %v9240_v60  ;;  %v9258_v60 = vld [vmem:[#allocation2 + $0x220] ss:$8 sps:$4 sm:$0xff]  }
 0x21d   : > { %2540 = vmatprep.subr.bf16.mxu1 %v9245_v27  ;;  %v1169_v27 = vpack.c.bf16 %v10527_v49, %v10527_v49  ;;  %v9270_v49 = vld [vmem:[#allocation2 + $0x260] ss:$8 sps:$4 sm:$0xff]  }
 0x220   : > { %2541 = vmatpush1.bf16.msra.mxu1 %v9243_v21  ;;  %v9255_v21 = vld [vmem:[#allocation2 + $0x210] ss:$8 sps:$4 sm:$0xff]  }
 0x221   : > { %2542 = vmatprep.subr.bf16.mxu1 %v9248_v51  ;;  %v9263_v51 = vld [vmem:[#allocation2 + $0x234] ss:$8 sps:$4 sm:$0xff]  }
 0x224   : > { %2543 = vmatpush1.bf16.msra.mxu1 %v9246_v12  ;;  %v9264_v12 = vld [vmem:[#allocation2 + $0x240] ss:$8 sps:$4 sm:$0xff]  }
 0x225   : > { %2544 = vmatprep.subr.bf16.mxu1 %v9251_v30  ;;  %v9269_v30 = vld [vmem:[#allocation2 + $0x254] ss:$8 sps:$4 sm:$0xff]  }
 0x228   : > { %2545 = vmatpush1.bf16.msra.mxu1 %v9249_v9  ;;  %v9267_v9 = vld [vmem:[#allocation2 + $0x250] ss:$8 sps:$4 sm:$0xff]  }
 0x229   : > { %2565 = vmatprep.subr.bf16.mxu1 %v9254_v11  ;;  %v9272_v11 = vld [vmem:[#allocation2 + $0x264] ss:$8 sps:$4 sm:$0xff]  }
 0x22b   : > { %2547 = vmatmul.mubr.bf16.vlgmr.msra.gmra.mrb[0].mxu1 %v11997_v48  ;;  %v9279_v48 = vld [vmem:[#allocation2 + $0x290] ss:$8 sps:$4 sm:$0xff]  }
 0x22c   : > { %2556 = vmatprep.mubr.bf16.mxu1 %v1170_v50  ;;  %2566 = vmatpush1.bf16.msra.mxu1 %v9252_v33  ;;  %v9275_v33 = vld [vmem:[#allocation2 + $0x274] ss:$8 sps:$4 sm:$0xff]  }
 0x22d   : > { %2567 = vmatprep.subr.bf16.mxu1 %v9257_v13  ;;  %v9273_v13 = vld [vmem:[#allocation2 + $0x270] ss:$8 sps:$4 sm:$0xff]   ;;  %v9281_v50 = vld [vmem:[#allocation2 + $0x294] ss:$8 sps:$4 sm:$0xff]  }
 0x230   : > { %2568 = vmatpush1.bf16.msra.mxu1 %v9255_v21  ;;  %v9284_v21 = vld [vmem:[#allocation2 + $0x2a4] ss:$8 sps:$4 sm:$0xff]  }
 0x231   : > { %2569 = vmatprep.subr.bf16.mxu1 %v9260_v31  ;;  %v9282_v31 = vld [vmem:[#allocation2 + $0x2a0] ss:$8 sps:$4 sm:$0xff]  }
 0x233   : > { %2557 = vmatmul.mubr.bf16.gmra.mrb[8].mxu1 %v1169_v27  ;;  %v9285_v27 = vld [vmem:[#allocation2 + $0x2b0] ss:$8 sps:$4 sm:$0xff]  }
 0x234   : > { %2570 = vmatpush1.bf16.msra.mxu1 %v9258_v60  ;;  %2597 = vmatprep.mubr.bf16.mxu1 %v11998_v43  ;;  %v9287_v60 = vld [vmem:[#allocation2 + $0x2b4] ss:$8 sps:$4 sm:$0xff]   ;;  %v9288_v43 = vld [vmem:[#allocation2 + $0x2c0] ss:$8 sps:$4 sm:$0xff]  }
 0x235   : > { %2571 = vmatprep.subr.bf16.mxu1 %v9263_v51  ;;  %v9290_v51 = vld [vmem:[#allocation2 + $0x2c4] ss:$8 sps:$4 sm:$0xff]  }
 0x238   : > { %2572 = vmatpush1.bf16.msra.mxu1 %v9261_v36  ;;  %v9293_v36 = vld [vmem:[#allocation2 + $0x2d4] ss:$8 sps:$4 sm:$0xff]  }
 0x239   : > { %2573 = vmatprep.subr.bf16.mxu1 %v9266_v16  ;;  %v9291_v16 = vld [vmem:[#allocation2 + $0x2d0] ss:$8 sps:$4 sm:$0xff]  }
 0x23c   : > { %2574 = vmatpush1.bf16.msra.mxu1 %v9264_v12  ;;  %v9296_v12 = vld [vmem:[#allocation2 + $0x2e4] ss:$8 sps:$4 sm:$0xff]  }
 0x23d   : > { %2575 = vmatprep.subr.bf16.mxu1 %v9269_v30  ;;  %v9294_v30 = vld [vmem:[#allocation2 + $0x2e0] ss:$8 sps:$4 sm:$0xff]  }
 0x240   : > { %2576 = vmatpush1.bf16.msra.mxu1 %v9267_v9  ;;  %v9299_v9 = vld [vmem:[#allocation2 + $0x2f4] ss:$8 sps:$4 sm:$0xff]  }
 0x241   : > { %2577 = vmatprep.subr.bf16.mxu1 %v9272_v11  ;;  %v9297_v11 = vld [vmem:[#allocation2 + $0x2f0] ss:$8 sps:$4 sm:$0xff]  }
 0x244   : > { %2578 = vmatpush1.bf16.msra.mxu1 %v9270_v49  ;;  %v9302_v49 = vld [vmem:[#allocation2 + $0x304] ss:$8 sps:$4 sm:$0xff]  }
 0x245   : > { %2579 = vmatprep.subr.bf16.mxu1 %v9275_v33  ;;  %v9300_v33 = vld [vmem:[#allocation2 + $0x300] ss:$8 sps:$4 sm:$0xff]  }
 0x248   : > { %2580 = vmatpush1.bf16.msra.mxu1 %v9273_v13  ;;  %v9305_v13 = vld [vmem:[#allocation2 + $0x314] ss:$8 sps:$4 sm:$0xff]  }
 0x249   : > { %2581 = vmatprep.subr.bf16.mxu1 %v9278_v45  ;;  %v1172_v45 = vpack.c.bf16 %v10542_v40, %v10542_v40  ;;  %v12000_v40 = vpack.c.bf16 %v10554_v29, %v10476_v47  ;;  %v9326_v47 = vld [vmem:[#allocation2 + $0x384] ss:$8 sps:$4 sm:$0xff]   ;;  %v9324_v29 = vld [vmem:[#allocation2 + $0x380] ss:$8 sps:$4 sm:$0xff]  }
 0x24c   : > { %2582 = vmatpush1.bf16.msra.mxu1 %v9276_v52  ;;  %v11999_v52 = vpack.c.bf16 %v10539_v55, %v10460_v37  ;;  %v9309_v37 = vld [vmem:[#allocation2 + $0x330] ss:$8 sps:$4 sm:$0xff]   ;;  %v9314_v55 = vld [vmem:[#allocation2 + $0x344] ss:$8 sps:$4 sm:$0xff]  }
 0x24d   : > { %2583 = vmatprep.subr.bf16.mxu1 %v9281_v50  ;;  %v9303_v50 = vld [vmem:[#allocation2 + $0x310] ss:$8 sps:$4 sm:$0xff]  }
 0x250   : > { %2584 = vmatpush1.bf16.msra.mxu1 %v9279_v48  ;;  %v9308_v48 = vld [vmem:[#allocation2 + $0x324] ss:$8 sps:$4 sm:$0xff]  }
 0x251   : > { %2585 = vmatprep.subr.bf16.mxu1 %v9284_v21  ;;  %v9306_v21 = vld [vmem:[#allocation2 + $0x320] ss:$8 sps:$4 sm:$0xff]  }
 0x254   : > { %2586 = vmatpush1.bf16.msra.mxu1 %v9282_v31  ;;  %v1171_v31 = vpack.c.bf16 %v10549_v63, %v10549_v63  ;;  %v9318_v63 = vld [vmem:[#allocation2 + $0x360] ss:$8 sps:$4 sm:$0xff]  }
 0x255   : > { %2587 = vmatprep.subr.bf16.mxu1 %v9287_v60  ;;  %v9311_v60 = vld [vmem:[#allocation2 + $0x334] ss:$8 sps:$4 sm:$0xff]  }
 0x258   : > { %2588 = vmatpush1.bf16.msra.mxu1 %v9285_v27  ;;  %v9312_v27 = vld [vmem:[#allocation2 + $0x340] ss:$8 sps:$4 sm:$0xff]  }
 0x259   : > { %2589 = vmatprep.subr.bf16.mxu1 %v9290_v51  ;;  %v9317_v51 = vld [vmem:[#allocation2 + $0x354] ss:$8 sps:$4 sm:$0xff]  }
 0x25c   : > { %2590 = vmatpush1.bf16.msra.mxu1 %v9288_v43  ;;  %v9315_v43 = vld [vmem:[#allocation2 + $0x350] ss:$8 sps:$4 sm:$0xff]  }
 0x25d   : > { %2591 = vmatprep.subr.bf16.mxu1 %v9293_v36  ;;  %v9320_v36 = vld [vmem:[#allocation2 + $0x364] ss:$8 sps:$4 sm:$0xff]  }
 0x260   : > { %2592 = vmatpush1.bf16.msra.mxu1 %v9291_v16  ;;  %v9323_v16 = vld [vmem:[#allocation2 + $0x374] ss:$8 sps:$4 sm:$0xff]  }
 0x261   : > { %2593 = vmatprep.subr.bf16.mxu1 %v9296_v12  ;;  %v9321_v12 = vld [vmem:[#allocation2 + $0x370] ss:$8 sps:$4 sm:$0xff]  }
 0x264   : > { %2594 = vmatpush1.bf16.msra.mxu1 %v9294_v30  ;;  %v9329_v30 = vld [vmem:[#allocation2 + $0x394] ss:$8 sps:$4 sm:$0xff]  }
 0x265   : > { %2595 = vmatprep.subr.bf16.mxu1 %v9299_v9  ;;  %v9327_v9 = vld [vmem:[#allocation2 + $0x390] ss:$8 sps:$4 sm:$0xff]  }
 0x268   : > { %2596 = vmatpush1.bf16.msra.mxu1 %v9297_v11  ;;  %v9332_v11 = vld [vmem:[#allocation2 + $0x3a4] ss:$8 sps:$4 sm:$0xff]  }
 0x269   : > { %2616 = vmatprep.subr.bf16.mxu1 %v9302_v49  ;;  %v9330_v49 = vld [vmem:[#allocation2 + $0x3a0] ss:$8 sps:$4 sm:$0xff]  }
 0x26b   : > { %2598 = vmatmul.mubr.bf16.vlgmr.msra.gmra.mrb[0].mxu1 %v11999_v52  ;;  %v9336_v52 = vld [vmem:[#allocation2 + $0x3c0] ss:$8 sps:$4 sm:$0xff]  }
 0x26c   : > { %2607 = vmatprep.mubr.bf16.mxu1 %v1172_v45  ;;  %2617 = vmatpush1.bf16.msra.mxu1 %v9300_v33  ;;  %v9335_v33 = vld [vmem:[#allocation2 + $0x3b4] ss:$8 sps:$4 sm:$0xff]   ;;  %v9338_v45 = vld [vmem:[#allocation2 + $0x3c4] ss:$8 sps:$4 sm:$0xff]  }
 0x26d   : > { %2618 = vmatprep.subr.bf16.mxu1 %v9305_v13  ;;  %v9333_v13 = vld [vmem:[#allocation2 + $0x3b0] ss:$8 sps:$4 sm:$0xff]  }
 0x270   : > { %2619 = vmatpush1.bf16.msra.mxu1 %v9303_v50  ;;  %v9341_v50 = vld [vmem:[#allocation2 + $0x3d4] ss:$8 sps:$4 sm:$0xff]  }
 0x271   : > { %2620 = vmatprep.subr.bf16.mxu1 %v9308_v48  ;;  %v9339_v48 = vld [vmem:[#allocation2 + $0x3d0] ss:$8 sps:$4 sm:$0xff]  }
 0x273   : > { %2608 = vmatmul.mubr.bf16.gmra.mrb[12].mxu1 %v1171_v31  ;;  %v9342_v31 = vld [vmem:[#allocation2 + $0x3e0] ss:$8 sps:$4 sm:$0xff]  }
 0x274   : > { %2621 = vmatpush1.bf16.msra.mxu1 %v9306_v21  ;;  %2648 = vmatprep.mubr.bf16.mxu1 %v12000_v40  ;;  %v9344_v21 = vld [vmem:[#allocation2 + $0x3e4] ss:$8 sps:$4 sm:$0xff]   ;;  %v9345_v40 = vld [vmem:[#allocation2 + $0x3f0] ss:$8 sps:$4 sm:$0xff]  }
 0x275   : > { %2622 = vmatprep.subr.bf16.mxu1 %v9311_v60  ;;  %v9347_v60 = vld [vmem:[#allocation2 + $0x3f4] ss:$8 sps:$4 sm:$0xff]  }
 0x278   : > { %2623 = vmatpush1.bf16.msra.mxu1 %v9309_v37  ;;  %v9350_v37 = vld [vmem:[#allocation2 + $0x404] ss:$8 sps:$4 sm:$0xff]  }
 0x279   : > { %2624 = vmatprep.subr.bf16.mxu1 %v9314_v55  ;;  %v9348_v55 = vld [vmem:[#allocation2 + $0x400] ss:$8 sps:$4 sm:$0xff]  }
 0x27c   : > { %2625 = vmatpush1.bf16.msra.mxu1 %v9312_v27  ;;  %v9353_v27 = vld [vmem:[#allocation2 + $0x414] ss:$8 sps:$4 sm:$0xff]  }
 0x27d   : > { %2626 = vmatprep.subr.bf16.mxu1 %v9317_v51  ;;  %v1174_v51 = vpack.c.bf16 %v10570_v26, %v10570_v26  ;;  %v12002_v26 = vpack.c.bf16 %v10580_v35, %v10496_v17  ;;  %v9374_v17 = vld [vmem:[#allocation2 + $0x484] ss:$8 sps:$4 sm:$0xff]  }
 0x280   : > { %2627 = vmatpush1.bf16.msra.mxu1 %v9315_v43  ;;  %v12001_v43 = vpack.c.bf16 %v10567_v38, %v10487_v5  ;;  %v9357_v5 = vld [vmem:[#allocation2 + $0x430] ss:$8 sps:$4 sm:$0xff]   ;;  %v9362_v38 = vld [vmem:[#allocation2 + $0x444] ss:$8 sps:$4 sm:$0xff]  }
 0x281   : > { %2628 = vmatprep.subr.bf16.mxu1 %v9320_v36  ;;  %v9351_v36 = vld [vmem:[#allocation2 + $0x410] ss:$8 sps:$4 sm:$0xff]  }
 0x284   : > { %2629 = vmatpush1.bf16.msra.mxu1 %v9318_v63  ;;  %v9356_v63 = vld [vmem:[#allocation2 + $0x424] ss:$8 sps:$4 sm:$0xff]  }
 0x285   : > { %2630 = vmatprep.subr.bf16.mxu1 %v9323_v16  ;;  %v9354_v16 = vld [vmem:[#allocation2 + $0x420] ss:$8 sps:$4 sm:$0xff]  }
 0x288   : > { %2631 = vmatpush1.bf16.msra.mxu1 %v9321_v12  ;;  %v1173_v12 = vpack.c.bf16 %v10577_v32, %v10577_v32  ;;  %v9366_v32 = vld [vmem:[#allocation2 + $0x460] ss:$8 sps:$4 sm:$0xff]  }
 0x289   : > { %2632 = vmatprep.subr.bf16.mxu1 %v9326_v47  ;;  %v9359_v47 = vld [vmem:[#allocation2 + $0x434] ss:$8 sps:$4 sm:$0xff]  }
 0x28c   : > { %2633 = vmatpush1.bf16.msra.mxu1 %v9324_v29  ;;  %v9360_v29 = vld [vmem:[#allocation2 + $0x440] ss:$8 sps:$4 sm:$0xff]  }
 0x28d   : > { %2634 = vmatprep.subr.bf16.mxu1 %v9329_v30  ;;  %v9365_v30 = vld [vmem:[#allocation2 + $0x454] ss:$8 sps:$4 sm:$0xff]  }
 0x290   : > { %2635 = vmatpush1.bf16.msra.mxu1 %v9327_v9  ;;  %v9363_v9 = vld [vmem:[#allocation2 + $0x450] ss:$8 sps:$4 sm:$0xff]  }
 0x291   : > { %2636 = vmatprep.subr.bf16.mxu1 %v9332_v11  ;;  %v9368_v11 = vld [vmem:[#allocation2 + $0x464] ss:$8 sps:$4 sm:$0xff]  }
 0x294   : > { %2637 = vmatpush1.bf16.msra.mxu1 %v9330_v49  ;;  %v9371_v49 = vld [vmem:[#allocation2 + $0x474] ss:$8 sps:$4 sm:$0xff]  }
 0x295   : > { %2638 = vmatprep.subr.bf16.mxu1 %v9335_v33  ;;  %v9369_v33 = vld [vmem:[#allocation2 + $0x470] ss:$8 sps:$4 sm:$0xff]  }
 0x298   : > { %2639 = vmatpush1.bf16.msra.mxu1 %v9333_v13  ;;  %v9372_v13 = vld [vmem:[#allocation2 + $0x480] ss:$8 sps:$4 sm:$0xff]  }
 0x299   : > { %2640 = vmatprep.subr.bf16.mxu1 %v9338_v45 }
 0x29c   : > { %2641 = vmatpush1.bf16.msra.mxu1 %v9336_v52  ;;  %v9377_v52 = vld [vmem:[#allocation2 + $0x494] ss:$8 sps:$4 sm:$0xff]  }
 0x29d   : > { %2642 = vmatprep.subr.bf16.mxu1 %v9341_v50 }
 0x2a0   : > { %2643 = vmatpush1.bf16.msra.mxu1 %v9339_v48 }
 0x2a1   : > { %2644 = vmatprep.subr.bf16.mxu1 %v9344_v21  ;;  %v9375_v21 = vld [vmem:[#allocation2 + $0x490] ss:$8 sps:$4 sm:$0xff]  }
 0x2a4   : > { %2645 = vmatpush1.bf16.msra.mxu1 %v9342_v31  ;;  %v9380_v31 = vld [vmem:[#allocation2 + $0x4a4] ss:$8 sps:$4 sm:$0xff]  }
 0x2a5   : > { %2646 = vmatprep.subr.bf16.mxu1 %v9347_v60  ;;  %v9378_v60 = vld [vmem:[#allocation2 + $0x4a0] ss:$8 sps:$4 sm:$0xff]  }
 0x2a8   : > { %2647 = vmatpush1.bf16.msra.mxu1 %v9345_v40  ;;  %v9383_v40 = vld [vmem:[#allocation2 + $0x4b4] ss:$8 sps:$4 sm:$0xff]  }
 0x2a9   : > { %2667 = vmatprep.subr.bf16.mxu1 %v9350_v37  ;;  %v9381_v37 = vld [vmem:[#allocation2 + $0x4b0] ss:$8 sps:$4 sm:$0xff]  }
 0x2ab   : > { %2649 = vmatmul.mubr.bf16.vlgmr.msra.gmra.mrb[0].mxu1 %v12001_v43  ;;  %v9387_v43 = vld [vmem:[#allocation2 + $0x4d0] ss:$8 sps:$4 sm:$0xff]  }
 0x2ac   : > { %2658 = vmatprep.mubr.bf16.mxu1 %v1174_v51  ;;  %2668 = vmatpush1.bf16.msra.mxu1 %v9348_v55  ;;  %v9386_v55 = vld [vmem:[#allocation2 + $0x4c4] ss:$8 sps:$4 sm:$0xff]   ;;  %v9389_v51 = vld [vmem:[#allocation2 + $0x4d4] ss:$8 sps:$4 sm:$0xff]  }
 0x2ad   : > { %2669 = vmatprep.subr.bf16.mxu1 %v9353_v27  ;;  %v9384_v27 = vld [vmem:[#allocation2 + $0x4c0] ss:$8 sps:$4 sm:$0xff]  }
 0x2b0   : > { %2670 = vmatpush1.bf16.msra.mxu1 %v9351_v36  ;;  %v9392_v36 = vld [vmem:[#allocation2 + $0x4e4] ss:$8 sps:$4 sm:$0xff]  }
 0x2b1   : > { %2671 = vmatprep.subr.bf16.mxu1 %v9356_v63  ;;  %v9390_v63 = vld [vmem:[#allocation2 + $0x4e0] ss:$8 sps:$4 sm:$0xff]  }
 0x2b3   : > { %2659 = vmatmul.mubr.bf16.gmra.mrb[16].mxu1 %v1173_v12  ;;  %v9393_v12 = vld [vmem:[#allocation2 + $0x4f0] ss:$8 sps:$4 sm:$0xff]  }
 0x2b4   : > { %2672 = vmatpush1.bf16.msra.mxu1 %v9354_v16  ;;  %2699 = vmatprep.mubr.bf16.mxu1 %v12002_v26  ;;  %v9395_v16 = vld [vmem:[#allocation2 + $0x4f4] ss:$8 sps:$4 sm:$0xff]   ;;  %v9396_v26 = vld [vmem:[#allocation2 + $0x500] ss:$8 sps:$4 sm:$0xff]  }
 0x2b5   : > { %2673 = vmatprep.subr.bf16.mxu1 %v9359_v47  ;;  %v9398_v47 = vld [vmem:[#allocation2 + $0x504] ss:$8 sps:$4 sm:$0xff]  }
 0x2b8   : > { %2674 = vmatpush1.bf16.msra.mxu1 %v9357_v5  ;;  %v9401_v5 = vld [vmem:[#allocation2 + $0x514] ss:$8 sps:$4 sm:$0xff]  }
 0x2b9   : > { %2675 = vmatprep.subr.bf16.mxu1 %v9362_v38  ;;  %v1176_v38 = vpack.c.bf16 %v10589_v46, %v10589_v46  ;;  %v12004_v46 = vpack.c.bf16 %v10607_v18, %v10595_v1  ;;  %v9422_v1 = vld [vmem:[#allocation2 + $0x584] ss:$8 sps:$4 sm:$0xff]  }
 0x2bc   : > { %2676 = vmatpush1.bf16.msra.mxu1 %v9360_v29  ;;  %v12003_v29 = vpack.c.bf16 %v10586_v28, %v10564_v25  ;;  %v9405_v25 = vld [vmem:[#allocation2 + $0x530] ss:$8 sps:$4 sm:$0xff]   ;;  %v9410_v28 = vld [vmem:[#allocation2 + $0x544] ss:$8 sps:$4 sm:$0xff]  }
 0x2bd   : > { %2677 = vmatprep.subr.bf16.mxu1 %v9365_v30  ;;  %v9399_v30 = vld [vmem:[#allocation2 + $0x510] ss:$8 sps:$4 sm:$0xff]  }
 0x2c0   : > { %2678 = vmatpush1.bf16.msra.mxu1 %v9363_v9  ;;  %v9404_v9 = vld [vmem:[#allocation2 + $0x524] ss:$8 sps:$4 sm:$0xff]  }
 0x2c1   : > { %2679 = vmatprep.subr.bf16.mxu1 %v9368_v11  ;;  %v9402_v11 = vld [vmem:[#allocation2 + $0x520] ss:$8 sps:$4 sm:$0xff]  }
 0x2c4   : > { %2680 = vmatpush1.bf16.msra.mxu1 %v9366_v32  ;;  %v1175_v32 = vpack.c.bf16 %v10602_v23, %v10602_v23  ;;  %v9414_v23 = vld [vmem:[#allocation2 + $0x560] ss:$8 sps:$4 sm:$0xff]  }
 0x2c5   : > { %2681 = vmatprep.subr.bf16.mxu1 %v9371_v49  ;;  %v9407_v49 = vld [vmem:[#allocation2 + $0x534] ss:$8 sps:$4 sm:$0xff]  }
 0x2c8   : > { %2682 = vmatpush1.bf16.msra.mxu1 %v9369_v33  ;;  %v10715_v35 = vpop.f32.mrb[4].mxu1  ;;  %v9408_v33 = vld [vmem:[#allocation2 + $0x540] ss:$8 sps:$4 sm:$0xff]  }
 0x2c9   : > { %v10717_v45 = vpop.f32.mrb[5].mxu1  ;;  %2683 = vmatprep.subr.bf16.mxu1 %v9374_v17  ;;  %v9413_v17 = vld [vmem:[#allocation2 + $0x554] ss:$8 sps:$4 sm:$0xff]  }
 0x2ca   : > { %v2511_v50 = vpop.f32.mrb[6].mxu1 }
 0x2cb   : > { %v2512_v48 = vpop.f32.mrb[7].mxu1  ;;  %v9419_v50 = vld [vmem:[#allocation2 + $0x574] ss:$8 sps:$4 sm:$0xff]  }
 0x2cc   : > { %2684 = vmatpush1.bf16.msra.mxu1 %v9372_v13  ;;  %v9411_v13 = vld [vmem:[#allocation2 + $0x550] ss:$8 sps:$4 sm:$0xff]  }
 0x2cd   : > { %2685 = vmatprep.subr.bf16.mxu1 %v9377_v52  ;;  %v9416_v52 = vld [vmem:[#allocation2 + $0x564] ss:$8 sps:$4 sm:$0xff]   ;;  %v9417_v48 = vld [vmem:[#allocation2 + $0x570] ss:$8 sps:$4 sm:$0xff]  }
 0x2d0   : > { %2686 = vmatpush1.bf16.msra.mxu1 %v9375_v21 }
 0x2d1   : > { %2687 = vmatprep.subr.bf16.mxu1 %v9380_v31 }
 0x2d4   : > { %2688 = vmatpush1.bf16.msra.mxu1 %v9378_v60 }
 0x2d5   : > { %2689 = vmatprep.subr.bf16.mxu1 %v9383_v40 }
 0x2d8   : > { %2690 = vmatpush1.bf16.msra.mxu1 %v9381_v37  ;;  %v9420_v37 = vld [vmem:[#allocation2 + $0x580] ss:$8 sps:$4 sm:$0xff]  }
 0x2d9   : > { %2691 = vmatprep.subr.bf16.mxu1 %v9386_v55 }
 0x2dc   : > { %2692 = vmatpush1.bf16.msra.mxu1 %v9384_v27  ;;  %v9425_v27 = vld [vmem:[#allocation2 + $0x594] ss:$8 sps:$4 sm:$0xff]  }
 0x2dd   : > { %2693 = vmatprep.subr.bf16.mxu1 %v9389_v51  ;;  %v9423_v51 = vld [vmem:[#allocation2 + $0x590] ss:$8 sps:$4 sm:$0xff]  }
 0x2e0   : > { %2694 = vmatpush1.bf16.msra.mxu1 %v9387_v43  ;;  %v9428_v43 = vld [vmem:[#allocation2 + $0x5a4] ss:$8 sps:$4 sm:$0xff]  }
 0x2e1   : > { %2695 = vmatprep.subr.bf16.mxu1 %v9392_v36  ;;  %v9426_v36 = vld [vmem:[#allocation2 + $0x5a0] ss:$8 sps:$4 sm:$0xff]  }
 0x2e4   : > { %2696 = vmatpush1.bf16.msra.mxu1 %v9390_v63  ;;  %v9431_v63 = vld [vmem:[#allocation2 + $0x5b4] ss:$8 sps:$4 sm:$0xff]  }
 0x2e5   : > { %2697 = vmatprep.subr.bf16.mxu1 %v9395_v16  ;;  %v9434_v16 = vld [vmem:[#allocation2 + $0x5c4] ss:$8 sps:$4 sm:$0xff]  }
 0x2e8   : > { %2698 = vmatpush1.bf16.msra.mxu1 %v9393_v12  ;;  %v9437_v12 = vld [vmem:[#allocation2 + $0x5d4] ss:$8 sps:$4 sm:$0xff]  }
 0x2e9   : > { %2718 = vmatprep.subr.bf16.mxu1 %v9398_v47  ;;  %v9435_v47 = vld [vmem:[#allocation2 + $0x5d0] ss:$8 sps:$4 sm:$0xff]  }
 0x2eb   : > { %2700 = vmatmul.mubr.bf16.vlgmr.msra.gmra.mrb[0].mxu1 %v12003_v29  ;;  %v9441_v29 = vld [vmem:[#allocation2 + $0x5f0] ss:$8 sps:$4 sm:$0xff]  }
 0x2ec   : > { %2709 = vmatprep.mubr.bf16.mxu1 %v1176_v38  ;;  %2719 = vmatpush1.bf16.msra.mxu1 %v9396_v26  ;;  %v9440_v26 = vld [vmem:[#allocation2 + $0x5e4] ss:$8 sps:$4 sm:$0xff]   ;;  %v9443_v38 = vld [vmem:[#allocation2 + $0x5f4] ss:$8 sps:$4 sm:$0xff]  }
 0x2ed   : > { %2720 = vmatprep.subr.bf16.mxu1 %v9401_v5  ;;  %v9438_v5 = vld [vmem:[#allocation2 + $0x5e0] ss:$8 sps:$4 sm:$0xff]  }
 0x2f0   : > { %2721 = vmatpush1.bf16.msra.mxu1 %v9399_v30  ;;  %v9446_v30 = vld [vmem:[#allocation2 + $0x604] ss:$8 sps:$4 sm:$0xff]  }
 0x2f1   : > { %2722 = vmatprep.subr.bf16.mxu1 %v9404_v9  ;;  %v9444_v9 = vld [vmem:[#allocation2 + $0x600] ss:$8 sps:$4 sm:$0xff]  }
 0x2f3   : > { %2710 = vmatmul.mubr.bf16.gmra.mrb[20].mxu1 %v1175_v32  ;;  %v1178_v32 = vpack.c.bf16 %v10620_v56, %v10620_v56  ;;  %v12006_v56 = vpack.c.bf16 %v10636_v22, %v10633_v34  ;;  %v9470_v34 = vld [vmem:[#allocation2 + $0x684] ss:$8 sps:$4 sm:$0xff]  }
 0x2f4   : > { %2723 = vmatpush1.bf16.msra.mxu1 %v9402_v11  ;;  %2750 = vmatprep.mubr.bf16.mxu1 %v12004_v46  ;;  %v9449_v11 = vld [vmem:[#allocation2 + $0x614] ss:$8 sps:$4 sm:$0xff]   ;;  %v9447_v46 = vld [vmem:[#allocation2 + $0x610] ss:$8 sps:$4 sm:$0xff]  }
 0x2f5   : > { %2724 = vmatprep.subr.bf16.mxu1 %v9407_v49  ;;  %v12005_v49 = vpack.c.bf16 %v10613_v42, %v10610_v44  ;;  %v9453_v42 = vld [vmem:[#allocation2 + $0x630] ss:$8 sps:$4 sm:$0xff]   ;;  %v9458_v44 = vld [vmem:[#allocation2 + $0x644] ss:$8 sps:$4 sm:$0xff]  }
 0x2f8   : > { %2725 = vmatpush1.bf16.msra.mxu1 %v9405_v25  ;;  %v9452_v25 = vld [vmem:[#allocation2 + $0x624] ss:$8 sps:$4 sm:$0xff]  }
 0x2f9   : > { %2726 = vmatprep.subr.bf16.mxu1 %v9410_v28  ;;  %v9450_v28 = vld [vmem:[#allocation2 + $0x620] ss:$8 sps:$4 sm:$0xff]  }
 0x2fc   : > { %2727 = vmatpush1.bf16.msra.mxu1 %v9408_v33  ;;  %v1177_v33 = vpack.c.bf16 %v10623_v4, %v10623_v4  ;;  %v9462_v4 = vld [vmem:[#allocation2 + $0x660] ss:$8 sps:$4 sm:$0xff]  }
 0x2fd   : > { %2728 = vmatprep.subr.bf16.mxu1 %v9413_v17  ;;  %v9455_v17 = vld [vmem:[#allocation2 + $0x634] ss:$8 sps:$4 sm:$0xff]  }
 0x300   : > { %2729 = vmatpush1.bf16.msra.mxu1 %v9411_v13  ;;  %v9456_v13 = vld [vmem:[#allocation2 + $0x640] ss:$8 sps:$4 sm:$0xff]  }
 0x301   : > { %2730 = vmatprep.subr.bf16.mxu1 %v9416_v52  ;;  %v9461_v52 = vld [vmem:[#allocation2 + $0x654] ss:$8 sps:$4 sm:$0xff]  }
 0x304   : > { %2731 = vmatpush1.bf16.msra.mxu1 %v9414_v23  ;;  %v9459_v23 = vld [vmem:[#allocation2 + $0x650] ss:$8 sps:$4 sm:$0xff]  }
 0x305   : > { %2732 = vmatprep.subr.bf16.mxu1 %v9419_v50  ;;  %v9464_v50 = vld [vmem:[#allocation2 + $0x664] ss:$8 sps:$4 sm:$0xff]  }
 0x306   : > { %v2558_v18 = vpop.f32.mrb[8].mxu1 }
 0x307   : > { %v10730_v21 = vadd.f32 %v2558_v18, %v10715_v35  ;;  %v2560_v31 = vpop.f32.mrb[9].mxu1  ;;  %v9429_v35 = vld [vmem:[#allocation2 + $0x5b0] ss:$8 sps:$4 sm:$0xff]  }
 0x308   : > { %v10733_v60 = vadd.f32 %v2560_v31, %v10717_v45  ;;  %v2562_v40 = vpop.f32.mrb[10].mxu1  ;;  %2733 = vmatpush1.bf16.msra.mxu1 %v9417_v48  ;;  %v9432_v45 = vld [vmem:[#allocation2 + $0x5c0] ss:$8 sps:$4 sm:$0xff]   ;;  %v9467_v48 = vld [vmem:[#allocation2 + $0x674] ss:$8 sps:$4 sm:$0xff]  }
 0x309   : > { %v2563_v55 = vpop.f32.mrb[11].mxu1  ;;  %2734 = vmatprep.subr.bf16.mxu1 %v9422_v1  ;;  %v9465_v1 = vld [vmem:[#allocation2 + $0x670] ss:$8 sps:$4 sm:$0xff]  }
 0x30a   : > { %v9468_v55 = vld [vmem:[#allocation2 + $0x680] ss:$8 sps:$4 sm:$0xff]  }
 0x30c   : > { %2735 = vmatpush1.bf16.msra.mxu1 %v9420_v37 }
 0x30d   : > { %2736 = vmatprep.subr.bf16.mxu1 %v9425_v27 }
 0x310   : > { %2737 = vmatpush1.bf16.msra.mxu1 %v9423_v51  ;;  %v9473_v51 = vld [vmem:[#allocation2 + $0x694] ss:$8 sps:$4 sm:$0xff]  }
 0x311   : > { %2738 = vmatprep.subr.bf16.mxu1 %v9428_v43  ;;  %v9471_v43 = vld [vmem:[#allocation2 + $0x690] ss:$8 sps:$4 sm:$0xff]  }
 0x314   : > { %2739 = vmatpush1.bf16.msra.mxu1 %v9426_v36  ;;  %v9476_v36 = vld [vmem:[#allocation2 + $0x6a4] ss:$8 sps:$4 sm:$0xff]  }
 0x315   : > { %2740 = vmatprep.subr.bf16.mxu1 %v9431_v63  ;;  %v9474_v63 = vld [vmem:[#allocation2 + $0x6a0] ss:$8 sps:$4 sm:$0xff]  }
 0x318   : > { %2741 = vmatpush1.bf16.msra.mxu1 %v9429_v35  ;;  %v9479_v35 = vld [vmem:[#allocation2 + $0x6b4] ss:$8 sps:$4 sm:$0xff]  }
 0x319   : > { %2742 = vmatprep.subr.bf16.mxu1 %v9434_v16  ;;  %v9482_v16 = vld [vmem:[#allocation2 + $0x6c4] ss:$8 sps:$4 sm:$0xff]  }
 0x31c   : > { %2743 = vmatpush1.bf16.msra.mxu1 %v9432_v45  ;;  %v9485_v45 = vld [vmem:[#allocation2 + $0x6d4] ss:$8 sps:$4 sm:$0xff]  }
 0x31d   : > { %2744 = vmatprep.subr.bf16.mxu1 %v9437_v12  ;;  %v9483_v12 = vld [vmem:[#allocation2 + $0x6d0] ss:$8 sps:$4 sm:$0xff]  }
 0x320   : > { %2745 = vmatpush1.bf16.msra.mxu1 %v9435_v47  ;;  %v9488_v47 = vld [vmem:[#allocation2 + $0x6e4] ss:$8 sps:$4 sm:$0xff]  }
 0x321   : > { %2746 = vmatprep.subr.bf16.mxu1 %v9440_v26  ;;  %v9486_v26 = vld [vmem:[#allocation2 + $0x6e0] ss:$8 sps:$4 sm:$0xff]  }
 0x324   : > { %2747 = vmatpush1.bf16.msra.mxu1 %v9438_v5  ;;  %v9491_v5 = vld [vmem:[#allocation2 + $0x6f4] ss:$8 sps:$4 sm:$0xff]  }
 0x325   : > { %2748 = vmatprep.subr.bf16.mxu1 %v9443_v38  ;;  %v9489_v38 = vld [vmem:[#allocation2 + $0x6f0] ss:$8 sps:$4 sm:$0xff]  }
 0x328   : > { %2749 = vmatpush1.bf16.msra.mxu1 %v9441_v29  ;;  %v9494_v29 = vld [vmem:[#allocation2 + $0x704] ss:$8 sps:$4 sm:$0xff]  }
 0x329   : > { %2769 = vmatprep.subr.bf16.mxu1 %v9446_v30  ;;  %v9492_v30 = vld [vmem:[#allocation2 + $0x700] ss:$8 sps:$4 sm:$0xff]  }
 0x32b   : > { %2751 = vmatmul.mubr.bf16.vlgmr.msra.gmra.mrb[0].mxu1 %v12005_v49  ;;  %v9500_v49 = vld [vmem:[#allocation2 + $0x724] ss:$8 sps:$4 sm:$0xff]  }
 0x32c   : > { %2760 = vmatprep.mubr.bf16.mxu1 %v1178_v32  ;;  %2770 = vmatpush1.bf16.msra.mxu1 %v9444_v9  ;;  %v9497_v9 = vld [vmem:[#allocation2 + $0x714] ss:$8 sps:$4 sm:$0xff]   ;;  %v9495_v32 = vld [vmem:[#allocation2 + $0x710] ss:$8 sps:$4 sm:$0xff]  }
 0x32d   : > { %2771 = vmatprep.subr.bf16.mxu1 %v9449_v11  ;;  %v1180_v11 = vpack.c.bf16 %v10648_v53, %v10648_v53  ;;  %v9504_v53 = vld [vmem:[#allocation2 + $0x740] ss:$8 sps:$4 sm:$0xff]  }
 0x330   : > { %2772 = vmatpush1.bf16.msra.mxu1 %v9447_v46  ;;  %v9498_v46 = vld [vmem:[#allocation2 + $0x720] ss:$8 sps:$4 sm:$0xff]  }
 0x331   : > { %2773 = vmatprep.subr.bf16.mxu1 %v9452_v25  ;;  %v1179_v25 = vpack.c.bf16 %v10653_v7, %v10653_v7  ;;  %v9510_v7 = vld [vmem:[#allocation2 + $0x760] ss:$8 sps:$4 sm:$0xff]  }
 0x333   : > { %2761 = vmatmul.mubr.bf16.gmra.mrb[24].mxu1 %v1177_v33  ;;  %v9507_v33 = vld [vmem:[#allocation2 + $0x750] ss:$8 sps:$4 sm:$0xff]  }
 0x334   : > { %2774 = vmatpush1.bf16.msra.mxu1 %v9450_v28  ;;  %2801 = vmatprep.mubr.bf16.mxu1 %v12006_v56  ;;  %v9503_v28 = vld [vmem:[#allocation2 + $0x734] ss:$8 sps:$4 sm:$0xff]  }
 0x335   : > { %2775 = vmatprep.subr.bf16.mxu1 %v9455_v17  ;;  %v9512_v17 = vld [vmem:[#allocation2 + $0x764] ss:$8 sps:$4 sm:$0xff]   ;;  %v9515_v56 = vld [vmem:[#allocation2 + $0x774] ss:$8 sps:$4 sm:$0xff]  }
 0x338   : > { %2776 = vmatpush1.bf16.msra.mxu1 %v9453_v42  ;;  %v9513_v42 = vld [vmem:[#allocation2 + $0x770] ss:$8 sps:$4 sm:$0xff]  }
 0x339   : > { %2777 = vmatprep.subr.bf16.mxu1 %v9458_v44 }
 0x33c   : > { %2778 = vmatpush1.bf16.msra.mxu1 %v9456_v13 }
 0x33d   : > { %2779 = vmatprep.subr.bf16.mxu1 %v9461_v52 }
 0x340   : > { %2780 = vmatpush1.bf16.msra.mxu1 %v9459_v23  ;;  %v9516_v23 = vld [vmem:[#allocation2 + $0x780] ss:$8 sps:$4 sm:$0xff]  }
 0x341   : > { %2781 = vmatprep.subr.bf16.mxu1 %v9464_v50 }
 0x344   : > { %2782 = vmatpush1.bf16.msra.mxu1 %v9462_v4  ;;  %v9521_v4 = vld [vmem:[#allocation2 + $0x794] ss:$8 sps:$4 sm:$0xff]  }
 0x345   : > { %2783 = vmatprep.subr.bf16.mxu1 %v9467_v48  ;;  %v9519_v48 = vld [vmem:[#allocation2 + $0x790] ss:$8 sps:$4 sm:$0xff]  }
 0x346   : > { %v2609_v22 = vpop.f32.mrb[12].mxu1 }
 0x347   : > { %v10746_v18 = vadd.f32 %v2609_v22, %v10730_v21  ;;  %v2611_v31 = vpop.f32.mrb[13].mxu1  ;;  %v9477_v21 = vld [vmem:[#allocation2 + $0x6b0] ss:$8 sps:$4 sm:$0xff]   ;;  %v9527_v22 = vld [vmem:[#allocation2 + $0x7b4] ss:$8 sps:$4 sm:$0xff]  }
 0x348   : > { %v10749_v40 = vadd.f32 %v2611_v31, %v10733_v60  ;;  %v2613_v37 = vpop.f32.mrb[14].mxu1  ;;  %2784 = vmatpush1.bf16.msra.mxu1 %v9465_v1  ;;  %v9480_v60 = vld [vmem:[#allocation2 + $0x6c0] ss:$8 sps:$4 sm:$0xff]   ;;  %v9524_v1 = vld [vmem:[#allocation2 + $0x7a4] ss:$8 sps:$4 sm:$0xff]  }
 0x349   : > { %v2614_v27 = vpop.f32.mrb[15].mxu1  ;;  %2785 = vmatprep.subr.bf16.mxu1 %v9470_v34  ;;  %v9522_v34 = vld [vmem:[#allocation2 + $0x7a0] ss:$8 sps:$4 sm:$0xff]   ;;  %v9525_v31 = vld [vmem:[#allocation2 + $0x7b0] ss:$8 sps:$4 sm:$0xff]  }
 0x34a   : > { %v9533_v37 = vld [vmem:[#allocation2 + $0x7d4] ss:$8 sps:$4 sm:$0xff]   ;;  %v9536_v27 = vld [vmem:[#allocation2 + $0x7e4] ss:$8 sps:$4 sm:$0xff]  }
 0x34c   : > { %2786 = vmatpush1.bf16.msra.mxu1 %v9468_v55  ;;  %v9531_v55 = vld [vmem:[#allocation2 + $0x7d0] ss:$8 sps:$4 sm:$0xff]  }
 0x34d   : > { %2787 = vmatprep.subr.bf16.mxu1 %v9473_v51  ;;  %v9534_v51 = vld [vmem:[#allocation2 + $0x7e0] ss:$8 sps:$4 sm:$0xff]  }
 0x350   : > { %2788 = vmatpush1.bf16.msra.mxu1 %v9471_v43  ;;  %v9539_v43 = vld [vmem:[#allocation2 + $0x7f4] ss:$8 sps:$4 sm:$0xff]  }
 0x351   : > { %2789 = vmatprep.subr.bf16.mxu1 %v9476_v36  ;;  %v9537_v36 = vld [vmem:[#allocation2 + $0x7f0] ss:$8 sps:$4 sm:$0xff]  }
 0x354   : > { %2790 = vmatpush1.bf16.msra.mxu1 %v9474_v63  ;;  %v1182_v63 = vpack.c.bf16 %v10678_v6, %v10678_v6 }
 0x355   : > { %2791 = vmatprep.subr.bf16.mxu1 %v9479_v35  ;;  %v12007_v35 = vpack.c.bf16 %v10675_v20, %v10669_v24  ;;  %v9540_v24 = vld [vmem:[%s11958_s3 + $0x40] sm:$0xff]  }
 0x356   : > { %8333 = vmatprep.subr.bf16.mxu0 %v9540_v24  ;;  %v9541_v20 = vld [vmem:[%s11958_s3] sm:$0xff]  }
 0x357   : > { %8334 = vmatpush3.bf16.msra.mxu0 %v9541_v20 }
 0x358   : > { %2792 = vmatpush1.bf16.msra.mxu1 %v9477_v21  ;;  %v1181_v21 = vpack.c.bf16 %v10683_v14, %v10683_v14  ;;  %v9542_v14 = vld [vmem:[%s11958_s3 + $0x48] sm:$0xff]  }
 0x359   : > { %2793 = vmatprep.subr.bf16.mxu1 %v9482_v16  ;;  %8335 = vmatprep.subr.bf16.mxu0 %v9542_v14 }
 0x35c   : > { %2794 = vmatpush1.bf16.msra.mxu1 %v9480_v60 }
 0x35d   : > { %2795 = vmatprep.subr.bf16.mxu1 %v9485_v45 }
 0x360   : > { %2796 = vmatpush1.bf16.msra.mxu1 %v9483_v12 }
 0x361   : > { %2797 = vmatprep.subr.bf16.mxu1 %v9488_v47 }
 0x364   : > { %2798 = vmatpush1.bf16.msra.mxu1 %v9486_v26 }
 0x365   : > { %2799 = vmatprep.subr.bf16.mxu1 %v9491_v5 }
 0x368   : > { %2800 = vmatpush1.bf16.msra.mxu1 %v9489_v38 }
 0x369   : > { %2820 = vmatprep.subr.bf16.mxu1 %v9494_v29 }
 0x36b   : > { %2802 = vmatmul.mubr.bf16.vlgmr.msra.gmra.mrb[0].mxu1 %v1163_v58  ;;  %v9509_v58 = vld [vmem:[#allocation2 + $0x754] ss:$8 sps:$4 sm:$0xff]  }
 0x36c   : > { %2811 = vmatprep.mubr.bf16.mxu1 %v1180_v11  ;;  %2821 = vmatpush1.bf16.msra.mxu1 %v9492_v30  ;;  %v9543_v11 = vld [vmem:[%s11958_s3 + $0x8] sm:$0xff]  }
 0x36d   : > { %2822 = vmatprep.subr.bf16.mxu1 %v9497_v9  ;;  %8336 = vmatpush3.bf16.msra.mxu0 %v9543_v11 }
 0x370   : > { %2823 = vmatpush1.bf16.msra.mxu1 %v9495_v32  ;;  %v9544_v32 = vld [vmem:[%s11958_s3 + $0x50] sm:$0xff]  }
 0x371   : > { %2824 = vmatprep.subr.bf16.mxu1 %v9500_v49  ;;  %v9545_v49 = vld [vmem:[%s11958_s3 + $0x10] sm:$0xff]   ;;  %8337 = vmatprep.subr.bf16.mxu0 %v9544_v32 }
 0x372   : > { %8338 = vmatpush3.bf16.msra.mxu0 %v9545_v49 }
 0x373   : > { %2812 = vmatmul.mubr.bf16.gmra.mrb[28].mxu1 %v1179_v25  ;;  %v9547_v25 = vld [vmem:[%s11958_s3 + $0x18] sm:$0xff]  }
 0x374   : > { %2825 = vmatpush1.bf16.msra.mxu1 %v9498_v46  ;;  %2852 = vmatprep.mubr.bf16.mxu1 %v1166_v19  ;;  %v9546_v46 = vld [vmem:[%s11958_s3 + $0x58] sm:$0xff]  }
 0x375   : > { %2826 = vmatprep.subr.bf16.mxu1 %v9503_v28  ;;  %8339 = vmatprep.subr.bf16.mxu0 %v9546_v46  ;;  %v9548_v28 = vld [vmem:[%s11958_s3 + $0x60] sm:$0xff]  }
 0x376   : > { %8340 = vmatpush3.bf16.msra.mxu0 %v9547_v25 }
 0x377   : > { %8341 = vmatprep.subr.bf16.mxu0 %v9548_v28 }
 0x378   : > { %2827 = vmatpush1.bf16.msra.mxu1 %v9501_v39  ;;  %v9549_v39 = vld [vmem:[%s11958_s3 + $0x20] sm:$0xff]  }
 0x379   : > { %2828 = vmatprep.subr.bf16.mxu1 %v9506_v57  ;;  %v9550_v57 = vld [vmem:[%s11958_s3 + $0x68] sm:$0xff]  }
 0x37a   : > { %8342 = vmatpush3.bf16.msra.mxu0 %v9549_v39 }
 0x37b   : > { %8343 = vmatprep.subr.bf16.mxu0 %v9550_v57 }
 0x37c   : > { %2829 = vmatpush1.bf16.msra.mxu1 %v9504_v53  ;;  %v9551_v53 = vld [vmem:[%s11958_s3 + $0x28] sm:$0xff]  }
 0x37d   : > { %2830 = vmatprep.subr.bf16.mxu1 %v9509_v58  ;;  %v9552_v58 = vld [vmem:[%s11958_s3 + $0x70] sm:$0xff]  }
 0x37e   : > { %8344 = vmatpush3.bf16.msra.mxu0 %v9551_v53 }
 0x37f   : > { %8345 = vmatprep.subr.bf16.mxu0 %v9552_v58 }
 0x380   : > { %2831 = vmatpush1.bf16.msra.mxu1 %v9507_v33  ;;  %v9553_v33 = vld [vmem:[%s11958_s3 + $0x30] sm:$0xff]  }
 0x381   : > { %2832 = vmatprep.subr.bf16.mxu1 %v9512_v17  ;;  %v9554_v17 = vld [vmem:[%s11958_s3 + $0x78] sm:$0xff]  }
 0x382   : > { %8346 = vmatpush3.bf16.msra.mxu0 %v9553_v33 }
 0x383   : > { %8347 = vmatprep.subr.bf16.mxu0 %v9554_v17 }
 0x384   : > { %2833 = vmatpush1.bf16.msra.mxu1 %v9510_v7  ;;  %v9555_v7 = vld [vmem:[%s11958_s3 + $0x38] sm:$0xff]  }
 0x385   : > { %2834 = vmatprep.subr.bf16.mxu1 %v9515_v56  ;;  %v9556_v56 = vld [vmem:[%s11958_s3 + $0xc0] sm:$0xff]  }
 0x386   : > { %v2660_v15 = vpop.f32.mrb[16].mxu1  ;;  %8348 = vmatpush3.bf16.msra.mxu0 %v9555_v7 }
 0x387   : > { %v2661_v19 = vadd.f32 %v2660_v15, %v10746_v18  ;;  %v2662_v44 = vpop.f32.mrb[17].mxu1  ;;  %v9530_v18 = vld [vmem:[#allocation2 + $0x7c4] ss:$8 sps:$4 sm:$0xff]   ;;  %8355 = vmatprep.subr.bf16.mxu0 %v9556_v56 }
 0x388   : > { %v2663_v13 = vadd.f32 %v2662_v44, %v10749_v40  ;;  %v2664_v52 = vpop.f32.mrb[18].mxu1  ;;  %2835 = vmatpush1.bf16.msra.mxu1 %v9513_v42  ;;  %v9528_v40 = vld [vmem:[#allocation2 + $0x7c0] ss:$8 sps:$4 sm:$0xff]  }
 0x389   : > { %v2665_v50 = vpop.f32.mrb[19].mxu1  ;;  %2836 = vmatprep.subr.bf16.mxu1 %v9518_v3  ;;  %v7944_v52 = vld [vmem:[%s11964_s9 + $0x1] ss:$8 sm:$0x3] }
 0x38c   : > { %2837 = vmatpush1.bf16.msra.mxu1 %v9516_v23  ;;  %v12008_v23 = vsub.s32 0, %v10402_v41 }
 0x38d   : > { %2838 = vmatprep.subr.bf16.mxu1 %v9521_v4  ;;  %v12009_v4 = vsub.s32 1, %v10402_v41 }
 0x38e   : > { %v2877_v50 = vrot.slane %v7944_v52, %v12008_v23 }
 0x390   : > { %2839 = vmatpush1.bf16.msra.mxu1 %v9519_v48  ;;  %v10830_v48 = vrot.slane %v7944_v52, %v12009_v4 }
 0x391   : > { %2840 = vmatprep.subr.bf16.mxu1 %v9524_v1 }
 0x394   : > { %2841 = vmatpush1.bf16.msra.mxu1 %v9522_v34 }
 0x395   : > { %2842 = vmatprep.subr.bf16.mxu1 %v9527_v22 }
 0x398   : > { %2843 = vmatpush1.bf16.msra.mxu1 %v9525_v31 }
 0x399   : > { %2844 = vmatprep.subr.bf16.mxu1 %v9530_v18 }
 0x39c   : > { %2845 = vmatpush1.bf16.msra.mxu1 %v9528_v40 }
 0x39d   : > { %2846 = vmatprep.subr.bf16.mxu1 %v9533_v37 }
 0x3a0   : > { %2847 = vmatpush1.bf16.msra.mxu1 %v9531_v55 }
 0x3a1   : > { %2848 = vmatprep.subr.bf16.mxu1 %v9536_v27 }
 0x3a4   : > { %2849 = vmatpush1.bf16.msra.mxu1 %v9534_v51 }
 0x3a5   : > { %2850 = vmatprep.subr.bf16.mxu1 %v9539_v43 }
 0x3a8   : > { %2851 = vmatpush1.bf16.msra.mxu1 %v9537_v36 }
 0x3ab   : > { %2853 = vmatmul.mubr.bf16.vlgmr.msra.gmra.mrb[0].mxu1 %v12007_v35 }
 0x3ac   : > { %2862 = vmatprep.mubr.bf16.mxu1 %v1182_v63 }
 0x3b3   : > { %2863 = vmatmul.mubr.bf16.gmra.mrb[32].mxu1 %v1181_v21 }
 0x3c6   : > { %v2711_v16 = vpop.f32.mrb[20].mxu1 }
 0x3c7   : > { %v2712_v60 = vadd.f32 %v2711_v16, %v2661_v19  ;;  %v2713_v45 = vpop.f32.mrb[21].mxu1 }
 0x3c8   : > { %v2714_v12 = vadd.f32 %v2713_v45, %v2663_v13  ;;  %v2715_v47 = vpop.f32.mrb[22].mxu1 }
 0x3c9   : > { %v2716_v26 = vpop.f32.mrb[23].mxu1 }
 0x406   : > { %v2762_v5 = vpop.f32.mrb[24].mxu1 }
 0x407   : > { %v2763_v38 = vadd.f32 %v2762_v5, %v2712_v60  ;;  %v2764_v29 = vpop.f32.mrb[25].mxu1 }
 0x408   : > { %v2765_v30 = vadd.f32 %v2764_v29, %v2714_v12  ;;  %v2766_v6 = vpop.f32.mrb[26].mxu1 }
 0x409   : > { %v2767_v9 = vpop.f32.mrb[27].mxu1 }
 0x446   : > { %v2813_v42 = vpop.f32.mrb[28].mxu1 }
 0x447   : > { %v2814_v3 = vadd.f32 %v2813_v42, %v2763_v38  ;;  %v2815_v15 = vpop.f32.mrb[29].mxu1 }
 0x448   : > { %v10821_v19 = vadd.f32 %v2815_v15, %v2765_v30  ;;  %v2817_v44 = vpop.f32.mrb[30].mxu1 }
 0x449   : > { %v2818_v13 = vpop.f32.mrb[31].mxu1 }
 0x47e   : > { %v2854_v1 = vpop.f32.mrb[0].mxu1 }
 0x47f   : > { %v2884_v34 = vadd.f32 %v2877_v50, %v2854_v1  ;;  %v2856_v22 = vpop.f32.mrb[1].mxu1 }
 0x480   : > { %v2885_v31 = vadd.f32 %v10830_v48, %v2856_v22  ;;  %v2858_v18 = vpop.f32.mrb[2].mxu1 }
 0x481   : > { %vm2890_vm7 = vcmp.gt.f32.partialorder %v2884_v34, 0.0  ;;  %v2896_v40 = vmul.f32 0.01, %v2884_v34  ;;  %v2886_v37 = vadd.f32 %v2877_v50, %v2858_v18  ;;  %v2860_v55 = vpop.f32.mrb[3].mxu1 }
 0x482   : > { %vm2891_vm8 = vcmp.gt.f32.partialorder %v2885_v31, 0.0  ;;  %v2897_v27 = vmul.f32 0.01, %v2885_v31  ;;  %v2887_v51 = vadd.f32 %v10830_v48, %v2860_v55 }
 0x483   : > { %v2902_v43 = vsel %vm2890_vm7, %v2884_v34, %v2896_v40  ;;  %vm2892_vm9 = vcmp.gt.f32.partialorder %v2886_v37, 0.0  ;;  %v2898_v36 = vmul.f32 0.01, %v2886_v37 }
 0x484   : > { %v2919_v63 = vrot.slane %v2902_v43, 1  ;;  %v2903_v35 = vsel %vm2891_vm8, %v2885_v31, %v2897_v27  ;;  %vm2893_vm10 = vcmp.gt.f32.partialorder %v2887_v51, 0.0  ;;  %v2899_v21 = vmul.f32 0.01, %v2887_v51 }
 0x485   : > { %v2920_v16 = vrot.slane %v2903_v35, 1  ;;  %v2904_v60 = vsel %vm2892_vm9, %v2886_v37, %v2898_v36 }
 0x486   : > { %v2923_v45 = vmax.f32 %v2902_v43, %v2919_v63  ;;  %v2927_v12 = vrot.slane %v2904_v60, 1  ;;  %v2905_v47 = vsel %vm2893_vm10, %v2887_v51, %v2899_v21  ;;  %v2864_v26 = vpop.f32.mrb[32].mxu1 }
 0x487   : > { %v2924_v5 = vmax.f32 %v2903_v35, %v2920_v16  ;;  %v2928_v38 = vrot.slane %v2905_v47, 1  ;;  %v2865_v29 = vadd.f32 %v2864_v26, %v2814_v3  ;;  %v2866_v30 = vpop.f32.mrb[33].mxu1 }
 0x488   : > { %v2943_v6 = vrot.slane %v2923_v45, 1  ;;  %v2947_v9 = vrot.slane %v2923_v45, 2  ;;  %v2931_v24 = vmax.f32 %v2904_v60, %v2927_v12  ;;  %v2868_v20 = vpop.f32.mrb[34].mxu1  ;;  %v2951_v14 = vrot.slane %v2923_v45, 3 }
 0x489   : > { %v2944_v11 = vrot.slane %v2924_v5, 1  ;;  %v2948_v32 = vrot.slane %v2924_v5, 2  ;;  %v2932_v49 = vmax.f32 %v2905_v47, %v2928_v38  ;;  %v2869_v46 = vpop.f32.mrb[35].mxu1  ;;  %v2952_v28 = vrot.slane %v2924_v5, 3 }
 0x48a   : > { %v2987_v25 = vsel %vm533_vm6, %v2923_v45, %v2943_v6  ;;  %v2957_v39 = vrot.slane %v2931_v24, 4  ;;  %v2961_v57 = vrot.slane %v2931_v24, 5  ;;  %v2965_v33 = vrot.slane %v2931_v24, 6 }
 0x48b   : > { %v2989_v53 = vsel %vm516_vm5, %v2987_v25, %v2947_v9  ;;  %v2988_v58 = vsel %vm533_vm6, %v2924_v5, %v2944_v11  ;;  %v2958_v17 = vrot.slane %v2932_v49, 4  ;;  %v2969_v42 = vrot.slane %v2931_v24, 7 }
 0x48c   : > { %v2991_v7 = vsel %vm499_vm4, %v2989_v53, %v2951_v14  ;;  %v2990_v56 = vsel %vm516_vm5, %v2988_v58, %v2948_v32  ;;  %v2962_v3 = vrot.slane %v2932_v49, 5  ;;  %v2966_v13 = vrot.slane %v2932_v49, 6 }
 0x48d   : > { %v2992_v15 = vsel %vm499_vm4, %v2990_v56, %v2952_v28  ;;  %v2993_v44 = vsel %vm420_vm0, %v2991_v7, %v2957_v39  ;;  %v2888_v52 = vadd.f32 %v2877_v50, %v2865_v29  ;;  %v2970_v4 = vrot.slane %v2932_v49, 7 }
 0x48e   : > { %v2995_v23 = vsel %vm466_vm2, %v2993_v44, %v2961_v57  ;;  %v2994_v1 = vsel %vm420_vm0, %v2992_v15, %v2958_v17  ;;  %v2867_v34 = vadd.f32 %v2866_v30, %v10821_v19 }
 0x48f   : > { %v2997_v22 = vsel %vm449_vm3, %v2995_v23, %v2965_v33  ;;  %vm2894_vm14 = vcmp.gt.f32.partialorder %v2888_v52, 0.0  ;;  %v2900_v31 = vmul.f32 0.01, %v2888_v52  ;;  %v2996_v18 = vsel %vm466_vm2, %v2994_v1, %v2962_v3 }
 0x490   : > { %v2999_v40 = vsel %vm432_vm1, %v2997_v22, %v2969_v42  ;;  %v2889_v37 = vadd.f32 %v10830_v48, %v2867_v34  ;;  %v2998_v55 = vsel %vm449_vm3, %v2996_v18, %v2966_v13  ;;  %v10858_v48 = vadd.s32 8, %v10402_v41 }
 0x491   : > { %v2906_v50 = vsel %vm2894_vm14, %v2888_v52, %v2900_v31  ;;  %v3000_v27 = vsel %vm432_vm1, %v2998_v55, %v2970_v4  ;;  %v10851_v51 = vrot.slane %v2999_v40, 4 }
 0x492   : > { %v2915_v19 = vsel %vm2910_vm12, %v2906_v50, 0.0  ;;  %vm2895_vm15 = vcmp.gt.f32.partialorder %v2889_v37, 0.0  ;;  %v2901_v43 = vmul.f32 0.01, %v2889_v37  ;;  %v3018_v35 = vrot.slane %v3000_v27, 4  ;;  %v9557_v27 = vld [vmem:[%s11958_s3 + $0x80] sm:$0xff]  }
 0x493   : > { %v2935_v36 = vrot.slane %v2915_v19, 1  ;;  %v10862_v60 = vsel %vm420_vm0, 0.0, %v10851_v51  ;;  %vm3008_vm7 = vcmp.lt.s32.totalorder %v10858_v48, 9  ;;  %vm4493_vm10 = vcmp.lt.s32.totalorder %v10858_v48, 10 }
 0x494   : > { %v2907_v63 = vsel %vm2895_vm15, %v2889_v37, %v2901_v43  ;;  %v10865_v5 = vsel %vm420_vm0, 0.0, %v3018_v35  ;;  %v3031_v61 = vrot.slane %v10862_v60, 1  ;;  %v3043_v24 = vrot.slane %v10862_v60, 2 }
 0x495   : > { %v2939_v21 = vmax.f32 %v2915_v19, %v2935_v36  ;;  %v2916_v16 = vsel %vm2910_vm12, %v2907_v63, 0.0  ;;  %v3034_v14 = vrot.slane %v10865_v5, 1  ;;  %v3046_v11 = vrot.slane %v10865_v5, 2  ;;  %v9558_v36 = vld [vmem:[%s11958_s3 + $0xc8] sm:$0xff]  }
 0x496   : > { %v2936_v45 = vrot.slane %v2916_v16, 1  ;;  %v3058_v32 = vrot.slane %v10865_v5, 3  ;;  %v3055_v28 = vrot.slane %v10862_v60, 3  ;;  %v3070_v53 = vrot.slane %v10865_v5, 4 }
 0x497   : > { %v2975_v12 = vrot.slane %v2939_v21, 1  ;;  %v2979_v47 = vrot.slane %v2939_v21, 2  ;;  %v2983_v38 = vrot.slane %v2939_v21, 3  ;;  %v3067_v58 = vrot.slane %v10862_v60, 4 }
 0x498   : > { %v2940_v26 = vmax.f32 %v2916_v16, %v2936_v45  ;;  %v3082_v17 = vrot.slane %v10865_v5, 5  ;;  %v3079_v7 = vrot.slane %v10862_v60, 5  ;;  %v3094_v56 = vrot.slane %v10865_v5, 6 }
 0x499   : > { %v3001_v29 = vsel %vm533_vm6, %v2939_v21, %v2975_v12  ;;  %v3091_v15 = vrot.slane %v10862_v60, 6  ;;  %v3106_v44 = vrot.slane %v10865_v5, 7  ;;  %vm5251_vm14 = vcmp.lt.s32.totalorder %v10858_v48, 11 }
 0x49a   : > { %v3003_v30 = vsel %vm516_vm5, %v3001_v29, %v2979_v47  ;;  %v2976_v6 = vrot.slane %v2940_v26, 1  ;;  %v2980_v9 = vrot.slane %v2940_v26, 2  ;;  %v2984_v49 = vrot.slane %v2940_v26, 3 }
 0x49b   : > { %v3005_v20 = vsel %vm499_vm4, %v3003_v30, %v2983_v38  ;;  %vm5285_vm15 = vcmp.lt.s32.totalorder %v10402_v41, 5 }
 0x49c   : > { %v3002_v46 = vsel %vm533_vm6, %v2940_v26, %v2976_v6  ;;  %v3011_v25 = vsel %vm3008_vm7, %v3005_v20, 0.0  ;;  %v9560_v20 = vld [vmem:[%s11958_s3 + $0xd0] sm:$0xff]  }
 0x49d   : > { %v3004_v39 = vsel %vm516_vm5, %v3002_v46, %v2980_v9  ;;  %v3019_v57 = vrot.slane %v3011_v25, 4 }
 0x49e   : > { %v3006_v33 = vsel %vm499_vm4, %v3004_v39, %v2984_v49 }
 0x49f   : > { %v3012_v42 = vsel %vm3008_vm7, %v3006_v33, 0.0  ;;  %v10891_v3 = vsel %vm420_vm0, %v10851_v51, %v3019_v57  ;;  %vm8215_vm7 = vmpackc.low %vm10423_vm11, %vm10423_vm11 }
 0x4a0   : > { %v3021_v13 = vrot.slane %v3012_v42, 4  ;;  %v8079_v52 = vpack.c.bf16 %v10891_v3, %v10851_v51  ;;  %v3032_v23 = vrot.slane %v10891_v3, 1  ;;  %v3044_v4 = vrot.slane %v10891_v3, 2  ;;  %v9562_v42 = vld [vmem:[%s11958_s3 + $0xd8] sm:$0xff]  }
 0x4a1   : > { %v3056_v1 = vrot.slane %v10891_v3, 3  ;;  %v3068_v34 = vrot.slane %v10891_v3, 4  ;;  %v3080_v22 = vrot.slane %v10891_v3, 5  ;;  %v3092_v31 = vrot.slane %v10891_v3, 6 }
 0x4a2   : > { %v10904_v18 = vsel %vm420_vm0, %v3018_v35, %v3021_v13  ;;  %v10907_v40 = vsel %vm432_vm1, %v3031_v61, %v3032_v23  ;;  %v10911_v37 = vsel %vm432_vm1, %v3032_v23, %v10324_v54  ;;  %v10914_v55 = vsel %vm449_vm3, %v3043_v24, %v3044_v4 }
 0x4a3   : > { %v8075_v50 = vpack.c.bf16 %v10904_v18, %v3018_v35  ;;  %v3035_v51 = vrot.slane %v10904_v18, 1  ;;  %v3373_v19 = vpack.c.bf16 %v10911_v37, %v10907_v40  ;;  %v3047_v43 = vrot.slane %v10904_v18, 2  ;;  %v9577_v40 = vld [vmem:[%s11958_s3 + $0x110] sm:$0xff]   ;;  %v9578_v37 = vld [vmem:[%s11958_s3 + $0x158] sm:$0xff]  }
 0x4a4   : > { %v10929_v63 = vsel %vm449_vm3, %v3044_v4, %v10330_v59  ;;  %v3059_v35 = vrot.slane %v10904_v18, 3  ;;  %v10933_v21 = vsel %vm466_vm2, %v3055_v28, %v3056_v1  ;;  %v10937_v16 = vsel %vm466_vm2, %v3056_v1, %v10339_v62 }
 0x4a5   : > { %8076 = vmatprep.mubr.msk.bf16.mxu0 %vm10444_vm13, %v8075_v50  ;;  %v3036_v45 = vsel %vm432_vm1, %v3034_v14, %v3035_v51  ;;  %v3038_v12 = vsel %vm432_vm1, %v3035_v51, %v10324_v54  ;;  %v10945_v47 = vsel %vm449_vm3, %v3046_v11, %v3047_v43  ;;  %v10949_v26 = vsel %vm449_vm3, %v3047_v43, %v10330_v59  ;;  %v9559_v54 = vld [vmem:[%s11958_s3 + $0x88] sm:$0xff]   ;;  %v9565_v50 = vld [vmem:[%s11958_s3 + $0xa0] sm:$0xff]   ;;  %v9568_v43 = vld [vmem:[%s11958_s3 + $0xf0] sm:$0xff]  }
 0x4a6   : > { %8080 = vmatmul.mubr.msk.bf16.vlgmr.msra.gmra.mrb[8].mxu0 %vm10444_vm13, %v8079_v52  ;;  %v3374_v38 = vpack.c.bf16 %v3038_v12, %v3036_v45  ;;  %v3376_v29 = vpack.c.bf16 %v10949_v26, %v10945_v47  ;;  %v3375_v61 = vpack.c.bf16 %v10929_v63, %v10914_v55  ;;  %v10958_v30 = vsel %vm466_vm2, %v3058_v32, %v3059_v35  ;;  %v9567_v51 = vld [vmem:[%s11958_s3 + $0xa8] sm:$0xff]   ;;  %v9571_v45 = vld [vmem:[%s11958_s3 + $0xb8] sm:$0xff]   ;;  %v9572_v12 = vld [vmem:[%s11958_s3 + $0x140] sm:$0xff]  }
 0x4a7   : > { %8356 = vmatpush3.bf16.msra.mxu0 %v9557_v27  ;;  %v10965_v59 = vsel %vm466_vm2, %v3059_v35, %v10339_v62  ;;  %v3377_v6 = vpack.c.bf16 %v10937_v16, %v10933_v21  ;;  %v3071_v9 = vrot.slane %v10904_v18, 4  ;;  %v10971_v24 = vsel %vm420_vm0, %v3067_v58, %v3068_v34  ;;  %v9561_v58 = vld [vmem:[%s11958_s3 + $0x90] sm:$0xff]   ;;  %v9566_v27 = vld [vmem:[%s11958_s3 + $0xe8] sm:$0xff]   ;;  %v9570_v35 = vld [vmem:[%s11958_s3 + $0xf8] sm:$0xff]  }
 0x4a8   : > { %4228 = vmatprep.mubr.bf16.mxu0 %v3374_v38  ;;  %8357 = vmatprep.subr.bf16.mxu0 %v9558_v36  ;;  %v3378_v14 = vpack.c.bf16 %v10965_v59, %v10958_v30  ;;  %v10980_v62 = vsel %vm420_vm0, %v3068_v34, %v10346_v0  ;;  %v3083_v11 = vrot.slane %v10904_v18, 5  ;;  %v10984_v32 = vsel %vm499_vm4, %v3079_v7, %v3080_v22  ;;  %v9569_v36 = vld [vmem:[%s11958_s3 + $0xb0] sm:$0xff]   ;;  %v9573_v38 = vld [vmem:[%s11958_s3 + $0x100] sm:$0xff]   ;;  %v9594_v63 = vld [vmem:[%s11958_s3 + $0x1d8] sm:$0xff]  }
 0x4a9   : > { %v10987_v49 = vsel %vm420_vm0, %v3070_v53, %v3071_v9  ;;  %v10991_v46 = vsel %vm420_vm0, %v3071_v9, %v10346_v0  ;;  %v3379_v25 = vpack.c.bf16 %v10980_v62, %v10971_v24  ;;  %v10997_v28 = vsel %vm499_vm4, %v3080_v22, %v10353_v2  ;;  %v9575_v9 = vld [vmem:[%s11958_s3 + $0x108] sm:$0xff]   ;;  %v9580_v47 = vld [vmem:[%s11958_s3 + $0x160] sm:$0xff]   ;;  %v9593_v55 = vld [vmem:[%s11958_s3 + $0x190] sm:$0xff]  }
 0x4aa   : > { %v3380_v39 = vpack.c.bf16 %v10991_v46, %v10987_v49  ;;  %v11002_v57 = vsel %vm499_vm4, %v3082_v17, %v3083_v11  ;;  %v11006_v53 = vsel %vm499_vm4, %v3083_v11, %v10353_v2  ;;  %v3381_v0 = vpack.c.bf16 %v10997_v28, %v10984_v32  ;;  %v9581_v26 = vld [vmem:[%s11958_s3 + $0x120] sm:$0xff]   ;;  %v9583_v11 = vld [vmem:[%s11958_s3 + $0x128] sm:$0xff]   ;;  %v9609_v21 = vld [vmem:[%s11958_s3 + $0x210] sm:$0xff]  }
 0x4ab   : > { %8358 = vmatpush3.bf16.msra.mxu0 %v9559_v54  ;;  %v3382_v33 = vpack.c.bf16 %v11006_v53, %v11002_v57  ;;  %v3095_v7 = vrot.slane %v10904_v18, 6  ;;  %v11017_v17 = vsel %vm516_vm5, %v3091_v15, %v3092_v31  ;;  %v11021_v2 = vsel %vm516_vm5, %v3092_v31, %v10360_v10  ;;  %v9574_v54 = vld [vmem:[%s11958_s3 + $0x148] sm:$0xff]   ;;  %v9596_v30 = vld [vmem:[%s11958_s3 + $0x1e0] sm:$0xff]   ;;  %v9610_v16 = vld [vmem:[%s11958_s3 + $0x258] sm:$0xff]  }
 0x4ac   : > { %8359 = vmatprep.subr.bf16.mxu0 %v9560_v20  ;;  %v3383_v13 = vpack.c.bf16 %v11021_v2, %v11017_v17  ;;  %v3107_v52 = vrot.slane %v10904_v18, 7  ;;  %v3103_v23 = vrot.slane %v10862_v60, 7  ;;  %v3104_v4 = vrot.slane %v10891_v3, 7  ;;  %v12010_v60 = vld [vmem:[#allocation12_spill] sm:$0xff]  ;;  %v9576_v20 = vld [vmem:[%s11958_s3 + $0x150] sm:$0xff]   ;;  %v9626_v62 = vld [vmem:[%s11958_s3 + $0x2d8] sm:$0xff]  }
 0x4ad   : > { %v11034_v15 = vsel %vm516_vm5, %v3094_v56, %v3095_v7  ;;  %v11038_v1 = vsel %vm516_vm5, %v3095_v7, %v10360_v10  ;;  %v9563_v10 = vld [vmem:[%s11958_s3 + $0x98] sm:$0xff]   ;;  %v9585_v7 = vld [vmem:[%s11958_s3 + $0x130] sm:$0xff]   ;;  %v9597_v59 = vld [vmem:[%s11958_s3 + $0x1a0] sm:$0xff]  }
 0x4ae   : > { %v3384_v34 = vpack.c.bf16 %v11038_v1, %v11034_v15  ;;  %v11045_v22 = vsel %vm533_vm6, %v3106_v44, %v3107_v52  ;;  %v11049_v3 = vsel %vm533_vm6, %v3107_v52, %v12010_v60  ;;  %v11052_v31 = vsel %vm533_vm6, %v3103_v23, %v3104_v4  ;;  %v9564_v44 = vld [vmem:[%s11958_s3 + $0xe0] sm:$0xff]   ;;  %v9587_v52 = vld [vmem:[%s11958_s3 + $0x138] sm:$0xff]   ;;  %v9625_v24 = vld [vmem:[%s11958_s3 + $0x290] sm:$0xff]  }
 0x4af   : > { %8360 = vmatpush3.bf16.msra.mxu0 %v9561_v58  ;;  %v3386_v56 = vpack.c.bf16 %v11049_v3, %v11045_v22  ;;  %v11061_v5 = vsel %vm533_vm6, %v3104_v4, %v12010_v60  ;;  %v9584_v58 = vld [vmem:[%s11958_s3 + $0x170] sm:$0xff]   ;;  %v9588_v23 = vld [vmem:[%s11958_s3 + $0x1c0] sm:$0xff]   ;;  %v9590_v60 = vld [vmem:[%s11958_s3 + $0x1c8] sm:$0xff]  }
 0x4b0   : > { %8361 = vmatprep.subr.bf16.mxu0 %v9562_v42  ;;  %v3385_v18 = vpack.c.bf16 %v11061_v5, %v11052_v31  ;;  %v9586_v42 = vld [vmem:[%s11958_s3 + $0x178] sm:$0xff]   ;;  %v9589_v4 = vld [vmem:[%s11958_s3 + $0x180] sm:$0xff]   ;;  %v9641_v32 = vld [vmem:[%s11958_s3 + $0x310] sm:$0xff]  }
 0x4b1   : > { %v9612_v49 = vld [vmem:[%s11958_s3 + $0x260] sm:$0xff]   ;;  %v9642_v28 = vld [vmem:[%s11958_s3 + $0x358] sm:$0xff]   ;;  %v9657_v17 = vld [vmem:[%s11958_s3 + $0x390] sm:$0xff]  }
 0x4b2   : > { %v9613_v46 = vld [vmem:[%s11958_s3 + $0x220] sm:$0xff]   ;;  %v9658_v2 = vld [vmem:[%s11958_s3 + $0x3d8] sm:$0xff]   ;;  %v9670_v31 = vld [vmem:[#allocation4 + $0x48] sm:$0xff]  }
 0x4b3   : > { %8362 = vmatpush3.bf16.msra.mxu0 %v9563_v10  ;;  %v9591_v10 = vld [vmem:[%s11958_s3 + $0x188] sm:$0xff]   ;;  %v9628_v57 = vld [vmem:[%s11958_s3 + $0x2e0] sm:$0xff]  }
 0x4b4   : > { %8363 = vmatprep.subr.bf16.mxu0 %v9564_v44  ;;  %v9592_v44 = vld [vmem:[%s11958_s3 + $0x1d0] sm:$0xff]   ;;  %v9629_v53 = vld [vmem:[%s11958_s3 + $0x2a0] sm:$0xff]   ;;  %v9671_v5 = vld [vmem:[#allocation4 + $0x8] sm:$0xff]  }
 0x4b5   : > { %v9644_v15 = vld [vmem:[%s11958_s3 + $0x360] sm:$0xff]  }
 0x4b6   : > { %v9645_v1 = vld [vmem:[%s11958_s3 + $0x320] sm:$0xff]  }
 0x4b7   : > { %8364 = vmatpush3.bf16.msra.mxu0 %v9565_v50  ;;  %v9599_v50 = vld [vmem:[%s11958_s3 + $0x1a8] sm:$0xff]   ;;  %v9660_v22 = vld [vmem:[%s11958_s3 + $0x3e0] sm:$0xff]  }
 0x4b8   : > { %8365 = vmatprep.subr.bf16.mxu0 %v9566_v27  ;;  %v9600_v27 = vld [vmem:[%s11958_s3 + $0x1f0] sm:$0xff]   ;;  %v9661_v3 = vld [vmem:[%s11958_s3 + $0x3a0] sm:$0xff]  }
 0x4bb   : > { %8366 = vmatpush3.bf16.msra.mxu0 %v9567_v51  ;;  %v9601_v51 = vld [vmem:[%s11958_s3 + $0x1b0] sm:$0xff]  }
 0x4bc   : > { %8367 = vmatprep.subr.bf16.mxu0 %v9568_v43  ;;  %v9602_v43 = vld [vmem:[%s11958_s3 + $0x1f8] sm:$0xff]  }
 0x4bf   : > { %8368 = vmatpush3.bf16.msra.mxu0 %v9569_v36  ;;  %v9603_v36 = vld [vmem:[%s11958_s3 + $0x1b8] sm:$0xff]  }
 0x4c0   : > { %8369 = vmatprep.subr.bf16.mxu0 %v9570_v35  ;;  %v9604_v35 = vld [vmem:[%s11958_s3 + $0x240] sm:$0xff]  }
 0x4c3   : > { %8370 = vmatpush3.bf16.msra.mxu0 %v9571_v45  ;;  %v9605_v45 = vld [vmem:[%s11958_s3 + $0x200] sm:$0xff]  }
 0x4c4   : > { %8377 = vmatprep.subr.bf16.mxu0 %v9572_v12  ;;  %v9606_v12 = vld [vmem:[%s11958_s3 + $0x248] sm:$0xff]  }
 0x4c6   : > { %4229 = vmatmul.mubr.bf16.vlgmr.msra.gmra.mrb[12].mxu0 %v3373_v19  ;;  %v9579_v19 = vld [vmem:[%s11958_s3 + $0x118] sm:$0xff]  }
 0x4c7   : > { %8378 = vmatpush3.bf16.msra.mxu0 %v9573_v38  ;;  %4269 = vmatprep.mubr.bf16.mxu0 %v3376_v29  ;;  %v9582_v29 = vld [vmem:[%s11958_s3 + $0x168] sm:$0xff]  }
 0x4c8   : > { %8379 = vmatprep.subr.bf16.mxu0 %v9574_v54  ;;  %v9607_v38 = vld [vmem:[%s11958_s3 + $0x208] sm:$0xff]   ;;  %v9608_v54 = vld [vmem:[%s11958_s3 + $0x250] sm:$0xff]  }
 0x4cb   : > { %8380 = vmatpush3.bf16.msra.mxu0 %v9575_v9  ;;  %v9615_v9 = vld [vmem:[%s11958_s3 + $0x228] sm:$0xff]  }
 0x4cc   : > { %8381 = vmatprep.subr.bf16.mxu0 %v9576_v20  ;;  %v9616_v20 = vld [vmem:[%s11958_s3 + $0x270] sm:$0xff]  }
 0x4cf   : > { %8382 = vmatpush3.bf16.msra.mxu0 %v9577_v40  ;;  %v9617_v40 = vld [vmem:[%s11958_s3 + $0x230] sm:$0xff]  }
 0x4d0   : > { %8383 = vmatprep.subr.bf16.mxu0 %v9578_v37  ;;  %v9618_v37 = vld [vmem:[%s11958_s3 + $0x278] sm:$0xff]  }
 0x4d3   : > { %8384 = vmatpush3.bf16.msra.mxu0 %v9579_v19  ;;  %v9619_v19 = vld [vmem:[%s11958_s3 + $0x238] sm:$0xff]  }
 0x4d4   : > { %8385 = vmatprep.subr.bf16.mxu0 %v9580_v47  ;;  %v9620_v47 = vld [vmem:[%s11958_s3 + $0x2c0] sm:$0xff]  }
 0x4d7   : > { %8386 = vmatpush3.bf16.msra.mxu0 %v9581_v26  ;;  %v9621_v26 = vld [vmem:[%s11958_s3 + $0x280] sm:$0xff]  }
 0x4d8   : > { %8387 = vmatprep.subr.bf16.mxu0 %v9582_v29  ;;  %v9622_v29 = vld [vmem:[%s11958_s3 + $0x2c8] sm:$0xff]  }
 0x4db   : > { %8388 = vmatpush3.bf16.msra.mxu0 %v9583_v11  ;;  %v9623_v11 = vld [vmem:[%s11958_s3 + $0x288] sm:$0xff]  }
 0x4dc   : > { %8389 = vmatprep.subr.bf16.mxu0 %v9584_v58  ;;  %v9624_v58 = vld [vmem:[%s11958_s3 + $0x2d0] sm:$0xff]  }
 0x4df   : > { %8390 = vmatpush3.bf16.msra.mxu0 %v9585_v7  ;;  %v9631_v7 = vld [vmem:[%s11958_s3 + $0x2a8] sm:$0xff]  }
 0x4e0   : > { %8391 = vmatprep.subr.bf16.mxu0 %v9586_v42  ;;  %v9632_v42 = vld [vmem:[%s11958_s3 + $0x2f0] sm:$0xff]  }
 0x4e3   : > { %8392 = vmatpush3.bf16.msra.mxu0 %v9587_v52  ;;  %v9633_v52 = vld [vmem:[%s11958_s3 + $0x2b0] sm:$0xff]  }
 0x4e4   : > { %8399 = vmatprep.subr.bf16.mxu0 %v9588_v23  ;;  %v9634_v23 = vld [vmem:[%s11958_s3 + $0x2f8] sm:$0xff]  }
 0x4e6   : > { %4270 = vmatmul.mubr.bf16.vlgmr.msra.gmra.mrb[16].mxu0 %v3375_v61  ;;  %v9595_v61 = vld [vmem:[%s11958_s3 + $0x198] sm:$0xff]  }
 0x4e7   : > { %8400 = vmatpush3.bf16.msra.mxu0 %v9589_v4  ;;  %4310 = vmatprep.mubr.bf16.mxu0 %v3378_v14  ;;  %v9598_v14 = vld [vmem:[%s11958_s3 + $0x1e8] sm:$0xff]   ;;  %v9635_v4 = vld [vmem:[%s11958_s3 + $0x2b8] sm:$0xff]  }
 0x4e8   : > { %8401 = vmatprep.subr.bf16.mxu0 %v9590_v60  ;;  %v9636_v60 = vld [vmem:[%s11958_s3 + $0x340] sm:$0xff]  }
 0x4eb   : > { %8402 = vmatpush3.bf16.msra.mxu0 %v9591_v10  ;;  %v9637_v10 = vld [vmem:[%s11958_s3 + $0x300] sm:$0xff]  }
 0x4ec   : > { %8403 = vmatprep.subr.bf16.mxu0 %v9592_v44  ;;  %v9638_v44 = vld [vmem:[%s11958_s3 + $0x348] sm:$0xff]  }
 0x4ef   : > { %8404 = vmatpush3.bf16.msra.mxu0 %v9593_v55  ;;  %v9639_v55 = vld [vmem:[%s11958_s3 + $0x308] sm:$0xff]  }
 0x4f0   : > { %8405 = vmatprep.subr.bf16.mxu0 %v9594_v63  ;;  %v9640_v63 = vld [vmem:[%s11958_s3 + $0x350] sm:$0xff]  }
 0x4f3   : > { %8406 = vmatpush3.bf16.msra.mxu0 %v9595_v61  ;;  %v9647_v61 = vld [vmem:[%s11958_s3 + $0x328] sm:$0xff]  }
 0x4f4   : > { %8407 = vmatprep.subr.bf16.mxu0 %v9596_v30  ;;  %v9648_v30 = vld [vmem:[%s11958_s3 + $0x370] sm:$0xff]  }
 0x4f7   : > { %8408 = vmatpush3.bf16.msra.mxu0 %v9597_v59  ;;  %v9649_v59 = vld [vmem:[%s11958_s3 + $0x330] sm:$0xff]  }
 0x4f8   : > { %8409 = vmatprep.subr.bf16.mxu0 %v9598_v14  ;;  %v9650_v14 = vld [vmem:[%s11958_s3 + $0x378] sm:$0xff]  }
 0x4fb   : > { %8410 = vmatpush3.bf16.msra.mxu0 %v9599_v50  ;;  %v9651_v50 = vld [vmem:[%s11958_s3 + $0x338] sm:$0xff]  }
 0x4fc   : > { %8411 = vmatprep.subr.bf16.mxu0 %v9600_v27  ;;  %v9652_v27 = vld [vmem:[%s11958_s3 + $0x3c0] sm:$0xff]  }
 0x4ff   : > { %8412 = vmatpush3.bf16.msra.mxu0 %v9601_v51  ;;  %v9653_v51 = vld [vmem:[%s11958_s3 + $0x380] sm:$0xff]  }
 0x500   : > { %8413 = vmatprep.subr.bf16.mxu0 %v9602_v43  ;;  %v9654_v43 = vld [vmem:[%s11958_s3 + $0x3c8] sm:$0xff]  }
 0x503   : > { %8414 = vmatpush3.bf16.msra.mxu0 %v9603_v36  ;;  %v9655_v36 = vld [vmem:[%s11958_s3 + $0x388] sm:$0xff]  }
 0x504   : > { %8421 = vmatprep.subr.bf16.mxu0 %v9604_v35  ;;  %v9656_v35 = vld [vmem:[%s11958_s3 + $0x3d0] sm:$0xff]  }
 0x506   : > { %4311 = vmatmul.mubr.bf16.vlgmr.msra.gmra.mrb[20].mxu0 %v3377_v6  ;;  %v9611_v6 = vld [vmem:[%s11958_s3 + $0x218] sm:$0xff]  }
 0x507   : > { %8422 = vmatpush3.bf16.msra.mxu0 %v9605_v45  ;;  %4351 = vmatprep.mubr.bf16.mxu0 %v3380_v39  ;;  %v9614_v39 = vld [vmem:[%s11958_s3 + $0x268] sm:$0xff]  }
 0x508   : > { %8423 = vmatprep.subr.bf16.mxu0 %v9606_v12  ;;  %v9663_v45 = vld [vmem:[%s11958_s3 + $0x3a8] sm:$0xff]   ;;  %v9664_v12 = vld [vmem:[%s11958_s3 + $0x3f0] sm:$0xff]  }
 0x50b   : > { %8424 = vmatpush3.bf16.msra.mxu0 %v9607_v38 }
 0x50c   : > { %8425 = vmatprep.subr.bf16.mxu0 %v9608_v54 }
 0x50f   : > { %8426 = vmatpush3.bf16.msra.mxu0 %v9609_v21 }
 0x510   : > { %8427 = vmatprep.subr.bf16.mxu0 %v9610_v16 }
 0x513   : > { %8428 = vmatpush3.bf16.msra.mxu0 %v9611_v6  ;;  %v9665_v6 = vld [vmem:[%s11958_s3 + $0x3b0] sm:$0xff]  }
 0x514   : > { %8429 = vmatprep.subr.bf16.mxu0 %v9612_v49 }
 0x517   : > { %8430 = vmatpush3.bf16.msra.mxu0 %v9613_v46  ;;  %v9666_v46 = vld [vmem:[%s11958_s3 + $0x3f8] sm:$0xff]  }
 0x518   : > { %8431 = vmatprep.subr.bf16.mxu0 %v9614_v39 }
 0x51b   : > { %8432 = vmatpush3.bf16.msra.mxu0 %v9615_v9  ;;  %v9667_v9 = vld [vmem:[%s11958_s3 + $0x3b8] sm:$0xff]  }
 0x51c   : > { %8433 = vmatprep.subr.bf16.mxu0 %v9616_v20 }
 0x51f   : > { %8434 = vmatpush3.bf16.msra.mxu0 %v9617_v40 }
 0x520   : > { %8435 = vmatprep.subr.bf16.mxu0 %v9618_v37 }
 0x523   : > { %8436 = vmatpush3.bf16.msra.mxu0 %v9619_v19 }
 0x524   : > { %8443 = vmatprep.subr.bf16.mxu0 %v9620_v47 }
 0x526   : > { %4352 = vmatmul.mubr.bf16.vlgmr.msra.gmra.mrb[24].mxu0 %v3379_v25  ;;  %v9627_v25 = vld [vmem:[%s11958_s3 + $0x298] sm:$0xff]  }
 0x527   : > { %8444 = vmatpush3.bf16.msra.mxu0 %v9621_v26  ;;  %4392 = vmatprep.mubr.bf16.mxu0 %v3382_v33  ;;  %v9630_v33 = vld [vmem:[%s11958_s3 + $0x2e8] sm:$0xff]  }
 0x528   : > { %8445 = vmatprep.subr.bf16.mxu0 %v9622_v29 }
 0x52b   : > { %8446 = vmatpush3.bf16.msra.mxu0 %v9623_v11 }
 0x52c   : > { %8447 = vmatprep.subr.bf16.mxu0 %v9624_v58 }
 0x52f   : > { %8448 = vmatpush3.bf16.msra.mxu0 %v9625_v24 }
 0x530   : > { %8449 = vmatprep.subr.bf16.mxu0 %v9626_v62 }
 0x533   : > { %8450 = vmatpush3.bf16.msra.mxu0 %v9627_v25 }
 0x534   : > { %8451 = vmatprep.subr.bf16.mxu0 %v9628_v57 }
 0x537   : > { %8452 = vmatpush3.bf16.msra.mxu0 %v9629_v53 }
 0x538   : > { %8453 = vmatprep.subr.bf16.mxu0 %v9630_v33 }
 0x53b   : > { %8454 = vmatpush3.bf16.msra.mxu0 %v9631_v7 }
 0x53c   : > { %8455 = vmatprep.subr.bf16.mxu0 %v9632_v42  ;;  %v9668_v42 = vld [vmem:[#allocation4 + $0x40] sm:$0xff]  }
 0x53f   : > { %8456 = vmatpush3.bf16.msra.mxu0 %v9633_v52  ;;  %v9669_v52 = vld [vmem:[#allocation4] sm:$0xff]  }
 0x540   : > { %8457 = vmatprep.subr.bf16.mxu0 %v9634_v23  ;;  %v9673_v23 = vld [vmem:[#allocation4 + $0x10] sm:$0xff]  }
 0x543   : > { %8458 = vmatpush3.bf16.msra.mxu0 %v9635_v4 }
 0x544   : > { %8465 = vmatprep.subr.bf16.mxu0 %v9636_v60 }
 0x546   : > { %4393 = vmatmul.mubr.bf16.vlgmr.msra.gmra.mrb[28].mxu0 %v3381_v0  ;;  %v9643_v0 = vld [vmem:[%s11958_s3 + $0x318] sm:$0xff]  }
 0x547   : > { %8466 = vmatpush3.bf16.msra.mxu0 %v9637_v10  ;;  %4433 = vmatprep.mubr.bf16.mxu0 %v3384_v34  ;;  %v9646_v34 = vld [vmem:[%s11958_s3 + $0x368] sm:$0xff]  }
 0x548   : > { %8467 = vmatprep.subr.bf16.mxu0 %v9638_v44 }
 0x54b   : > { %8468 = vmatpush3.bf16.msra.mxu0 %v9639_v55 }
 0x54c   : > { %8469 = vmatprep.subr.bf16.mxu0 %v9640_v63 }
 0x54f   : > { %8470 = vmatpush3.bf16.msra.mxu0 %v9641_v32 }
 0x550   : > { %8471 = vmatprep.subr.bf16.mxu0 %v9642_v28 }
 0x553   : > { %8472 = vmatpush3.bf16.msra.mxu0 %v9643_v0  ;;  %v9674_v0 = vld [vmem:[#allocation4 + $0x58] sm:$0xff]  }
 0x554   : > { %8473 = vmatprep.subr.bf16.mxu0 %v9644_v15  ;;  %v9675_v15 = vld [vmem:[#allocation4 + $0x18] sm:$0xff]  }
 0x557   : > { %8474 = vmatpush3.bf16.msra.mxu0 %v9645_v1  ;;  %v9676_v1 = vld [vmem:[#allocation4 + $0x60] sm:$0xff]  }
 0x558   : > { %8475 = vmatprep.subr.bf16.mxu0 %v9646_v34  ;;  %v9677_v34 = vld [vmem:[#allocation4 + $0x20] sm:$0xff]  }
 0x55b   : > { %8476 = vmatpush3.bf16.msra.mxu0 %v9647_v61  ;;  %v9678_v61 = vld [vmem:[#allocation4 + $0x68] sm:$0xff]  }
 0x55c   : > { %8477 = vmatprep.subr.bf16.mxu0 %v9648_v30  ;;  %v9679_v30 = vld [vmem:[#allocation4 + $0x28] sm:$0xff]  }
 0x55f   : > { %8478 = vmatpush3.bf16.msra.mxu0 %v9649_v59  ;;  %v9680_v59 = vld [vmem:[#allocation4 + $0x70] sm:$0xff]  }
 0x560   : > { %8479 = vmatprep.subr.bf16.mxu0 %v9650_v14  ;;  %v9681_v14 = vld [vmem:[#allocation4 + $0x30] sm:$0xff]  }
 0x563   : > { %8480 = vmatpush3.bf16.msra.mxu0 %v9651_v50  ;;  %v9682_v50 = vld [vmem:[#allocation4 + $0x78] sm:$0xff]  }
 0x564   : > { %8487 = vmatprep.subr.bf16.mxu0 %v9652_v27  ;;  %v9683_v27 = vld [vmem:[#allocation4 + $0x38] sm:$0xff]  }
 0x566   : > { %4434 = vmatmul.mubr.bf16.vlgmr.msra.gmra.mrb[32].mxu0 %v3383_v13  ;;  %v9659_v13 = vld [vmem:[%s11958_s3 + $0x398] sm:$0xff]  }
 0x567   : > { %8488 = vmatpush3.bf16.msra.mxu0 %v9653_v51  ;;  %4474 = vmatprep.mubr.bf16.mxu0 %v3386_v56  ;;  %v9662_v56 = vld [vmem:[%s11958_s3 + $0x3e8] sm:$0xff]   ;;  %v9684_v51 = vld [vmem:[#allocation4 + $0xc0] sm:$0xff]  }
 0x568   : > { %8489 = vmatprep.subr.bf16.mxu0 %v9654_v43 }
 0x56b   : > { %8490 = vmatpush3.bf16.msra.mxu0 %v9655_v36 }
 0x56c   : > { %8491 = vmatprep.subr.bf16.mxu0 %v9656_v35 }
 0x56f   : > { %8492 = vmatpush3.bf16.msra.mxu0 %v9657_v17 }
 0x570   : > { %8493 = vmatprep.subr.bf16.mxu0 %v9658_v2 }
 0x573   : > { %8494 = vmatpush3.bf16.msra.mxu0 %v9659_v13 }
 0x574   : > { %8495 = vmatprep.subr.bf16.mxu0 %v9660_v22 }
 0x577   : > { %8496 = vmatpush3.bf16.msra.mxu0 %v9661_v3 }
 0x578   : > { %8497 = vmatprep.subr.bf16.mxu0 %v9662_v56 }
 0x579   : > { %v8349_v38 = vpop.f32.mrb[8].mxu0 }
 0x57a   : > { %v8350_v54 = vpop.f32.mrb[9].mxu0 }
 0x57b   : > { %v8351_v21 = vadd.f32 %v8350_v54, %v8349_v38  ;;  %8498 = vmatpush3.bf16.msra.mxu0 %v9663_v45  ;;  %v8352_v16 = vpop.f32.mrb[10].mxu0 }
 0x57c   : > { %v8353_v49 = vpop.f32.mrb[11].mxu0  ;;  %8499 = vmatprep.subr.bf16.mxu0 %v9664_v12 }
 0x57d   : > { %v8354_v39 = vadd.f32 %v8353_v49, %v8352_v16 }
 0x57f   : > { %8500 = vmatpush3.bf16.msra.mxu0 %v9665_v6 }
 0x580   : > { %8501 = vmatprep.subr.bf16.mxu0 %v9666_v46 }
 0x583   : > { %8502 = vmatpush3.bf16.msra.mxu0 %v9667_v9 }
 0x584   : > { %8509 = vmatprep.subr.bf16.mxu0 %v9668_v42 }
 0x586   : > { %4475 = vmatmul.mubr.bf16.vlgmr.msra.gmra.mrb[36].mxu0 %v3385_v18  ;;  %v9672_v18 = vld [vmem:[#allocation4 + $0x50] sm:$0xff]  }
 0x587   : > { %8510 = vmatpush3.bf16.msra.mxu0 %v9669_v52 }
 0x588   : > { %8511 = vmatprep.subr.bf16.mxu0 %v9670_v31 }
 0x58b   : > { %8512 = vmatpush3.bf16.msra.mxu0 %v9671_v5 }
 0x58c   : > { %8513 = vmatprep.subr.bf16.mxu0 %v9672_v18 }
 0x58f   : > { %8514 = vmatpush3.bf16.msra.mxu0 %v9673_v23 }
 0x590   : > { %8515 = vmatprep.subr.bf16.mxu0 %v9674_v0 }
 0x593   : > { %8516 = vmatpush3.bf16.msra.mxu0 %v9675_v15 }
 0x594   : > { %8517 = vmatprep.subr.bf16.mxu0 %v9676_v1 }
 0x597   : > { %8518 = vmatpush3.bf16.msra.mxu0 %v9677_v34 }
 0x598   : > { %8519 = vmatprep.subr.bf16.mxu0 %v9678_v61 }
 0x599   : > { %v8371_v20 = vpop.f32.mrb[12].mxu0 }
 0x59a   : > { %v8372_v40 = vpop.f32.mrb[13].mxu0 }
 0x59b   : > { %v8373_v37 = vadd.f32 %v8372_v40, %v8371_v20  ;;  %v8374_v19 = vpop.f32.mrb[14].mxu0  ;;  %8520 = vmatpush3.bf16.msra.mxu0 %v9679_v30 }
 0x59c   : > { %v8375_v47 = vpop.f32.mrb[15].mxu0  ;;  %8521 = vmatprep.subr.bf16.mxu0 %v9680_v59 }
 0x59d   : > { %v4231_v26 = vadd.f32 %v8373_v37, %v8351_v21  ;;  %v8376_v29 = vadd.f32 %v8375_v47, %v8374_v19 }
 0x59f   : > { %v4234_v11 = vadd.f32 %v8376_v29, %v8354_v39  ;;  %8522 = vmatpush3.bf16.msra.mxu0 %v9681_v14 }
 0x5a0   : > { %8523 = vmatprep.subr.bf16.mxu0 %v9682_v50 }
 0x5a3   : > { %8524 = vmatpush3.bf16.msra.mxu0 %v9683_v27 }
 0x5a4   : > { %8531 = vmatprep.subr.bf16.mxu0 %v9684_v51 }
 0x5b9   : > { %v8393_v58 = vpop.f32.mrb[16].mxu0 }
 0x5ba   : > { %v8394_v24 = vpop.f32.mrb[17].mxu0 }
 0x5bb   : > { %v8395_v62 = vadd.f32 %v8394_v24, %v8393_v58  ;;  %v8396_v25 = vpop.f32.mrb[18].mxu0  ;;  %v4483_v58 = vld [vmem:[%s11964_s9 + $0x2] ss:$0 sm:$0xff] }
 0x5bc   : > { %v8397_v57 = vpop.f32.mrb[19].mxu0 }
 0x5bd   : > { %v4272_v53 = vadd.f32 %v8395_v62, %v4231_v26  ;;  %v8398_v33 = vadd.f32 %v8397_v57, %v8396_v25 }
 0x5bf   : > { %v4275_v7 = vadd.f32 %v8398_v33, %v4234_v11 }
 0x5d9   : > { %v8415_v4 = vpop.f32.mrb[20].mxu0 }
 0x5da   : > { %v8416_v60 = vpop.f32.mrb[21].mxu0 }
 0x5db   : > { %v8417_v10 = vadd.f32 %v8416_v60, %v8415_v4  ;;  %v8418_v44 = vpop.f32.mrb[22].mxu0 }
 0x5dc   : > { %v8419_v55 = vpop.f32.mrb[23].mxu0 }
 0x5dd   : > { %v4313_v63 = vadd.f32 %v8417_v10, %v4272_v53  ;;  %v8420_v32 = vadd.f32 %v8419_v55, %v8418_v44 }
 0x5df   : > { %v4316_v28 = vadd.f32 %v8420_v32, %v4275_v7 }
 0x5f9   : > { %v8437_v43 = vpop.f32.mrb[24].mxu0 }
 0x5fa   : > { %v8438_v36 = vpop.f32.mrb[25].mxu0 }
 0x5fb   : > { %v8439_v35 = vadd.f32 %v8438_v36, %v8437_v43  ;;  %v8440_v17 = vpop.f32.mrb[26].mxu0 }
 0x5fc   : > { %v8441_v2 = vpop.f32.mrb[27].mxu0 }
 0x5fd   : > { %v4354_v13 = vadd.f32 %v8439_v35, %v4313_v63  ;;  %v8442_v22 = vadd.f32 %v8441_v2, %v8440_v17  ;;  %v9685_v17 = vld [vmem:[#allocation4 + $0x80] sm:$0xff]  }
 0x5ff   : > { %v4357_v3 = vadd.f32 %v8442_v22, %v4316_v28 }
 0x619   : > { %v8459_v56 = vpop.f32.mrb[28].mxu0 }
 0x61a   : > { %v8460_v45 = vpop.f32.mrb[29].mxu0 }
 0x61b   : > { %v8461_v12 = vadd.f32 %v8460_v45, %v8459_v56  ;;  %v8462_v38 = vpop.f32.mrb[30].mxu0  ;;  %v9686_v56 = vld [vmem:[#allocation4 + $0xc8] sm:$0xff]  }
 0x61c   : > { %v8463_v54 = vpop.f32.mrb[31].mxu0 }
 0x61d   : > { %v4395_v21 = vadd.f32 %v8461_v12, %v4354_v13  ;;  %v8464_v16 = vadd.f32 %v8463_v54, %v8462_v38 }
 0x61f   : > { %v4398_v6 = vadd.f32 %v8464_v16, %v4357_v3 }
 0x639   : > { %v8481_v49 = vpop.f32.mrb[32].mxu0 }
 0x63a   : > { %v8482_v46 = vpop.f32.mrb[33].mxu0 }
 0x63b   : > { %v8483_v39 = vadd.f32 %v8482_v46, %v8481_v49  ;;  %v8484_v9 = vpop.f32.mrb[34].mxu0 }
 0x63c   : > { %v8485_v20 = vpop.f32.mrb[35].mxu0 }
 0x63d   : > { %v4436_v40 = vadd.f32 %v8483_v39, %v4395_v21  ;;  %v8486_v37 = vadd.f32 %v8485_v20, %v8484_v9  ;;  %v9687_v20 = vld [vmem:[#allocation4 + $0x88] sm:$0xff]  }
 0x63f   : > { %v4439_v19 = vadd.f32 %v8486_v37, %v4398_v6 }
 0x659   : > { %v8503_v47 = vpop.f32.mrb[36].mxu0 }
 0x65a   : > { %v8504_v26 = vpop.f32.mrb[37].mxu0 }
 0x65b   : > { %v8505_v29 = vadd.f32 %v8504_v26, %v8503_v47  ;;  %v8506_v11 = vpop.f32.mrb[38].mxu0  ;;  %v9688_v47 = vld [vmem:[#allocation4 + $0xd0] sm:$0xff]  }
 0x65c   : > { %v8507_v24 = vpop.f32.mrb[39].mxu0 }
 0x65d   : > { %v4477_v62 = vadd.f32 %v8505_v29, %v4436_v40  ;;  %v8508_v25 = vadd.f32 %v8507_v24, %v8506_v11 }
 0x65f   : > { %v4484_v57 = vadd.f32 %v4483_v58, %v4477_v62  ;;  %v4480_v53 = vadd.f32 %v8508_v25, %v4439_v19  ;;  %v9689_v62 = vld [vmem:[#allocation4 + $0x90] sm:$0xff]   ;;  %v9690_v25 = vld [vmem:[#allocation4 + $0xd8] sm:$0xff]  }
 0x661   : > { %vm4486_vm8 = vcmp.gt.f32.partialorder %v4484_v57, 0.0  ;;  %v4488_v33 = vmul.f32 0.01, %v4484_v57  ;;  %v4485_v7 = vadd.f32 %v4483_v58, %v4480_v53  ;;  %v9692_v53 = vld [vmem:[#allocation4 + $0xe0] sm:$0xff]  }
 0x663   : > { %v4490_v42 = vsel %vm4486_vm8, %v4484_v57, %v4488_v33  ;;  %vm4487_vm9 = vcmp.gt.f32.partialorder %v4485_v7, 0.0  ;;  %v4489_v52 = vmul.f32 0.01, %v4485_v7  ;;  %v9691_v57 = vld [vmem:[#allocation4 + $0x98] sm:$0xff]   ;;  %v9693_v33 = vld [vmem:[#allocation4 + $0xa0] sm:$0xff]   ;;  %vm6007_vm8 = vcmp.lt.s32.totalorder %v10402_v41, 6 }
 0x664   : > { %v4498_v31 = vrot.slane %v4490_v42, 4  ;;  %v9695_v42 = vld [vmem:[#allocation4 + $0xa8] sm:$0xff]  }
 0x665   : > { %v4491_v5 = vsel %vm4487_vm9, %v4485_v7, %v4489_v52  ;;  %v9694_v7 = vld [vmem:[#allocation4 + $0xe8] sm:$0xff]   ;;  %v9696_v52 = vld [vmem:[#allocation4 + $0xf0] sm:$0xff]   ;;  %vm6052_vm9 = vcmask 523264  }
 0x666   : > { %v4504_v18 = vsel %vm420_vm0, 0.0, %v4498_v31  ;;  %v4495_v23 = vsel %vm4493_vm10, %v4491_v5, 0.0  ;;  %v9698_v5 = vld [vmem:[#allocation4 + $0xf8] sm:$0xff]  }
 0x667   : > { %v4499_v4 = vrot.slane %v4495_v23, 4  ;;  %v4508_v60 = vrot.slane %v4504_v18, 1  ;;  %v4522_v10 = vrot.slane %v4504_v18, 3  ;;  %v4515_v44 = vrot.slane %v4504_v18, 2  ;;  %v9700_v23 = vld [vmem:[#allocation4 + $0x140] sm:$0xff]  }
 0x668   : > { %v4536_v55 = vrot.slane %v4504_v18, 5  ;;  %v4529_v28 = vrot.slane %v4504_v18, 4  ;;  %v4550_v0 = vrot.slane %v4504_v18, 7  ;;  %v4543_v46 = vrot.slane %v4504_v18, 6  ;;  %v9699_v18 = vld [vmem:[#allocation4 + $0xb8] sm:$0xff]  }
 0x669   : > { %v4500_v63 = vsel %vm420_vm0, %v4498_v31, %v4499_v4  ;;  %v4505_v32 = vsel %vm420_vm0, %v4499_v4, 0.0  ;;  %v9701_v4 = vld [vmem:[#allocation4 + $0x100] sm:$0xff]  }
 0x66a   : > { %v4509_v15 = vrot.slane %v4500_v63, 1  ;;  %v4511_v1 = vrot.slane %v4505_v32, 1  ;;  %v8147_v34 = vpack.c.bf16 %v4500_v63, %v4498_v31  ;;  %v4523_v61 = vrot.slane %v4500_v63, 3  ;;  %v9697_v31 = vld [vmem:[#allocation4 + $0xb0] sm:$0xff]  }
 0x66b   : > { %v4525_v30 = vrot.slane %v4505_v32, 3  ;;  %v4516_v59 = vrot.slane %v4500_v63, 2  ;;  %v4518_v14 = vrot.slane %v4505_v32, 2  ;;  %v4537_v50 = vrot.slane %v4500_v63, 5 }
 0x66c   : > { %v4510_v27 = vsel %vm432_vm1, %v4508_v60, %v4509_v15  ;;  %v4512_v51 = vsel %vm432_vm1, %v4509_v15, %v4511_v1  ;;  %v4524_v43 = vsel %vm466_vm2, %v4522_v10, %v4523_v61  ;;  %v4539_v36 = vrot.slane %v4505_v32, 5  ;;  %v9702_v60 = vld [vmem:[#allocation4 + $0x148] sm:$0xff]  }
 0x66d   : > { %v4686_v35 = vpack.c.bf16 %v4512_v51, %v4510_v27  ;;  %v4526_v2 = vsel %vm466_vm2, %v4523_v61, %v4525_v30  ;;  %v4517_v13 = vsel %vm449_vm3, %v4515_v44, %v4516_v59  ;;  %v4519_v22 = vsel %vm449_vm3, %v4516_v59, %v4518_v14  ;;  %v9703_v10 = vld [vmem:[#allocation4 + $0x108] sm:$0xff]   ;;  %v9704_v44 = vld [vmem:[#allocation4 + $0x150] sm:$0xff]   ;;  %v9714_v30 = vld [vmem:[#allocation4 + $0x178] sm:$0xff]  }
 0x66e   : > { %v4688_v3 = vpack.c.bf16 %v4526_v2, %v4524_v43  ;;  %v4687_v45 = vpack.c.bf16 %v4519_v22, %v4517_v13  ;;  %v4538_v12 = vsel %vm499_vm4, %v4536_v55, %v4537_v50  ;;  %v4540_v38 = vsel %vm499_vm4, %v4537_v50, %v4539_v36  ;;  %v9705_v55 = vld [vmem:[#allocation4 + $0x110] sm:$0xff]   ;;  %v9710_v15 = vld [vmem:[#allocation4 + $0x168] sm:$0xff]   ;;  %v9715_v59 = vld [vmem:[#allocation4 + $0x138] sm:$0xff]  }
 0x66f   : > { %5109 = vmatprep.mubr.bf16.mxu0 %v4686_v35  ;;  %v4690_v54 = vpack.c.bf16 %v4540_v38, %v4538_v12  ;;  %v4530_v21 = vrot.slane %v4500_v63, 4  ;;  %v4532_v16 = vrot.slane %v4505_v32, 4  ;;  %v4551_v6 = vrot.slane %v4500_v63, 7  ;;  %v9711_v1 = vld [vmem:[#allocation4 + $0x128] sm:$0xff]   ;;  %v9713_v61 = vld [vmem:[#allocation4 + $0x130] sm:$0xff]   ;;  %v9716_v14 = vld [vmem:[#allocation4 + $0x1c0] sm:$0xff]  }
 0x670   : > { %8148 = vmatmul.mubr.msk.bf16.vlgmr.msra.gmra.mrb[40].mxu0 %vm10444_vm13, %v8147_v34  ;;  %v4553_v49 = vrot.slane %v4505_v32, 7  ;;  %v4544_v39 = vrot.slane %v4500_v63, 6  ;;  %v4546_v9 = vrot.slane %v4505_v32, 6  ;;  %v9706_v63 = vld [vmem:[#allocation4 + $0x158] sm:$0xff]   ;;  %v9712_v34 = vld [vmem:[#allocation4 + $0x170] sm:$0xff]   ;;  %v9717_v50 = vld [vmem:[#allocation4 + $0x180] sm:$0xff]  }
 0x671   : > { %8532 = vmatpush3.bf16.msra.mxu0 %v9685_v17  ;;  %5150 = vmatprep.mubr.bf16.mxu0 %v4688_v3  ;;  %v11434_v40 = vsel %vm420_vm0, %v4529_v28, %v4530_v21  ;;  %v11437_v37 = vsel %vm420_vm0, %v4530_v21, %v4532_v16  ;;  %v11440_v19 = vsel %vm533_vm6, %v4550_v0, %v4551_v6  ;;  %v9707_v32 = vld [vmem:[#allocation4 + $0x118] sm:$0xff]   ;;  %v9708_v28 = vld [vmem:[#allocation4 + $0x160] sm:$0xff]   ;;  %v9718_v27 = vld [vmem:[#allocation4 + $0x1c8] sm:$0xff]  }
 0x672   : > { %8533 = vmatprep.subr.bf16.mxu0 %v9686_v56  ;;  %v4689_v8 = vpack.c.bf16 %v11437_v37, %v11434_v40  ;;  %v11445_v26 = vsel %vm533_vm6, %v4551_v6, %v4553_v49  ;;  %v11448_v29 = vsel %vm516_vm5, %v4543_v46, %v4544_v39  ;;  %v11451_v11 = vsel %vm516_vm5, %v4544_v39, %v4546_v9  ;;  %v9709_v0 = vld [vmem:[#allocation4 + $0x120] sm:$0xff]   ;;  %v9719_v51 = vld [vmem:[#allocation4 + $0x188] sm:$0xff]   ;;  %v9720_v43 = vld [vmem:[#allocation4 + $0x1d0] sm:$0xff]  }
 0x673   : > { %v4692_v58 = vpack.c.bf16 %v11445_v26, %v11440_v19  ;;  %v4691_v24 = vpack.c.bf16 %v11451_v11, %v11448_v29  ;;  %v9721_v36 = vld [vmem:[#allocation4 + $0x190] sm:$0xff]   ;;  %v9722_v35 = vld [vmem:[#allocation4 + $0x1d8] sm:$0xff]   ;;  %v9724_v2 = vld [vmem:[#allocation4 + $0x1e0] sm:$0xff]  }
 0x674   : > { %v9723_v17 = vld [vmem:[#allocation4 + $0x198] sm:$0xff]   ;;  %v9725_v13 = vld [vmem:[#allocation4 + $0x1a0] sm:$0xff]   ;;  %v9726_v22 = vld [vmem:[#allocation4 + $0x1e8] sm:$0xff]  }
 0x675   : > { %8534 = vmatpush3.bf16.msra.mxu0 %v9687_v20  ;;  %v9727_v3 = vld [vmem:[#allocation4 + $0x1a8] sm:$0xff]   ;;  %v9728_v56 = vld [vmem:[#allocation4 + $0x1f0] sm:$0xff]   ;;  %v9730_v12 = vld [vmem:[#allocation4 + $0x1f8] sm:$0xff]  }
 0x676   : > { %8535 = vmatprep.subr.bf16.mxu0 %v9688_v47  ;;  %v9731_v38 = vld [vmem:[#allocation4 + $0x1b8] sm:$0xff]   ;;  %v9733_v21 = vld [vmem:[%s11960_s5] sm:$0xff]   ;;  %v9734_v16 = vld [vmem:[%s11960_s5 + $0x48] sm:$0xff]  }
 0x677   : > { %v9735_v6 = vld [vmem:[%s11960_s5 + $0x8] sm:$0xff]   ;;  %v9736_v49 = vld [vmem:[%s11960_s5 + $0x50] sm:$0xff]   ;;  %v9738_v39 = vld [vmem:[%s11960_s5 + $0x58] sm:$0xff]  }
 0x678   : > { %v9737_v46 = vld [vmem:[%s11960_s5 + $0x10] sm:$0xff]   ;;  %v9739_v20 = vld [vmem:[%s11960_s5 + $0x18] sm:$0xff]   ;;  %v9740_v37 = vld [vmem:[%s11960_s5 + $0x60] sm:$0xff]  }
 0x679   : > { %8536 = vmatpush3.bf16.msra.mxu0 %v9689_v62  ;;  %v9741_v29 = vld [vmem:[%s11960_s5 + $0x20] sm:$0xff]   ;;  %v9742_v11 = vld [vmem:[%s11960_s5 + $0x68] sm:$0xff]   ;;  %v9745_v62 = vld [vmem:[%s11960_s5 + $0x30] sm:$0xff]  }
 0x67a   : > { %8537 = vmatprep.subr.bf16.mxu0 %v9690_v25  ;;  %v9746_v25 = vld [vmem:[%s11960_s5 + $0x78] sm:$0xff]  }
 0x67d   : > { %8538 = vmatpush3.bf16.msra.mxu0 %v9691_v57  ;;  %v9747_v57 = vld [vmem:[%s11960_s5 + $0x38] sm:$0xff]  }
 0x67e   : > { %8539 = vmatprep.subr.bf16.mxu0 %v9692_v53  ;;  %v9748_v53 = vld [vmem:[%s11960_s5 + $0xc0] sm:$0xff]  }
 0x681   : > { %8540 = vmatpush3.bf16.msra.mxu0 %v9693_v33 }
 0x682   : > { %8541 = vmatprep.subr.bf16.mxu0 %v9694_v7 }
 0x685   : > { %8542 = vmatpush3.bf16.msra.mxu0 %v9695_v42 }
 0x686   : > { %8543 = vmatprep.subr.bf16.mxu0 %v9696_v52 }
 0x689   : > { %8544 = vmatpush3.bf16.msra.mxu0 %v9697_v31 }
 0x68a   : > { %8545 = vmatprep.subr.bf16.mxu0 %v9698_v5 }
 0x68d   : > { %8546 = vmatpush3.bf16.msra.mxu0 %v9699_v18 }
 0x68e   : > { %8553 = vmatprep.subr.bf16.mxu0 %v9700_v23 }
 0x690   : > { %5151 = vmatmul.mubr.bf16.vlgmr.msra.gmra.mrb[44].mxu0 %v4687_v45  ;;  %v9729_v45 = vld [vmem:[#allocation4 + $0x1b0] sm:$0xff]  }
 0x691   : > { %8554 = vmatpush3.bf16.msra.mxu0 %v9701_v4  ;;  %5191 = vmatprep.mubr.bf16.mxu0 %v4690_v54  ;;  %v9732_v54 = vld [vmem:[%s11960_s5 + $0x40] sm:$0xff]  }
 0x692   : > { %8555 = vmatprep.subr.bf16.mxu0 %v9702_v60 }
 0x695   : > { %8556 = vmatpush3.bf16.msra.mxu0 %v9703_v10 }
 0x696   : > { %8557 = vmatprep.subr.bf16.mxu0 %v9704_v44 }
 0x699   : > { %8558 = vmatpush3.bf16.msra.mxu0 %v9705_v55 }
 0x69a   : > { %8559 = vmatprep.subr.bf16.mxu0 %v9706_v63 }
 0x69d   : > { %8560 = vmatpush3.bf16.msra.mxu0 %v9707_v32 }
 0x69e   : > { %8561 = vmatprep.subr.bf16.mxu0 %v9708_v28 }
 0x6a1   : > { %8562 = vmatpush3.bf16.msra.mxu0 %v9709_v0 }
 0x6a2   : > { %8563 = vmatprep.subr.bf16.mxu0 %v9710_v15 }
 0x6a5   : > { %8564 = vmatpush3.bf16.msra.mxu0 %v9711_v1 }
 0x6a6   : > { %8565 = vmatprep.subr.bf16.mxu0 %v9712_v34 }
 0x6a9   : > { %8566 = vmatpush3.bf16.msra.mxu0 %v9713_v61  ;;  %v5241_v61 = vld [vmem:[%s11964_s9 + $0x3] ss:$0 sm:$0xff] }
 0x6aa   : > { %8567 = vmatprep.subr.bf16.mxu0 %v9714_v30 }
 0x6ad   : > { %8568 = vmatpush3.bf16.msra.mxu0 %v9715_v59 }
 0x6ae   : > { %8575 = vmatprep.subr.bf16.mxu0 %v9716_v14 }
 0x6b0   : > { %5192 = vmatmul.mubr.bf16.vlgmr.msra.gmra.mrb[48].mxu0 %v4689_v8 }
 0x6b1   : > { %8576 = vmatpush3.bf16.msra.mxu0 %v9717_v50  ;;  %5232 = vmatprep.mubr.bf16.mxu0 %v4692_v58  ;;  %v9743_v58 = vld [vmem:[%s11960_s5 + $0x28] sm:$0xff]  }
 0x6b2   : > { %8577 = vmatprep.subr.bf16.mxu0 %v9718_v27 }
 0x6b5   : > { %8578 = vmatpush3.bf16.msra.mxu0 %v9719_v51 }
 0x6b6   : > { %8579 = vmatprep.subr.bf16.mxu0 %v9720_v43 }
 0x6b9   : > { %8580 = vmatpush3.bf16.msra.mxu0 %v9721_v36 }
 0x6ba   : > { %8581 = vmatprep.subr.bf16.mxu0 %v9722_v35 }
 0x6bd   : > { %8582 = vmatpush3.bf16.msra.mxu0 %v9723_v17 }
 0x6be   : > { %8583 = vmatprep.subr.bf16.mxu0 %v9724_v2 }
 0x6c1   : > { %8584 = vmatpush3.bf16.msra.mxu0 %v9725_v13 }
 0x6c2   : > { %8585 = vmatprep.subr.bf16.mxu0 %v9726_v22 }
 0x6c5   : > { %8586 = vmatpush3.bf16.msra.mxu0 %v9727_v3 }
 0x6c6   : > { %8587 = vmatprep.subr.bf16.mxu0 %v9728_v56 }
 0x6c9   : > { %8588 = vmatpush3.bf16.msra.mxu0 %v9729_v45 }
 0x6ca   : > { %8589 = vmatprep.subr.bf16.mxu0 %v9730_v12 }
 0x6cd   : > { %8590 = vmatpush3.bf16.msra.mxu0 %v9731_v38 }
 0x6ce   : > { %8597 = vmatprep.subr.bf16.mxu0 %v9732_v54 }
 0x6d0   : > { %5233 = vmatmul.mubr.bf16.vlgmr.msra.gmra.mrb[52].mxu0 %v4691_v24  ;;  %v9744_v24 = vld [vmem:[%s11960_s5 + $0x70] sm:$0xff]  }
 0x6d1   : > { %8598 = vmatpush3.bf16.msra.mxu0 %v9733_v21 }
 0x6d2   : > { %8599 = vmatprep.subr.bf16.mxu0 %v9734_v16 }
 0x6d5   : > { %8600 = vmatpush3.bf16.msra.mxu0 %v9735_v6 }
 0x6d6   : > { %8601 = vmatprep.subr.bf16.mxu0 %v9736_v49 }
 0x6d9   : > { %8602 = vmatpush3.bf16.msra.mxu0 %v9737_v46 }
 0x6da   : > { %8603 = vmatprep.subr.bf16.mxu0 %v9738_v39 }
 0x6dd   : > { %8604 = vmatpush3.bf16.msra.mxu0 %v9739_v20 }
 0x6de   : > { %8605 = vmatprep.subr.bf16.mxu0 %v9740_v37 }
 0x6e1   : > { %8606 = vmatpush3.bf16.msra.mxu0 %v9741_v29 }
 0x6e2   : > { %8607 = vmatprep.subr.bf16.mxu0 %v9742_v11 }
 0x6e5   : > { %8608 = vmatpush3.bf16.msra.mxu0 %v9743_v58 }
 0x6e6   : > { %8609 = vmatprep.subr.bf16.mxu0 %v9744_v24 }
 0x6e9   : > { %8610 = vmatpush3.bf16.msra.mxu0 %v9745_v62 }
 0x6ea   : > { %8611 = vmatprep.subr.bf16.mxu0 %v9746_v25 }
 0x6ed   : > { %8612 = vmatpush3.bf16.msra.mxu0 %v9747_v57 }
 0x6ee   : > { %8619 = vmatprep.subr.bf16.mxu0 %v9748_v53 }
 0x743   : > { %v8525_v9 = vpop.f32.mrb[40].mxu0 }
 0x744   : > { %v8526_v40 = vpop.f32.mrb[41].mxu0 }
 0x745   : > { %v8527_v19 = vadd.f32 %v8526_v40, %v8525_v9  ;;  %v8528_v47 = vpop.f32.mrb[42].mxu0 }
 0x746   : > { %v8529_v8 = vpop.f32.mrb[43].mxu0 }
 0x747   : > { %v8530_v26 = vadd.f32 %v8529_v8, %v8528_v47 }
 0x763   : > { %v8547_v33 = vpop.f32.mrb[44].mxu0 }
 0x764   : > { %v8548_v7 = vpop.f32.mrb[45].mxu0 }
 0x765   : > { %v8549_v42 = vadd.f32 %v8548_v7, %v8547_v33  ;;  %v8550_v52 = vpop.f32.mrb[46].mxu0  ;;  %v9749_v7 = vld [vmem:[%s11960_s5 + $0x80] sm:$0xff]   ;;  %v9792_v33 = vld [vmem:[%s11960_s5 + $0x1f0] sm:$0xff]  }
 0x766   : > { %v8551_v31 = vpop.f32.mrb[47].mxu0 }
 0x767   : > { %v5153_v5 = vadd.f32 %v8549_v42, %v8527_v19  ;;  %v8552_v18 = vadd.f32 %v8551_v31, %v8550_v52  ;;  %v9750_v52 = vld [vmem:[%s11960_s5 + $0xc8] sm:$0xff]  }
 0x769   : > { %v5156_v23 = vadd.f32 %v8552_v18, %v8530_v26 }
 0x783   : > { %v8569_v4 = vpop.f32.mrb[48].mxu0 }
 0x784   : > { %v8570_v60 = vpop.f32.mrb[49].mxu0 }
 0x785   : > { %v8571_v10 = vadd.f32 %v8570_v60, %v8569_v4  ;;  %v8572_v44 = vpop.f32.mrb[50].mxu0 }
 0x786   : > { %v8573_v55 = vpop.f32.mrb[51].mxu0 }
 0x787   : > { %v5194_v63 = vadd.f32 %v8571_v10, %v5153_v5  ;;  %v8574_v32 = vadd.f32 %v8573_v55, %v8572_v44  ;;  %v9751_v10 = vld [vmem:[%s11960_s5 + $0x88] sm:$0xff]  }
 0x789   : > { %v5197_v28 = vadd.f32 %v8574_v32, %v5156_v23  ;;  %v9753_v32 = vld [vmem:[%s11960_s5 + $0x90] sm:$0xff]  }
 0x7a3   : > { %v8591_v0 = vpop.f32.mrb[52].mxu0 }
 0x7a4   : > { %v8592_v15 = vpop.f32.mrb[53].mxu0 }
 0x7a5   : > { %v8593_v1 = vadd.f32 %v8592_v15, %v8591_v0  ;;  %v8594_v34 = vpop.f32.mrb[54].mxu0  ;;  %v9755_v0 = vld [vmem:[%s11960_s5 + $0x98] sm:$0xff]   ;;  %v9756_v15 = vld [vmem:[%s11960_s5 + $0xe0] sm:$0xff]  }
 0x7a6   : > { %v8595_v30 = vpop.f32.mrb[55].mxu0 }
 0x7a7   : > { %v5235_v59 = vadd.f32 %v8593_v1, %v5194_v63  ;;  %v8596_v14 = vadd.f32 %v8595_v30, %v8594_v34  ;;  %v9752_v63 = vld [vmem:[%s11960_s5 + $0xd0] sm:$0xff]   ;;  %v9757_v1 = vld [vmem:[%s11960_s5 + $0xa0] sm:$0xff]   ;;  %v9758_v34 = vld [vmem:[%s11960_s5 + $0xe8] sm:$0xff]  }
 0x7a8   : > { %v9760_v30 = vld [vmem:[%s11960_s5 + $0xf0] sm:$0xff]  }
 0x7a9   : > { %v5242_v50 = vadd.f32 %v5241_v61, %v5235_v59  ;;  %v5238_v27 = vadd.f32 %v8596_v14, %v5197_v28  ;;  %v9754_v28 = vld [vmem:[%s11960_s5 + $0xd8] sm:$0xff]   ;;  %v9761_v59 = vld [vmem:[%s11960_s5 + $0xb0] sm:$0xff]  }
 0x7aa   : > { %v9762_v14 = vld [vmem:[%s11960_s5 + $0xf8] sm:$0xff]  }
 0x7ab   : > { %vm5244_vm13 = vcmp.gt.f32.partialorder %v5242_v50, 0.0  ;;  %v5246_v51 = vmul.f32 0.01, %v5242_v50  ;;  %v5243_v43 = vadd.f32 %v5241_v61, %v5238_v27  ;;  %v9759_v61 = vld [vmem:[%s11960_s5 + $0xa8] sm:$0xff]  }
 0x7ad   : > { %v5248_v36 = vsel %vm5244_vm13, %v5242_v50, %v5246_v51  ;;  %vm5245_vm12 = vcmp.gt.f32.partialorder %v5243_v43, 0.0  ;;  %v5247_v35 = vmul.f32 0.01, %v5243_v43 }
 0x7ae   : > { %v5255_v17 = vrot.slane %v5248_v36, 1 }
 0x7af   : > { %v5249_v2 = vsel %vm5245_vm12, %v5243_v43, %v5247_v35  ;;  %v9764_v35 = vld [vmem:[%s11960_s5 + $0x140] sm:$0xff]  }
 0x7b0   : > { %v5257_v13 = vmax.f32 %v5248_v36, %v5255_v17  ;;  %v5253_v22 = vsel %vm5251_vm14, %v5249_v2, 0.0  ;;  %v9763_v36 = vld [vmem:[%s11960_s5 + $0xb8] sm:$0xff]  }
 0x7b1   : > { %v5259_v3 = vrot.slane %v5253_v22, 1 }
 0x7b2   : > { %v5263_v56 = vrot.slane %v5257_v13, 1  ;;  %v5265_v45 = vrot.slane %v5257_v13, 2  ;;  %v5267_v38 = vrot.slane %v5257_v13, 3 }
 0x7b3   : > { %v5261_v12 = vmax.f32 %v5253_v22, %v5259_v3  ;;  %v9766_v3 = vld [vmem:[%s11960_s5 + $0x148] sm:$0xff]  }
 0x7b4   : > { %v5278_v54 = vsel %vm533_vm6, %v5257_v13, %v5263_v56  ;;  %v9765_v13 = vld [vmem:[%s11960_s5 + $0x100] sm:$0xff]  }
 0x7b5   : > { %v5279_v21 = vsel %vm516_vm5, %v5278_v54, %v5265_v45  ;;  %v5270_v16 = vrot.slane %v5261_v12, 4  ;;  %v5272_v6 = vrot.slane %v5261_v12, 5  ;;  %v5274_v46 = vrot.slane %v5261_v12, 6  ;;  %v9767_v45 = vld [vmem:[%s11960_s5 + $0x108] sm:$0xff]   ;;  %v9770_v54 = vld [vmem:[%s11960_s5 + $0x158] sm:$0xff]  }
 0x7b6   : > { %v5280_v49 = vsel %vm499_vm4, %v5279_v21, %v5267_v38  ;;  %v5276_v39 = vrot.slane %v5261_v12, 7  ;;  %v9768_v12 = vld [vmem:[%s11960_s5 + $0x150] sm:$0xff]   ;;  %v9771_v21 = vld [vmem:[%s11960_s5 + $0x118] sm:$0xff]  }
 0x7b7   : > { %v5281_v48 = vsel %vm420_vm0, %v5280_v49, %v5270_v16  ;;  %v9769_v38 = vld [vmem:[%s11960_s5 + $0x110] sm:$0xff]   ;;  %v9772_v16 = vld [vmem:[%s11960_s5 + $0x160] sm:$0xff]   ;;  %v9774_v49 = vld [vmem:[%s11960_s5 + $0x168] sm:$0xff]  }
 0x7b8   : > { %v5282_v9 = vsel %vm466_vm2, %v5281_v48, %v5272_v6  ;;  %v9773_v6 = vld [vmem:[%s11960_s5 + $0x120] sm:$0xff]   ;;  %v9776_v48 = vld [vmem:[%s11960_s5 + $0x170] sm:$0xff]  }
 0x7b9   : > { %v5283_v20 = vsel %vm449_vm3, %v5282_v9, %v5274_v46  ;;  %v9775_v46 = vld [vmem:[%s11960_s5 + $0x128] sm:$0xff]   ;;  %v9778_v9 = vld [vmem:[%s11960_s5 + $0x178] sm:$0xff]  }
 0x7ba   : > { %v5284_v40 = vsel %vm432_vm1, %v5283_v20, %v5276_v39  ;;  %v9777_v39 = vld [vmem:[%s11960_s5 + $0x130] sm:$0xff]   ;;  %v9779_v20 = vld [vmem:[%s11960_s5 + $0x138] sm:$0xff]  }
 0x7bb   : > { %v5286_v37 = vsel %vm5285_vm15, %v5284_v40, 0.0  ;;  %v9780_v40 = vld [vmem:[%s11960_s5 + $0x1c0] sm:$0xff]  }
 0x7bc   : > { %v5288_v19 = vrot.slane %v5286_v37, 4  ;;  %v9781_v37 = vld [vmem:[%s11960_s5 + $0x180] sm:$0xff]  }
 0x7be   : > { %v5290_v47 = vsel %vm420_vm0, 0.0, %v5288_v19  ;;  %v5291_v8 = vsel %vm420_vm0, %v5288_v19, 0.0  ;;  %v8216_v42 = vpack.c.bf16 %v5288_v19, %v5288_v19 }
 0x7bf   : > { %v5294_v26 = vrot.slane %v5290_v47, 1  ;;  %v5295_v29 = vrot.slane %v5291_v8, 1  ;;  %v5302_v11 = vrot.slane %v5290_v47, 3  ;;  %v5303_v58 = vrot.slane %v5291_v8, 3 }
 0x7c0   : > { %v5306_v25 = vrot.slane %v5290_v47, 4  ;;  %v5307_v57 = vrot.slane %v5291_v8, 4  ;;  %v5318_v5 = vrot.slane %v5290_v47, 7  ;;  %v5319_v23 = vrot.slane %v5291_v8, 7 }
 0x7c1   : > { %v5296_v24 = vsel %vm432_vm1, %v5294_v26, %v5295_v29  ;;  %v5304_v62 = vsel %vm466_vm2, %v5302_v11, %v5303_v58  ;;  %v5314_v4 = vrot.slane %v5290_v47, 6  ;;  %v5315_v60 = vrot.slane %v5291_v8, 6  ;;  %v9783_v26 = vld [vmem:[%s11960_s5 + $0x188] sm:$0xff]   ;;  %v9784_v29 = vld [vmem:[%s11960_s5 + $0x1d0] sm:$0xff]   ;;  %v9786_v58 = vld [vmem:[%s11960_s5 + $0x1d8] sm:$0xff]  }
 0x7c2   : > { %v5451_v53 = vpack.c.bf16 %v5296_v24, %v5296_v24  ;;  %v11543_v31 = vsel %vm420_vm0, %v5306_v25, %v5307_v57  ;;  %v5453_v18 = vpack.c.bf16 %v5304_v62, %v5304_v62  ;;  %v11549_v44 = vsel %vm533_vm6, %v5318_v5, %v5319_v23  ;;  %v9785_v11 = vld [vmem:[%s11960_s5 + $0x190] sm:$0xff]   ;;  %v9787_v24 = vld [vmem:[%s11960_s5 + $0x198] sm:$0xff]   ;;  %v9788_v62 = vld [vmem:[%s11960_s5 + $0x1e0] sm:$0xff]  }
 0x7c3   : > { %v11552_v55 = vsel %vm516_vm5, %v5314_v4, %v5315_v60  ;;  %v5298_v50 = vrot.slane %v5290_v47, 2  ;;  %v5299_v27 = vrot.slane %v5291_v8, 2  ;;  %v5310_v51 = vrot.slane %v5290_v47, 5  ;;  %v9782_v47 = vld [vmem:[%s11960_s5 + $0x1c8] sm:$0xff]   ;;  %v9789_v25 = vld [vmem:[%s11960_s5 + $0x1a0] sm:$0xff]  }
 0x7c4   : > { %5874 = vmatprep.mubr.bf16.mxu0 %v5451_v53  ;;  %v5311_v43 = vrot.slane %v5291_v8, 5  ;;  %v5454_v19 = vpack.c.bf16 %v11543_v31, %v11543_v31  ;;  %v5457_v8 = vpack.c.bf16 %v11549_v44, %v11549_v44  ;;  %v9790_v57 = vld [vmem:[%s11960_s5 + $0x1e8] sm:$0xff]   ;;  %v5456_v31 = vpack.c.bf16 %v11552_v55, %v11552_v55  ;;  %v9796_v5 = vld [vmem:[%s11961_s6 + $0x40] sm:$0xff]  }
 0x7c5   : > { %8217 = vmatmul.mubr.msk.bf16.vlgmr.msra.gmra.mrb[56].mxu0 %vm8215_vm7, %v8216_v42  ;;  %v5300_v17 = vsel %vm449_vm3, %v5298_v50, %v5299_v27  ;;  %v9791_v53 = vld [vmem:[%s11960_s5 + $0x1a8] sm:$0xff]   ;;  %v9794_v42 = vld [vmem:[%s11960_s5 + $0x1f8] sm:$0xff]   ;;  %v9798_v23 = vld [vmem:[%s11961_s6] sm:$0xff]   ;;  %8685 = vmatprep.subr.bf16.mxu1 %v9796_v5 }
 0x7c6   : > { %8620 = vmatpush3.bf16.msra.mxu0 %v9749_v7  ;;  %5914 = vmatprep.mubr.bf16.mxu0 %v5453_v18  ;;  %v5312_v2 = vsel %vm499_vm4, %v5310_v51, %v5311_v43  ;;  %v5452_v22 = vpack.c.bf16 %v5300_v17, %v5300_v17  ;;  %v9793_v7 = vld [vmem:[%s11960_s5 + $0x1b0] sm:$0xff]   ;;  %v9797_v18 = vld [vmem:[%s11961_s6 + $0xc0] sm:$0xff]   ;;  %v9800_v60 = vld [vmem:[%s11961_s6 + $0x48] sm:$0xff]  }
 0x7c7   : > { %8621 = vmatprep.subr.bf16.mxu0 %v9750_v52  ;;  %v5455_v56 = vpack.c.bf16 %v5312_v2, %v5312_v2  ;;  %v9795_v52 = vld [vmem:[%s11960_s5 + $0x1b8] sm:$0xff]   ;;  %v9799_v4 = vld [vmem:[%s11961_s6 + $0x80] sm:$0xff]   ;;  %8686 = vmatpush3.bf16.msra.mxu1 %v9798_v23  ;;  %v9802_v44 = vld [vmem:[%s11961_s6 + $0x8] sm:$0xff]  }
 0x7c8   : > { %v9803_v55 = vld [vmem:[%s11961_s6 + $0x88] sm:$0xff]   ;;  %8687 = vmatprep.subr.bf16.mxu1 %v9800_v60  ;;  %v9813_v50 = vld [vmem:[%s11961_s6 + $0xe0] sm:$0xff]   ;;  %v12012_v60 = vmov 0.0  }
 0x7c9   : > { %v9816_v17 = vld [vmem:[%s11961_s6 + $0x68] sm:$0xff]  }
 0x7ca   : > { %8622 = vmatpush3.bf16.msra.mxu0 %v9751_v10  ;;  %v9801_v10 = vld [vmem:[%s11961_s6 + $0xc8] sm:$0xff]  }
 0x7cb   : > { %8623 = vmatprep.subr.bf16.mxu0 %v9752_v63  ;;  %v9804_v63 = vld [vmem:[%s11961_s6 + $0x50] sm:$0xff]   ;;  %8688 = vmatpush3.bf16.msra.mxu1 %v9802_v44  ;;  %v9817_v2 = vld [vmem:[%s11961_s6 + $0xe8] sm:$0xff]  }
 0x7cc   : > { %8689 = vmatprep.subr.bf16.mxu1 %v9804_v63 }
 0x7ce   : > { %8624 = vmatpush3.bf16.msra.mxu0 %v9753_v32  ;;  %v9805_v32 = vld [vmem:[%s11961_s6 + $0xd0] sm:$0xff]  }
 0x7cf   : > { %8625 = vmatprep.subr.bf16.mxu0 %v9754_v28  ;;  %v9806_v28 = vld [vmem:[%s11961_s6 + $0x10] sm:$0xff]  }
 0x7d0   : > { %8690 = vmatpush3.bf16.msra.mxu1 %v9806_v28 }
 0x7d2   : > { %8626 = vmatpush3.bf16.msra.mxu0 %v9755_v0  ;;  %v9807_v0 = vld [vmem:[%s11961_s6 + $0x90] sm:$0xff]  }
 0x7d3   : > { %8627 = vmatprep.subr.bf16.mxu0 %v9756_v15  ;;  %v9808_v15 = vld [vmem:[%s11961_s6 + $0x58] sm:$0xff]  }
 0x7d4   : > { %8691 = vmatprep.subr.bf16.mxu1 %v9808_v15 }
 0x7d6   : > { %8628 = vmatpush3.bf16.msra.mxu0 %v9757_v1  ;;  %v9809_v1 = vld [vmem:[%s11961_s6 + $0xd8] sm:$0xff]  }
 0x7d7   : > { %8629 = vmatprep.subr.bf16.mxu0 %v9758_v34 }
 0x7da   : > { %8630 = vmatpush3.bf16.msra.mxu0 %v9759_v61  ;;  %v9810_v61 = vld [vmem:[%s11961_s6 + $0x18] sm:$0xff]  }
 0x7db   : > { %8631 = vmatprep.subr.bf16.mxu0 %v9760_v30  ;;  %v9811_v30 = vld [vmem:[%s11961_s6 + $0x98] sm:$0xff]   ;;  %8692 = vmatpush3.bf16.msra.mxu1 %v9810_v61 }
 0x7de   : > { %8632 = vmatpush3.bf16.msra.mxu0 %v9761_v59 }
 0x7df   : > { %8633 = vmatprep.subr.bf16.mxu0 %v9762_v14  ;;  %v9812_v14 = vld [vmem:[%s11961_s6 + $0x60] sm:$0xff]  }
 0x7e0   : > { %8693 = vmatprep.subr.bf16.mxu1 %v9812_v14 }
 0x7e2   : > { %8634 = vmatpush3.bf16.msra.mxu0 %v9763_v36  ;;  %v9814_v36 = vld [vmem:[%s11961_s6 + $0x20] sm:$0xff]  }
 0x7e3   : > { %8641 = vmatprep.subr.bf16.mxu0 %v9764_v35  ;;  %v9815_v35 = vld [vmem:[%s11961_s6 + $0xa0] sm:$0xff]   ;;  %8694 = vmatpush3.bf16.msra.mxu1 %v9814_v36 }
 0x7e4   : > { %8695 = vmatprep.subr.bf16.mxu1 %v9816_v17 }
 0x7e5   : > { %5915 = vmatmul.mubr.bf16.vlgmr.msra.gmra.mrb[60].mxu0 %v5452_v22  ;;  %v9819_v22 = vld [vmem:[%s11961_s6 + $0xa8] sm:$0xff]  }
 0x7e6   : > { %8642 = vmatpush3.bf16.msra.mxu0 %v9765_v13  ;;  %5954 = vmatprep.mubr.bf16.mxu0 %v5455_v56  ;;  %v9818_v13 = vld [vmem:[%s11961_s6 + $0x28] sm:$0xff]   ;;  %v9821_v56 = vld [vmem:[%s11961_s6 + $0xf0] sm:$0xff]  }
 0x7e7   : > { %8643 = vmatprep.subr.bf16.mxu0 %v9766_v3  ;;  %v9820_v3 = vld [vmem:[%s11961_s6 + $0x70] sm:$0xff]   ;;  %8696 = vmatpush3.bf16.msra.mxu1 %v9818_v13 }
 0x7e8   : > { %8697 = vmatprep.subr.bf16.mxu1 %v9820_v3 }
 0x7ea   : > { %8644 = vmatpush3.bf16.msra.mxu0 %v9767_v45  ;;  %v9822_v45 = vld [vmem:[%s11961_s6 + $0x30] sm:$0xff]  }
 0x7eb   : > { %8645 = vmatprep.subr.bf16.mxu0 %v9768_v12  ;;  %v9823_v12 = vld [vmem:[%s11961_s6 + $0xb0] sm:$0xff]   ;;  %8698 = vmatpush3.bf16.msra.mxu1 %v9822_v45 }
 0x7ee   : > { %8646 = vmatpush3.bf16.msra.mxu0 %v9769_v38 }
 0x7ef   : > { %8647 = vmatprep.subr.bf16.mxu0 %v9770_v54 }
 0x7f2   : > { %8648 = vmatpush3.bf16.msra.mxu0 %v9771_v21 }
 0x7f3   : > { %8649 = vmatprep.subr.bf16.mxu0 %v9772_v16 }
 0x7f6   : > { %8650 = vmatpush3.bf16.msra.mxu0 %v9773_v6 }
 0x7f7   : > { %8651 = vmatprep.subr.bf16.mxu0 %v9774_v49 }
 0x7fa   : > { %8652 = vmatpush3.bf16.msra.mxu0 %v9775_v46 }
 0x7fb   : > { %8653 = vmatprep.subr.bf16.mxu0 %v9776_v48 }
 0x7fe   : > { %8654 = vmatpush3.bf16.msra.mxu0 %v9777_v39 }
 0x7ff   : > { %8655 = vmatprep.subr.bf16.mxu0 %v9778_v9 }
 0x802   : > { %8656 = vmatpush3.bf16.msra.mxu0 %v9779_v20 }
 0x803   : > { %8663 = vmatprep.subr.bf16.mxu0 %v9780_v40 }
 0x805   : > { %5955 = vmatmul.mubr.bf16.vlgmr.msra.gmra.mrb[64].mxu0 %v5454_v19 }
 0x806   : > { %8664 = vmatpush3.bf16.msra.mxu0 %v9781_v37  ;;  %5994 = vmatprep.mubr.bf16.mxu0 %v5457_v8 }
 0x807   : > { %8665 = vmatprep.subr.bf16.mxu0 %v9782_v47 }
 0x80a   : > { %8666 = vmatpush3.bf16.msra.mxu0 %v9783_v26  ;;  %v6002_v26 = vld [vmem:[%s11964_s9 + $0x4] ss:$0 sm:$0xff] }
 0x80b   : > { %8667 = vmatprep.subr.bf16.mxu0 %v9784_v29 }
 0x80e   : > { %8668 = vmatpush3.bf16.msra.mxu0 %v9785_v11 }
 0x80f   : > { %8669 = vmatprep.subr.bf16.mxu0 %v9786_v58 }
 0x812   : > { %8670 = vmatpush3.bf16.msra.mxu0 %v9787_v24 }
 0x813   : > { %8671 = vmatprep.subr.bf16.mxu0 %v9788_v62 }
 0x816   : > { %8672 = vmatpush3.bf16.msra.mxu0 %v9789_v25 }
 0x817   : > { %8673 = vmatprep.subr.bf16.mxu0 %v9790_v57  ;;  %v9824_v57 = vld [vmem:[%s11961_s6 + $0x78] sm:$0xff]  }
 0x818   : > { %8699 = vmatprep.subr.bf16.mxu1 %v9824_v57 }
 0x81a   : > { %8674 = vmatpush3.bf16.msra.mxu0 %v9791_v53  ;;  %v9825_v53 = vld [vmem:[%s11961_s6 + $0xf8] sm:$0xff]  }
 0x81b   : > { %8675 = vmatprep.subr.bf16.mxu0 %v9792_v33  ;;  %v9826_v33 = vld [vmem:[%s11961_s6 + $0x38] sm:$0xff]  }
 0x81c   : > { %8700 = vmatpush3.bf16.msra.mxu1 %v9826_v33 }
 0x81d   : > { %8838 = vmatprep.subr.bf16.mxu1 %v12012_v60 }
 0x81e   : > { %8676 = vmatpush3.bf16.msra.mxu0 %v9793_v7 }
 0x81f   : > { %8677 = vmatprep.subr.bf16.mxu0 %v9794_v42  ;;  %v9827_v42 = vld [vmem:[%s11961_s6 + $0xb8] sm:$0xff]  }
 0x822   : > { %8678 = vmatpush3.bf16.msra.mxu0 %v9795_v52 }
 0x823   : > { %8707 = vmatprep.subr.bf16.mxu0 %v9797_v18 }
 0x825   : > { %5995 = vmatmul.mubr.bf16.vlgmr.msra.gmra.mrb[68].mxu0 %v5456_v31 }
 0x826   : > { %8708 = vmatpush3.bf16.msra.mxu0 %v9799_v4 }
 0x827   : > { %8709 = vmatprep.subr.bf16.mxu0 %v9801_v10 }
 0x82a   : > { %8710 = vmatpush3.bf16.msra.mxu0 %v9803_v55 }
 0x82b   : > { %8711 = vmatprep.subr.bf16.mxu0 %v9805_v32 }
 0x82e   : > { %8712 = vmatpush3.bf16.msra.mxu0 %v9807_v0 }
 0x82f   : > { %8713 = vmatprep.subr.bf16.mxu0 %v9809_v1 }
 0x832   : > { %8714 = vmatpush3.bf16.msra.mxu0 %v9811_v30 }
 0x833   : > { %8715 = vmatprep.subr.bf16.mxu0 %v9813_v50 }
 0x836   : > { %8716 = vmatpush3.bf16.msra.mxu0 %v9815_v35 }
 0x837   : > { %8717 = vmatprep.subr.bf16.mxu0 %v9817_v2 }
 0x83a   : > { %8718 = vmatpush3.bf16.msra.mxu0 %v9819_v22 }
 0x83b   : > { %8719 = vmatprep.subr.bf16.mxu0 %v9821_v56 }
 0x83e   : > { %8720 = vmatpush3.bf16.msra.mxu0 %v9823_v12 }
 0x83f   : > { %8721 = vmatprep.subr.bf16.mxu0 %v9825_v53 }
 0x842   : > { %8722 = vmatpush3.bf16.msra.mxu0 %v9827_v42 }
 0x843   : > { %8814 = vmatprep.subr.bf16.mxu0 %v12012_v60 }
 0x898   : > { %v8613_v34 = vpop.f32.mrb[56].mxu0 }
 0x899   : > { %v8614_v59 = vpop.f32.mrb[57].mxu0 }
 0x89a   : > { %v8615_v27 = vadd.f32 %v8614_v59, %v8613_v34  ;;  %v8616_v51 = vpop.f32.mrb[58].mxu0 }
 0x89b   : > { %v8617_v43 = vpop.f32.mrb[59].mxu0 }
 0x8b8   : > { %v8635_v38 = vpop.f32.mrb[60].mxu0 }
 0x8b9   : > { %v8636_v54 = vpop.f32.mrb[61].mxu0 }
 0x8ba   : > { %v8637_v21 = vadd.f32 %v8636_v54, %v8635_v38  ;;  %v8638_v16 = vpop.f32.mrb[62].mxu0 }
 0x8bb   : > { %v8639_v6 = vpop.f32.mrb[63].mxu0 }
 0x8bc   : > { %v5917_v49 = vadd.f32 %v8637_v21, %v8615_v27 }
 0x8d8   : > { %v8657_v46 = vpop.f32.mrb[64].mxu0 }
 0x8d9   : > { %v8658_v48 = vpop.f32.mrb[65].mxu0 }
 0x8da   : > { %v8659_v39 = vadd.f32 %v8658_v48, %v8657_v46  ;;  %v8660_v9 = vpop.f32.mrb[66].mxu0  ;;  %v9829_v46 = vld [vmem:[#allocation6 + $0x40] sm:$0xff]   ;;  %v9830_v48 = vld [vmem:[#allocation6 + $0x28] sm:$0xff]  }
 0x8db   : > { %v8661_v20 = vpop.f32.mrb[67].mxu0  ;;  %v9832_v9 = vld [vmem:[#allocation6 + $0x30] sm:$0xff]  }
 0x8dc   : > { %v5957_v40 = vadd.f32 %v8659_v39, %v5917_v49  ;;  %v9828_v49 = vld [vmem:[#allocation6 + $0x20] sm:$0xff]   ;;  %v9831_v39 = vld [vmem:[#allocation6 + $0x48] sm:$0xff]   ;;  %v9833_v20 = vld [vmem:[#allocation6 + $0x50] sm:$0xff]  }
 0x8f8   : > { %v8679_v37 = vpop.f32.mrb[68].mxu0 }
 0x8f9   : > { %v8680_v19 = vpop.f32.mrb[69].mxu0 }
 0x8fa   : > { %v8681_v47 = vadd.f32 %v8680_v19, %v8679_v37  ;;  %v8682_v8 = vpop.f32.mrb[70].mxu0  ;;  %v9835_v37 = vld [vmem:[#allocation6 + $0x58] sm:$0xff]  }
 0x8fb   : > { %v8683_v29 = vpop.f32.mrb[71].mxu0 }
 0x8fc   : > { %v5997_v11 = vadd.f32 %v8681_v47, %v5957_v40  ;;  %v9834_v40 = vld [vmem:[#allocation6 + $0x38] sm:$0xff]  }
 0x8fe   : > { %v6003_v58 = vadd.f32 %v6002_v26, %v5997_v11 }
 0x900   : > { %vm6004_vm11 = vcmp.gt.f32.partialorder %v6003_v58, 0.0  ;;  %v6005_v24 = vmul.f32 0.01, %v6003_v58 }
 0x902   : > { %v6006_v62 = vsel %vm6004_vm11, %v6003_v58, %v6005_v24 }
 0x903   : > { %v6008_v25 = vsel %vm6007_vm8, %v6006_v62, 0.0  ;;  %v6397_v62 = vld [vmem:[%s11964_s9 + $0x5] ss:$0 sm:$0xff] }
 0x904   : > { %v6010_v7 = vrot.slane %v6008_v25, 4 }
 0x906   : > { %v6012_v52 = vsel %vm420_vm0, 0.0, %v6010_v7  ;;  %v6013_v31 = vsel %vm420_vm0, %v6010_v7, 0.0 }
 0x907   : > { %v6026_v5 = vrot.slane %v6012_v52, 3  ;;  %v6027_v18 = vrot.slane %v6013_v31, 3  ;;  %v6046_v23 = vrot.slane %v6012_v52, 7  ;;  %v6047_v4 = vrot.slane %v6013_v31, 7 }
 0x908   : > { %v6016_v10 = vrot.slane %v6012_v52, 1  ;;  %v6017_v44 = vrot.slane %v6013_v31, 1  ;;  %v6036_v55 = vrot.slane %v6012_v52, 5  ;;  %v6037_v63 = vrot.slane %v6013_v31, 5 }
 0x909   : > { %v6028_v32 = vsel %vm466_vm2, %v6026_v5, %v6027_v18  ;;  %v6048_v28 = vsel %vm533_vm6, %v6046_v23, %v6047_v4  ;;  %v6022_v61 = vrot.slane %v6012_v52, 2  ;;  %v6023_v30 = vrot.slane %v6013_v31, 2  ;;  %v9836_v5 = vld [vmem:[#allocation6] sm:$0xff]  }
 0x90a   : > { %v9138_v0 = vpack.i.bf16 %v6048_v28, %v6028_v32  ;;  %v6018_v15 = vsel %vm432_vm1, %v6016_v10, %v6017_v44  ;;  %v6038_v1 = vsel %vm499_vm4, %v6036_v55, %v6037_v63  ;;  %v6042_v59 = vrot.slane %v6012_v52, 6  ;;  %v9837_v18 = vld [vmem:[#allocation6 + $0x80] sm:$0xff]   ;;  %v9838_v10 = vld [vmem:[#allocation6 + $0x8] sm:$0xff]   ;;  %v9840_v44 = vld [vmem:[#allocation6 + $0x10] sm:$0xff]  }
 0x90b   : > { %v9143_v34 = vpack.i.bf16 %v6038_v1, %v6018_v15  ;;  %v6043_v14 = vrot.slane %v6013_v31, 6  ;;  %v6032_v50 = vrot.slane %v6012_v52, 4  ;;  %v6033_v27 = vrot.slane %v6013_v31, 4  ;;  %v9841_v55 = vld [vmem:[#allocation6 + $0x90] sm:$0xff]   ;;  %v9842_v63 = vld [vmem:[#allocation6 + $0x18] sm:$0xff]   ;;  %v9844_v28 = vld [vmem:[#allocation6 + $0x60] sm:$0xff]  }
 0x90c   : > { %9139 = vrot.lane.b32.xlu0 %v9138_v0, %s10050_s26  ;;  %v6024_v13 = vsel %vm449_vm3, %v6022_v61, %v6023_v30  ;;  %vm6402_vm2 = vcmp.lt.s32.totalorder %v10402_v41, 7  ;;  %v9839_v41 = vld [vmem:[#allocation6 + $0x88] sm:$0xff]   ;;  %v9843_v32 = vld [vmem:[#allocation6 + $0x98] sm:$0xff]   ;;  %v9845_v0 = vld [vmem:[#allocation6 + $0xc0] sm:$0xff]  }
 0x90d   : > { %9144 = vrot.lane.b32.xlu1 %v9143_v34, %s10050_s26  ;;  %v6044_v22 = vsel %vm516_vm5, %v6042_v59, %v6043_v14  ;;  %v6034_v3 = vsel %vm420_vm0, %v6032_v50, %v6033_v27  ;;  %vm10051_vm0 = vmmov 0   ;;  %v9846_v1 = vld [vmem:[#allocation6 + $0x68] sm:$0xff]   ;;  %v9848_v61 = vld [vmem:[#allocation6 + $0x70] sm:$0xff]   ;;  %v9850_v59 = vld [vmem:[#allocation6 + $0x78] sm:$0xff]  }
 0x90e   : > { %v9847_v34 = vld [vmem:[#allocation6 + $0xc8] sm:$0xff]   ;;  %v9849_v30 = vld [vmem:[#allocation6 + $0xd0] sm:$0xff]   ;;  %v9851_v14 = vld [vmem:[#allocation6 + $0xd8] sm:$0xff]  }
 0x90f   : > { %v9852_v50 = vld [vmem:[#allocation6 + $0xa0] sm:$0xff]  }
 0x97e   : > { %v9140_v51 = vpop.permute.xlu0 %9139 }
 0x97f   : > { %v9142_v43 = vunpack.i.h.bf16 %v9140_v51  ;;  %v9141_v36 = vunpack.i.l.bf16 %v9140_v51  ;;  %v9145_v35 = vpop.permute.xlu1 %9144 }
 0x980   : > { %v9147_v17 = vunpack.i.h.bf16 %v9145_v35  ;;  %v9146_v2 = vunpack.i.l.bf16 %v9145_v35  ;;  %v9855_v35 = vld [vmem:[#allocation6 + $0xb8] sm:$0xff]  }
 0x981   : > { %v6054_v56 = vsel %vm6052_vm9, %v6024_v13, %v9141_v36  ;;  %v6056_v45 = vsel %vm6052_vm9, %v6044_v22, %v9142_v43  ;;  %v9853_v43 = vld [vmem:[#allocation6 + $0xa8] sm:$0xff]   ;;  %v9854_v36 = vld [vmem:[#allocation6 + $0xb0] sm:$0xff]  }
 0x982   : > { %v6055_v12 = vsel %vm6052_vm9, %v6034_v3, %v9147_v17  ;;  %v6053_v38 = vsel %vm6052_vm9, %v6012_v52, %v9146_v2  ;;  %v6122_v54 = vpack.c.bf16 %v6054_v56, %v6054_v56  ;;  %v6124_v21 = vpack.c.bf16 %v6056_v45, %v6056_v45  ;;  %v9856_v17 = vld [vmem:[#allocation6 + $0xe0] sm:$0xff]   ;;  %v9857_v13 = vld [vmem:[#allocation6 + $0xe8] sm:$0xff]   ;;  %v9858_v22 = vld [vmem:[#allocation6 + $0xf0] sm:$0xff]  }
 0x983   : > { %v6123_v16 = vpack.c.bf16 %v6055_v12, %v6055_v12  ;;  %v6121_v6 = vpack.c.bf16 %v6053_v38, %v6053_v38  ;;  %v9859_v3 = vld [vmem:[#allocation6 + $0xf8] sm:$0xff]   ;;  %v9860_v45 = vld [vmem:[#allocation7] sm:$0xff]   ;;  %v9861_v12 = vld [vmem:[#allocation7 + $0x8] sm:$0xff]  }
 0x984   : > { %6349 = vmatprep.mubr.bf16.mxu1 %v6122_v54  ;;  %6389 = vmatprep.mubr.bf16.mxu0 %v6124_v21  ;;  %v9862_v38 = vld [vmem:[#allocation7 + $0x10] sm:$0xff]   ;;  %v9863_v54 = vld [vmem:[#allocation7 + $0x18] sm:$0xff]   ;;  %v9864_v21 = vld [vmem:[#allocation7 + $0x20] sm:$0xff]  }
 0x985   : > { %6350 = vmatmul.mubr.bf16.vlgmr.msra.gmra.mrb[36].mxu1 %v6121_v6  ;;  %6390 = vmatmul.mubr.bf16.vlgmr.msra.gmra.mrb[72].mxu0 %v6123_v16  ;;  %v9865_v16 = vld [vmem:[#allocation7 + $0x28] sm:$0xff]   ;;  %v9866_v6 = vld [vmem:[#allocation7 + $0x30] sm:$0xff]  }
 0x986   : > { %8815 = vmatpush3.bf16.msra.mxu0 %v9828_v49  ;;  %8839 = vmatpush3.bf16.msra.mxu1 %v9829_v46  ;;  %v9867_v49 = vld [vmem:[#allocation7 + $0x38] sm:$0xff]   ;;  %v9868_v46 = vld [vmem:[#allocation7 + $0x40] sm:$0xff]  }
 0x987   : > { %8816 = vmatprep.subr.bf16.mxu0 %v12012_v60  ;;  %8840 = vmatprep.subr.bf16.mxu1 %v12012_v60 }
 0x988   : > { %8822 = vmatprep.mubr.msk.bf16.mxu0 %vm10051_vm0, %v12012_v60  ;;  %8846 = vmatprep.mubr.msk.bf16.mxu1 %vm10051_vm0, %v12012_v60 }
 0x98a   : > { %8817 = vmatpush3.bf16.msra.mxu0 %v9830_v48  ;;  %8841 = vmatpush3.bf16.msra.mxu1 %v9831_v39  ;;  %v9869_v48 = vld [vmem:[#allocation7 + $0x48] sm:$0xff]   ;;  %v9870_v39 = vld [vmem:[#allocation7 + $0x50] sm:$0xff]  }
 0x98b   : > { %8818 = vmatprep.subr.bf16.mxu0 %v12012_v60  ;;  %8842 = vmatprep.subr.bf16.mxu1 %v12012_v60 }
 0x98e   : > { %8819 = vmatpush3.bf16.msra.mxu0 %v9832_v9  ;;  %8843 = vmatpush3.bf16.msra.mxu1 %v9833_v20  ;;  %v9871_v9 = vld [vmem:[#allocation7 + $0x58] sm:$0xff]   ;;  %v9872_v20 = vld [vmem:[#allocation7 + $0x60] sm:$0xff]  }
 0x98f   : > { %8820 = vmatprep.subr.bf16.mxu0 %v12012_v60  ;;  %8844 = vmatprep.subr.bf16.mxu1 %v12012_v60 }
 0x992   : > { %8821 = vmatpush3.bf16.msra.mxu0 %v9834_v40  ;;  %8845 = vmatpush3.bf16.msra.mxu1 %v9835_v37  ;;  %v9873_v40 = vld [vmem:[#allocation7 + $0x68] sm:$0xff]  }
 0x993   : > { %8826 = vmatprep.subr.bf16.mxu0 %v12012_v60  ;;  %8862 = vmatprep.subr.bf16.mxu1 %v12012_v60 }
 0xa58   : > { %v8701_v19 = vpop.f32.mrb[36].mxu1  ;;  %v8723_v47 = vpop.f32.mrb[72].mxu0 }
 0xa59   : > { %v8702_v8 = vpop.f32.mrb[37].mxu1  ;;  %v8724_v26 = vpop.f32.mrb[73].mxu0 }
 0xa5a   : > { %v8703_v29 = vadd.f32 %v8702_v8, %v8701_v19  ;;  %v8725_v11 = vadd.f32 %v8724_v26, %v8723_v47  ;;  %v8704_v58 = vpop.f32.mrb[38].mxu1  ;;  %v8726_v24 = vpop.f32.mrb[74].mxu0 }
 0xa5b   : > { %v8705_v25 = vpop.f32.mrb[39].mxu1  ;;  %v8727_v57 = vpop.f32.mrb[75].mxu0 }
 0xa5c   : > { %v6392_v53 = vadd.f32 %v8725_v11, %v8703_v29 }
 0xa5e   : > { %v6398_v33 = vadd.f32 %v6397_v62, %v6392_v53 }
 0xa60   : > { %vm6399_vm1 = vcmp.gt.f32.partialorder %v6398_v33, 0.0  ;;  %v6400_v7 = vmul.f32 0.01, %v6398_v33 }
 0xa62   : > { %v6401_v42 = vsel %vm6399_vm1, %v6398_v33, %v6400_v7 }
 0xa63   : > { %v6403_v52 = vsel %vm6402_vm2, %v6401_v42, 0.0 }
 0xa64   : > { %v11825_v31 = vpack.c.bf16 %v6403_v52, %v6403_v52 }
 0xa66   : > { %v11828_v23 = vshrl.u32 %v11825_v31, 16  ;;  %v6566_v4 = vrot.slane %v11825_v31, 1  ;;  %v6720_v15 = vrot.slane %v11825_v31, 2  ;;  %v6874_v51 = vrot.slane %v11825_v31, 3 }
 0xa68   : > { %8823 = vmatmul.mubr.msk.bf16.vlgmr.msra.gmra.mrb[76].mxu0 %vm6052_vm9, %v11828_v23  ;;  %8847 = vmatmul.mubr.msk.bf16.vlgmr.msra.gmra.mrb[40].mxu1 %vm6052_vm9, %v6566_v4  ;;  %v6643_v27 = vrot.slane %v11828_v23, 1  ;;  %v6797_v2 = vrot.slane %v11828_v23, 2  ;;  %v6951_v56 = vrot.slane %v11828_v23, 3 }
 0xa69   : > { %8827 = vmatpush3.bf16.msra.mxu0 %v9836_v5  ;;  %8863 = vmatpush3.bf16.msra.mxu1 %v9837_v18 }
 0xa6a   : > { %8828 = vmatprep.subr.bf16.mxu0 %v12012_v60  ;;  %8864 = vmatprep.subr.bf16.mxu1 %v12012_v60 }
 0xa6b   : > { %8834 = vmatprep.mubr.msk.bf16.mxu0 %vm10051_vm0, %v12012_v60  ;;  %8870 = vmatprep.mubr.msk.bf16.mxu1 %vm10051_vm0, %v12012_v60 }
 0xa6d   : > { %8829 = vmatpush3.bf16.msra.mxu0 %v9838_v10  ;;  %8865 = vmatpush3.bf16.msra.mxu1 %v9839_v41 }
 0xa6e   : > { %8830 = vmatprep.subr.bf16.mxu0 %v12012_v60  ;;  %8866 = vmatprep.subr.bf16.mxu1 %v12012_v60 }
 0xa71   : > { %8831 = vmatpush3.bf16.msra.mxu0 %v9840_v44  ;;  %8867 = vmatpush3.bf16.msra.mxu1 %v9841_v55 }
 0xa72   : > { %8832 = vmatprep.subr.bf16.mxu0 %v12012_v60  ;;  %8868 = vmatprep.subr.bf16.mxu1 %v12012_v60 }
 0xa75   : > { %8833 = vmatpush3.bf16.msra.mxu0 %v9842_v63  ;;  %8869 = vmatpush3.bf16.msra.mxu1 %v9843_v32 }
 0xa76   : > { %8850 = vmatprep.subr.bf16.mxu0 %v12012_v60  ;;  %8886 = vmatprep.subr.bf16.mxu1 %v12012_v60 }
 0xa78   : > { %8835 = vmatmul.mubr.msk.bf16.vlgmr.msra.gmra.mrb[80].mxu0 %vm6052_vm9, %v11825_v31  ;;  %8871 = vmatmul.mubr.msk.bf16.vlgmr.msra.gmra.mrb[44].mxu1 %vm6052_vm9, %v6720_v15 }
 0xa79   : > { %8851 = vmatpush3.bf16.msra.mxu0 %v9844_v28  ;;  %8887 = vmatpush3.bf16.msra.mxu1 %v9845_v0 }
 0xa7a   : > { %8852 = vmatprep.subr.bf16.mxu0 %v12012_v60  ;;  %8888 = vmatprep.subr.bf16.mxu1 %v12012_v60 }
 0xa7b   : > { %8858 = vmatprep.mubr.msk.bf16.mxu0 %vm10051_vm0, %v12012_v60  ;;  %8894 = vmatprep.mubr.msk.bf16.mxu1 %vm10051_vm0, %v12012_v60 }
 0xa7d   : > { %8853 = vmatpush3.bf16.msra.mxu0 %v9846_v1  ;;  %8889 = vmatpush3.bf16.msra.mxu1 %v9847_v34 }
 0xa7e   : > { %8854 = vmatprep.subr.bf16.mxu0 %v12012_v60  ;;  %8890 = vmatprep.subr.bf16.mxu1 %v12012_v60 }
 0xa81   : > { %8855 = vmatpush3.bf16.msra.mxu0 %v9848_v61  ;;  %8891 = vmatpush3.bf16.msra.mxu1 %v9849_v30 }
 0xa82   : > { %8856 = vmatprep.subr.bf16.mxu0 %v12012_v60  ;;  %8892 = vmatprep.subr.bf16.mxu1 %v12012_v60 }
 0xa85   : > { %8857 = vmatpush3.bf16.msra.mxu0 %v9850_v59  ;;  %8893 = vmatpush3.bf16.msra.mxu1 %v9851_v14  ;;  %v7020_v59 = vld [vmem:[%s11964_s9 + $0x6] ss:$0 sm:$0xff] }
 0xa86   : > { %8874 = vmatprep.subr.bf16.mxu0 %v12012_v60  ;;  %8910 = vmatprep.subr.bf16.mxu1 %v12012_v60 }
 0xa88   : > { %8859 = vmatmul.mubr.msk.bf16.vlgmr.msra.gmra.mrb[84].mxu0 %vm6052_vm9, %v6643_v27  ;;  %8895 = vmatmul.mubr.msk.bf16.vlgmr.msra.gmra.mrb[48].mxu1 %vm6052_vm9, %v6874_v51 }
 0xa89   : > { %8875 = vmatpush3.bf16.msra.mxu0 %v9852_v50  ;;  %8882 = vmatprep.mubr.msk.bf16.mxu0 %vm10051_vm0, %v12012_v60 }
 0xa8a   : > { %8876 = vmatprep.subr.bf16.mxu0 %v12012_v60  ;;  %8926 = vmatprep.mubr.msk.bf16.mxu1 %vm10051_vm0, %v12012_v60 }
 0xa8b   : > { %8911 = vmatpush3.bf16.msra.mxu1 %v9860_v45  ;;  %v9879_v45 = vld [vmem:[#allocation7 + $0x98] sm:$0xff]  }
 0xa8c   : > { %8912 = vmatprep.subr.bf16.mxu1 %v12012_v60 }
 0xa8d   : > { %8877 = vmatpush3.bf16.msra.mxu0 %v9853_v43 }
 0xa8e   : > { %8878 = vmatprep.subr.bf16.mxu0 %v12012_v60 }
 0xa8f   : > { %8913 = vmatpush3.bf16.msra.mxu1 %v9861_v12  ;;  %v9880_v12 = vld [vmem:[#allocation7 + $0xa0] sm:$0xff]  }
 0xa90   : > { %8914 = vmatprep.subr.bf16.mxu1 %v12012_v60 }
 0xa91   : > { %8879 = vmatpush3.bf16.msra.mxu0 %v9854_v36 }
 0xa92   : > { %8880 = vmatprep.subr.bf16.mxu0 %v12012_v60 }
 0xa93   : > { %8915 = vmatpush3.bf16.msra.mxu1 %v9862_v38  ;;  %v9881_v38 = vld [vmem:[#allocation7 + $0xa8] sm:$0xff]  }
 0xa94   : > { %8916 = vmatprep.subr.bf16.mxu1 %v12012_v60 }
 0xa95   : > { %8881 = vmatpush3.bf16.msra.mxu0 %v9855_v35 }
 0xa96   : > { %8898 = vmatprep.subr.bf16.mxu0 %v12012_v60 }
 0xa97   : > { %8917 = vmatpush3.bf16.msra.mxu1 %v9863_v54  ;;  %v7042_v54 = vld [vmem:[%s11964_s9 + $0x7] ss:$0 sm:$0xff] }
 0xa98   : > { %8883 = vmatmul.mubr.msk.bf16.vlgmr.msra.gmra.mrb[88].mxu0 %vm6052_vm9, %v6797_v2  ;;  %8918 = vmatprep.subr.bf16.mxu1 %v12012_v60  ;;  %v9874_v2 = vld [vmem:[#allocation7 + $0x70] sm:$0xff]  }
 0xa99   : > { %8899 = vmatpush3.bf16.msra.mxu0 %v9856_v17  ;;  %8906 = vmatprep.mubr.msk.bf16.mxu0 %vm10051_vm0, %v12012_v60 }
 0xa9a   : > { %8900 = vmatprep.subr.bf16.mxu0 %v12012_v60 }
 0xa9b   : > { %8919 = vmatpush3.bf16.msra.mxu1 %v9864_v21 }
 0xa9c   : > { %8920 = vmatprep.subr.bf16.mxu1 %v12012_v60 }
 0xa9d   : > { %8901 = vmatpush3.bf16.msra.mxu0 %v9857_v13  ;;  %v9875_v13 = vld [vmem:[#allocation7 + $0x78] sm:$0xff]  }
 0xa9e   : > { %8902 = vmatprep.subr.bf16.mxu0 %v12012_v60 }
 0xa9f   : > { %8921 = vmatpush3.bf16.msra.mxu1 %v9865_v16 }
 0xaa0   : > { %8922 = vmatprep.subr.bf16.mxu1 %v12012_v60 }
 0xaa1   : > { %8903 = vmatpush3.bf16.msra.mxu0 %v9858_v22  ;;  %v9876_v22 = vld [vmem:[#allocation7 + $0x80] sm:$0xff]  }
 0xaa2   : > { %8904 = vmatprep.subr.bf16.mxu0 %v12012_v60 }
 0xaa3   : > { %8923 = vmatpush3.bf16.msra.mxu1 %v9866_v6 }
 0xaa4   : > { %8924 = vmatprep.subr.bf16.mxu1 %v12012_v60 }
 0xaa5   : > { %8905 = vmatpush3.bf16.msra.mxu0 %v9859_v3  ;;  %v9877_v3 = vld [vmem:[#allocation7 + $0x88] sm:$0xff]  }
 0xaa6   : > { %8930 = vmatprep.subr.bf16.mxu0 %v12012_v60 }
 0xaa7   : > { %8925 = vmatpush3.bf16.msra.mxu1 %v9867_v49 }
 0xaa8   : > { %8907 = vmatmul.mubr.msk.bf16.vlgmr.msra.gmra.mrb[92].mxu0 %vm6052_vm9, %v6951_v56  ;;  %8950 = vmatprep.subr.bf16.mxu1 %v12012_v60  ;;  %v9878_v56 = vld [vmem:[#allocation7 + $0x90] sm:$0xff]  }
 0xaa9   : > { %8946 = vmatprep.mubr.msk.bf16.mxu0 %vm10051_vm0, %v12012_v60  ;;  %8931 = vmatpush3.bf16.msra.mxu0 %v9868_v46 }
 0xaaa   : > { %8932 = vmatprep.subr.bf16.mxu0 %v12012_v60 }
 0xaad   : > { %8933 = vmatpush3.bf16.msra.mxu0 %v9869_v48 }
 0xaae   : > { %8934 = vmatprep.subr.bf16.mxu0 %v12012_v60 }
 0xab1   : > { %8935 = vmatpush3.bf16.msra.mxu0 %v9870_v39 }
 0xab2   : > { %8936 = vmatprep.subr.bf16.mxu0 %v12012_v60 }
 0xab5   : > { %8937 = vmatpush3.bf16.msra.mxu0 %v9871_v9 }
 0xab6   : > { %8938 = vmatprep.subr.bf16.mxu0 %v12012_v60 }
 0xab9   : > { %8939 = vmatpush3.bf16.msra.mxu0 %v9872_v20  ;;  %v9882_v20 = vld [vmem:[#allocation7 + $0xb0] sm:$0xff]  }
 0xaba   : > { %8940 = vmatprep.subr.bf16.mxu0 %v12012_v60 }
 0xabd   : > { %8941 = vmatpush3.bf16.msra.mxu0 %v9873_v40  ;;  %v9883_v40 = vld [vmem:[#allocation7 + $0xb8] sm:$0xff]  }
 0xabe   : > { %8942 = vmatprep.subr.bf16.mxu0 %v12012_v60 }
 0xac1   : > { %8943 = vmatpush3.bf16.msra.mxu0 %v9874_v2 }
 0xac2   : > { %8944 = vmatprep.subr.bf16.mxu0 %v12012_v60 }
 0xac5   : > { %8945 = vmatpush3.bf16.msra.mxu0 %v9875_v13 }
 0xac6   : > { %8970 = vmatprep.subr.bf16.mxu0 %v12012_v60 }
 0xb3b   : > { %v6485_v37 = vpop.f32.mrb[76].mxu0  ;;  %v6628_v19 = vpop.f32.mrb[40].mxu1 }
 0xb3c   : > { %v8824_v47 = vpop.f32.mrb[77].mxu0  ;;  %v8848_v8 = vpop.f32.mrb[41].mxu1 }
 0xb3d   : > { %v6488_v26 = vpop.f32.mrb[78].mxu0  ;;  %v6631_v29 = vpop.f32.mrb[42].mxu1  ;;  %v9886_v47 = vld [vmem:[#allocation7 + $0xd0] sm:$0xff]   ;;  %v9887_v8 = vld [vmem:[#allocation7 + $0xd8] sm:$0xff]  }
 0xb3e   : > { %v8825_v11 = vpop.f32.mrb[79].mxu0  ;;  %v8849_v58 = vpop.f32.mrb[43].mxu1  ;;  %v9888_v26 = vld [vmem:[#allocation7 + $0xe0] sm:$0xff]   ;;  %v9889_v29 = vld [vmem:[#allocation7 + $0xe8] sm:$0xff]  }
 0xb3f   : > { %v7151_v11 = vld [vmem:[%s11964_s9 + $0x10] ss:$0 sm:$0xff] }
 0xb4b   : > { %v6551_v24 = vpop.f32.mrb[80].mxu0  ;;  %v6782_v62 = vpop.f32.mrb[44].mxu1 }
 0xb4c   : > { %v6552_v25 = vadd.f32 %v6551_v24, %v6485_v37  ;;  %v8836_v57 = vpop.f32.mrb[81].mxu0  ;;  %v8872_v53 = vpop.f32.mrb[45].mxu1  ;;  %v9884_v37 = vld [vmem:[#allocation7 + $0xc0] sm:$0xff]  }
 0xb4d   : > { %v6554_v33 = vpop.f32.mrb[82].mxu0  ;;  %v6785_v7 = vpop.f32.mrb[46].mxu1 }
 0xb4e   : > { %v8837_v42 = vpop.f32.mrb[83].mxu0  ;;  %v8873_v52 = vpop.f32.mrb[47].mxu1  ;;  %v6634_v31 = vadd.f32 %v6628_v19, %v6552_v25  ;;  %v9885_v19 = vld [vmem:[#allocation7 + $0xc8] sm:$0xff]  }
 0xb4f   : > { %v9890_v42 = vld [vmem:[#allocation7 + $0xf0] sm:$0xff]   ;;  %v9891_v52 = vld [vmem:[#allocation7 + $0xf8] sm:$0xff]  }
 0xb5b   : > { %v6705_v5 = vpop.f32.mrb[84].mxu0  ;;  %v6936_v18 = vpop.f32.mrb[48].mxu1 }
 0xb5c   : > { %v6711_v23 = vadd.f32 %v6705_v5, %v6634_v31  ;;  %v8860_v4 = vpop.f32.mrb[85].mxu0  ;;  %v8896_v10 = vpop.f32.mrb[49].mxu1  ;;  %v9892_v31 = vld [vmem:[#allocation7 + $0x100] sm:$0xff]   ;;  %v9893_v5 = vld [vmem:[#allocation7 + $0x108] sm:$0xff]  }
 0xb5d   : > { %v6708_v41 = vpop.f32.mrb[86].mxu0  ;;  %v6939_v44 = vpop.f32.mrb[50].mxu1  ;;  %v9896_v4 = vld [vmem:[#allocation7 + $0x120] sm:$0xff]   ;;  %v9897_v10 = vld [vmem:[#allocation7 + $0x128] sm:$0xff]  }
 0xb5e   : > { %v8861_v55 = vpop.f32.mrb[87].mxu0  ;;  %v8897_v63 = vpop.f32.mrb[51].mxu1  ;;  %v6788_v32 = vadd.f32 %v6782_v62, %v6711_v23  ;;  %v9895_v23 = vld [vmem:[#allocation7 + $0x118] sm:$0xff]   ;;  %v7260_v41 = vld [vmem:[%s11964_s9 + $0x11] ss:$0 sm:$0xff] }
 0xb6b   : > { %v6859_v28 = vpop.f32.mrb[88].mxu0 }
 0xb6c   : > { %v6865_v0 = vadd.f32 %v6859_v28, %v6788_v32  ;;  %v8884_v15 = vpop.f32.mrb[89].mxu0 }
 0xb6d   : > { %v6862_v1 = vpop.f32.mrb[90].mxu0 }
 0xb6e   : > { %v8885_v34 = vpop.f32.mrb[91].mxu0  ;;  %v6942_v61 = vadd.f32 %v6936_v18, %v6865_v0  ;;  %v9894_v18 = vld [vmem:[#allocation7 + $0x110] sm:$0xff]  }
 0xb6f   : > { %v9898_v34 = vld [vmem:[#allocation7 + $0x130] sm:$0xff]  }
 0xb7b   : > { %v7013_v30 = vpop.f32.mrb[92].mxu0 }
 0xb7c   : > { %v7019_v14 = vadd.f32 %v7013_v30, %v6942_v61  ;;  %v8908_v50 = vpop.f32.mrb[93].mxu0  ;;  %v9899_v61 = vld [vmem:[#allocation7 + $0x138] sm:$0xff]   ;;  %v7369_v30 = vld [vmem:[%s11964_s9 + $0x12] ss:$0 sm:$0xff] }
 0xb7d   : > { %v7016_v27 = vpop.f32.mrb[94].mxu0 }
 0xb7e   : > { %v7021_v51 = vadd.f32 %v7020_v59, %v7019_v14  ;;  %v8909_v43 = vpop.f32.mrb[95].mxu0 }
 0xb80   : > { %vm7022_vm3 = vcmp.gt.f32.partialorder %v7021_v51, 0.0  ;;  %v7023_v36 = vmul.f32 0.01, %v7021_v51 }
 0xb82   : > { %v7024_v35 = vsel %vm7022_vm3, %v7021_v51, %v7023_v36 }
 0xb83   : > { %v7041_v17 = vpack.c.bf16 %v7024_v35, %v7024_v35 }
 0xb85   : > { %8927 = vmatmul.mubr.bf16.vlgmr.msra.gmra.mrb[52].mxu1 %v7041_v17  ;;  %v7478_v17 = vld [vmem:[%s11964_s9 + $0x13] ss:$0 sm:$0xff] }
 0xb86   : > { %8966 = vmatprep.mubr.msk.bf16.mxu1 %vm10051_vm0, %v12012_v60  ;;  %8951 = vmatpush3.bf16.msra.mxu1 %v9876_v22 }
 0xb87   : > { %8952 = vmatprep.subr.bf16.mxu1 %v12012_v60 }
 0xb8a   : > { %8953 = vmatpush3.bf16.msra.mxu1 %v9877_v3 }
 0xb8b   : > { %8954 = vmatprep.subr.bf16.mxu1 %v12012_v60 }
 0xb8e   : > { %8955 = vmatpush3.bf16.msra.mxu1 %v9878_v56 }
 0xb8f   : > { %8956 = vmatprep.subr.bf16.mxu1 %v12012_v60 }
 0xb92   : > { %8957 = vmatpush3.bf16.msra.mxu1 %v9879_v45 }
 0xb93   : > { %8958 = vmatprep.subr.bf16.mxu1 %v12012_v60 }
 0xb96   : > { %8959 = vmatpush3.bf16.msra.mxu1 %v9880_v12 }
 0xb97   : > { %8960 = vmatprep.subr.bf16.mxu1 %v12012_v60 }
 0xb9a   : > { %8961 = vmatpush3.bf16.msra.mxu1 %v9881_v38 }
 0xb9b   : > { %8962 = vmatprep.subr.bf16.mxu1 %v12012_v60 }
 0xb9e   : > { %8963 = vmatpush3.bf16.msra.mxu1 %v9882_v20 }
 0xb9f   : > { %8964 = vmatprep.subr.bf16.mxu1 %v12012_v60 }
 0xba2   : > { %8965 = vmatpush3.bf16.msra.mxu1 %v9883_v40 }
 0xba3   : > { %8990 = vmatprep.subr.bf16.mxu1 %v12012_v60 }
 0xc58   : > { %v7125_v21 = vpop.f32.mrb[52].mxu1 }
 0xc59   : > { %v7126_v16 = vadd.f32 %v7125_v21, %v7042_v54  ;;  %v8928_v6 = vpop.f32.mrb[53].mxu1 }
 0xc5a   : > { %v7128_v49 = vpop.f32.mrb[54].mxu1 }
 0xc5b   : > { %vm7131_vm4 = vcmp.gt.f32.partialorder %v7126_v16, 0.0  ;;  %v7132_v46 = vmul.f32 0.01, %v7126_v16  ;;  %v8929_v48 = vpop.f32.mrb[55].mxu1 }
 0xc5d   : > { %v7133_v39 = vsel %vm7131_vm4, %v7126_v16, %v7132_v46 }
 0xc5e   : > { %v7150_v9 = vpack.c.bf16 %v7133_v39, %v7133_v39 }
 0xc60   : > { %8947 = vmatmul.mubr.bf16.vlgmr.msra.gmra.mrb[96].mxu0 %v7150_v9 }
 0xc61   : > { %8986 = vmatprep.mubr.msk.bf16.mxu0 %vm10051_vm0, %v12012_v60  ;;  %8971 = vmatpush3.bf16.msra.mxu0 %v9884_v37 }
 0xc62   : > { %8972 = vmatprep.subr.bf16.mxu0 %v12012_v60 }
 0xc65   : > { %8973 = vmatpush3.bf16.msra.mxu0 %v9885_v19 }
 0xc66   : > { %8974 = vmatprep.subr.bf16.mxu0 %v12012_v60 }
 0xc69   : > { %8975 = vmatpush3.bf16.msra.mxu0 %v9886_v47 }
 0xc6a   : > { %8976 = vmatprep.subr.bf16.mxu0 %v12012_v60 }
 0xc6d   : > { %8977 = vmatpush3.bf16.msra.mxu0 %v9887_v8 }
 0xc6e   : > { %8978 = vmatprep.subr.bf16.mxu0 %v12012_v60 }
 0xc71   : > { %8979 = vmatpush3.bf16.msra.mxu0 %v9888_v26 }
 0xc72   : > { %8980 = vmatprep.subr.bf16.mxu0 %v12012_v60 }
 0xc75   : > { %8981 = vmatpush3.bf16.msra.mxu0 %v9889_v29 }
 0xc76   : > { %8982 = vmatprep.subr.bf16.mxu0 %v12012_v60 }
 0xc79   : > { %8983 = vmatpush3.bf16.msra.mxu0 %v9890_v42 }
 0xc7a   : > { %8984 = vmatprep.subr.bf16.mxu0 %v12012_v60 }
 0xc7d   : > { %8985 = vmatpush3.bf16.msra.mxu0 %v9891_v52 }
 0xd33   : > { %v7234_v58 = vpop.f32.mrb[96].mxu0 }
 0xd34   : > { %v7235_v24 = vadd.f32 %v7234_v58, %v7151_v11  ;;  %v8948_v62 = vpop.f32.mrb[97].mxu0 }
 0xd35   : > { %v7237_v25 = vpop.f32.mrb[98].mxu0 }
 0xd36   : > { %vm7240_vm5 = vcmp.gt.f32.partialorder %v7235_v24, 0.0  ;;  %v7241_v57 = vmul.f32 0.01, %v7235_v24  ;;  %v8949_v53 = vpop.f32.mrb[99].mxu0 }
 0xd38   : > { %v7242_v33 = vsel %vm7240_vm5, %v7235_v24, %v7241_v57 }
 0xd39   : > { %v7259_v7 = vpack.c.bf16 %v7242_v33, %v7242_v33 }
 0xd3b   : > { %8967 = vmatmul.mubr.bf16.vlgmr.msra.gmra.mrb[56].mxu1 %v7259_v7 }
 0xd3c   : > { %9006 = vmatprep.mubr.msk.bf16.mxu1 %vm10051_vm0, %v12012_v60  ;;  %8991 = vmatpush3.bf16.msra.mxu1 %v9892_v31 }
 0xd3d   : > { %8992 = vmatprep.subr.bf16.mxu1 %v12012_v60 }
 0xd40   : > { %8993 = vmatpush3.bf16.msra.mxu1 %v9893_v5 }
 0xd41   : > { %8994 = vmatprep.subr.bf16.mxu1 %v12012_v60 }
 0xd44   : > { %8995 = vmatpush3.bf16.msra.mxu1 %v9894_v18 }
 0xd45   : > { %8996 = vmatprep.subr.bf16.mxu1 %v12012_v60 }
 0xd48   : > { %8997 = vmatpush3.bf16.msra.mxu1 %v9895_v23 }
 0xd49   : > { %8998 = vmatprep.subr.bf16.mxu1 %v12012_v60 }
 0xd4c   : > { %8999 = vmatpush3.bf16.msra.mxu1 %v9896_v4 }
 0xd4d   : > { %9000 = vmatprep.subr.bf16.mxu1 %v12012_v60 }
 0xd50   : > { %9001 = vmatpush3.bf16.msra.mxu1 %v9897_v10 }
 0xd51   : > { %9002 = vmatprep.subr.bf16.mxu1 %v12012_v60 }
 0xd54   : > { %9003 = vmatpush3.bf16.msra.mxu1 %v9898_v34 }
 0xd55   : > { %9004 = vmatprep.subr.bf16.mxu1 %v12012_v60 }
 0xd58   : > { %9005 = vmatpush3.bf16.msra.mxu1 %v9899_v61 }
 0xe0e   : > { %v7343_v44 = vpop.f32.mrb[56].mxu1 }
 0xe0f   : > { %v7344_v55 = vadd.f32 %v7343_v44, %v7260_v41  ;;  %v8968_v63 = vpop.f32.mrb[57].mxu1 }
 0xe10   : > { %v7346_v32 = vpop.f32.mrb[58].mxu1 }
 0xe11   : > { %vm7349_vm6 = vcmp.gt.f32.partialorder %v7344_v55, 0.0  ;;  %v7350_v28 = vmul.f32 0.01, %v7344_v55  ;;  %v8969_v0 = vpop.f32.mrb[59].mxu1 }
 0xe13   : > { %v7351_v15 = vsel %vm7349_vm6, %v7344_v55, %v7350_v28 }
 0xe14   : > { %v7368_v1 = vpack.c.bf16 %v7351_v15, %v7351_v15 }
 0xe16   : > { %8987 = vmatmul.mubr.bf16.vlgmr.msra.gmra.mrb[100].mxu0 %v7368_v1 }
 0xee9   : > { %v7452_v59 = vpop.f32.mrb[100].mxu0 }
 0xeea   : > { %v7453_v14 = vadd.f32 %v7452_v59, %v7369_v30  ;;  %v8988_v50 = vpop.f32.mrb[101].mxu0 }
 0xeeb   : > { %v7455_v27 = vpop.f32.mrb[102].mxu0 }
 0xeec   : > { %vm7458_vm10 = vcmp.gt.f32.partialorder %v7453_v14, 0.0  ;;  %v7459_v51 = vmul.f32 0.01, %v7453_v14  ;;  %v8989_v43 = vpop.f32.mrb[103].mxu0 }
 0xeee   : > { %v7460_v36 = vsel %vm7458_vm10, %v7453_v14, %v7459_v51 }
 0xeef   : > { %v7477_v35 = vpack.c.bf16 %v7460_v36, %v7460_v36 }
 0xef1   : > { %9007 = vmatmul.mubr.bf16.vlgmr.msra.gmra.mrb[60].mxu1 %v7477_v35 }
 0xfc4   : > { %v7561_v60 = vpop.f32.mrb[60].mxu1 }
 0xfc5   : > { %v7562_v2 = vadd.f32 %v7561_v60, %v7478_v17  ;;  %v9008_v13 = vpop.f32.mrb[61].mxu1 }
 0xfc6   : > { %v7564_v22 = vpop.f32.mrb[62].mxu1 }
 0xfc7   : > { %7567 = vst [vmem:[%s414_s24] sm:$0x1] %v7562_v2  ;;  %v9009_v3 = vpop.f32.mrb[63].mxu1 }
 0xfc8 PF: > { %s23_s13 = sadd.s32 1, %s10030_s13  }
 0xfc9   : > { %p20_p1 = scmp.ge.s32.totalorder %s23_s13, 4  }
 0xfcb   :  { %22 = sbr.rel (!%p20_p1) target bundleno = 3 (0x3), region = 108 }
 0xfd2   :  { %7585 = vsyncpa [#allocation3], 1 }
 0xfd3   :  { %7587 = vsyncpa [#allocation3 + $0x1], 1 }
 0xfd4   :  { %7588 = vsyncpa [#allocation5], 1 }
 0xfd5   :  { %7589 = vsyncpa [#allocation8], 1 }

</bundles_post_ra>
